<compile_context>
chip_gen: v6e
topology: v6e:2x2x1
jax: 0.10.0
libtpu: 0.0.40
codegen_flags: <defaults>
</compile_context>

<pallas_src>
import functools
import math

import jax
import jax.numpy as jnp
from jax import lax
from jax.experimental import pallas as pl
from jax.experimental.pallas import tpu as pltpu

LN_EPS = 1e-5

PARAM_NAMES = [
    # self-attention: fused qkv (scale folded into Q), out-proj (D,D), layer norm
    "sqkv_w", "sqkv_b", "so_w", "so_b", "ln1_g", "ln1_b",
    # encoder-decoder attention: q (scale folded), fused kv, out-proj (D,D), layer norm
    "cq_w", "cq_b", "ckv_w", "ckv_b", "co_w", "co_b", "ln2_g", "ln2_b",
    # feed-forward + final layer norm
    "fc1_w", "fc1_b", "fc2_w", "fc2_b", "ln3_g", "ln3_b",
]


# --------------------------------------------------------------------------------------
# small math helpers
# --------------------------------------------------------------------------------------
def _layer_norm(h, g, b):
    mu = jnp.mean(h, axis=-1, keepdims=True)
    d = h - mu
    var = jnp.mean(d * d, axis=-1, keepdims=True)
    return d * lax.rsqrt(var + LN_EPS) * g + b


def _softmax_last(s, approx_recip):
    m = jnp.max(s, axis=-1, keepdims=True)
    e = jnp.exp(s - m)
    den = jnp.sum(e, axis=-1, keepdims=True)
    if approx_recip:
        return e * pl.reciprocal(den, approx=True)
    return e / den


# --------------------------------------------------------------------------------------
# in-kernel head staging (cheap lane-slab stores instead of concatenate / 3-D transpose)
# --------------------------------------------------------------------------------------
def _split_heads_to_slab(arr, slab_ref, n_batch, n_heads, seq_len, head_dim):
    """arr: (n_batch*seq_len, n_heads*head_dim) f32 value -> bf16 VALUE (n_batch*n_heads, seq_len, hd).

    The return is a value load (ref[...]) taken immediately after the writes, so reusing
    the same slab later (e.g. cross-attention after self-attention) cannot corrupt it."""
    a = arr.astype(slab_ref.dtype)
    for b in range(n_batch):
        for h in range(n_heads):
            slab_ref[b * n_heads + h, :seq_len, :] = a[
                b * seq_len:(b + 1) * seq_len, h * head_dim:(h + 1) * head_dim]
    return slab_ref[:, :seq_len, :]


def _merge_heads_from_slab(ctx, slab_ref, n_batch, n_heads, seq_len, head_dim):
    """ctx: (n_batch*n_heads, seq_len, hd) f32 -> bf16 VALUE (n_batch*seq_len, D)."""
    c = ctx.astype(slab_ref.dtype)
    for b in range(n_batch):
        for h in range(n_heads):
            slab_ref[b * seq_len:(b + 1) * seq_len,
                     h * head_dim:(h + 1) * head_dim] = c[b * n_heads + h]
    return slab_ref[...]


# --------------------------------------------------------------------------------------
# Pallas kernel
# --------------------------------------------------------------------------------------
def decoder_layer_kernel(num_heads, causal, need_attn, compute_dtype,
                         x_ref, enc_ref, *refs):
    n_p = len(PARAM_NAMES)
    param_refs = refs[:n_p]
    rest = refs[n_p:]
    if need_attn:
        out_ref, attn_ref = rest[0], rest[1]
        q_slab, k_slab, v_slab, ctx_slab = rest[2], rest[3], rest[4], rest[5]
    else:
        out_ref, attn_ref = rest[0], None
        q_slab, k_slab, v_slab, ctx_slab = rest[1], rest[2], rest[3], rest[4]

    # keep params as refs; load each at its use site to keep live ranges short
    p = dict(zip(PARAM_NAMES, param_refs))

    Bb, T, D = x_ref.shape
    S = enc_ref.shape[1]
    H = num_heads
    hd = D // H
    cd = compute_dtype

    x2 = x_ref[...].reshape(Bb * T, D)       # (Bb*T, D) f32
    enc2 = enc_ref[...].reshape(Bb * S, D)   # (Bb*S, D) f32

    # ---------------- self attention (post-norm, causal; 1/sqrt(hd) folded into Wq) ----
    residual = x2
    qkv = jnp.dot(x2.astype(cd), p["sqkv_w"][...],
                  preferred_element_type=jnp.float32) + p["sqkv_b"][...]   # (Bb*T, 3D)
    qh = _split_heads_to_slab(qkv[:, :D], q_slab, Bb, H, T, hd)
    kh = _split_heads_to_slab(qkv[:, D:2 * D], k_slab, Bb, H, T, hd)
    vh = _split_heads_to_slab(qkv[:, 2 * D:], v_slab, Bb, H, T, hd)
    s = jnp.einsum("gtd,gsd->gts", qh, kh,
                   preferred_element_type=jnp.float32)                     # (Bb*H, T, T)
    if causal:
        rows = lax.broadcasted_iota(jnp.int32, (T, T), 0)
        cols = lax.broadcasted_iota(jnp.int32, (T, T), 1)
        s = jnp.where((cols <= rows)[None, :, :], s, -1e9)                 # fused mask
    probs = _softmax_last(s, True)
    ctx = jnp.einsum("gts,gsd->gtd", probs.astype(cd), vh,
                     preferred_element_type=jnp.float32)                   # (Bb*H, T, hd)
    merged = _merge_heads_from_slab(ctx, ctx_slab, Bb, H, T, hd)           # (Bb*T, D) bf16
    h_sa = jnp.dot(merged, p["so_w"][...],
                   preferred_element_type=jnp.float32) + p["so_b"][...]
    x2 = _layer_norm(residual + h_sa, p["ln1_g"][...], p["ln1_b"][...])

    # ---------------- encoder-decoder attention ----------------
    residual = x2
    q = jnp.dot(x2.astype(cd), p["cq_w"][...],
                preferred_element_type=jnp.float32) + p["cq_b"][...]       # (Bb*T, D)
    kv = jnp.dot(enc2.astype(cd), p["ckv_w"][...],
                 preferred_element_type=jnp.float32) + p["ckv_b"][...]     # (Bb*S, 2D)
    qh = _split_heads_to_slab(q, q_slab, Bb, H, T, hd)
    kh = _split_heads_to_slab(kv[:, :D], k_slab, Bb, H, S, hd)
    vh = _split_heads_to_slab(kv[:, D:], v_slab, Bb, H, S, hd)
    s = jnp.einsum("gtd,gsd->gts", qh, kh,
                   preferred_element_type=jnp.float32)                     # (Bb*H, T, S)
    probs = _softmax_last(s, True)
    ctx = jnp.einsum("gts,gsd->gtd", probs.astype(cd), vh,
                     preferred_element_type=jnp.float32)
    merged = _merge_heads_from_slab(ctx, ctx_slab, Bb, H, T, hd)
    h_ca = jnp.dot(merged, p["co_w"][...],
                   preferred_element_type=jnp.float32) + p["co_b"][...]
    x2 = _layer_norm(residual + h_ca, p["ln2_g"][...], p["ln2_b"][...])
    if need_attn:
        attn_ref[...] = jnp.mean(probs.reshape(Bb, H, T, S), axis=1)       # head average

    # ---------------- feed-forward ----------------
    residual = x2
    h1 = jnp.maximum(jnp.dot(x2.astype(cd), p["fc1_w"][...],
                             preferred_element_type=jnp.float32) + p["fc1_b"][...], 0.0)
    h2 = jnp.dot(h1.astype(cd), p["fc2_w"][...],
                 preferred_element_type=jnp.float32) + p["fc2_b"][...]
    x2 = _layer_norm(residual + h2, p["ln3_g"][...], p["ln3_b"][...])

    out_ref[...] = x2.reshape(Bb, T, D)


# --------------------------------------------------------------------------------------
# parameter fusion (once, in the wrapper): fused QKV / KV, scale folded into Q, bf16 weights
# --------------------------------------------------------------------------------------
def fuse_params(params, num_heads, compute_dtype=jnp.bfloat16):
    D = params["sq_w"].shape[0]
    hd = D // num_heads
    scale = 1.0 / math.sqrt(hd)
    cd = compute_dtype
    f32 = jnp.float32
    f = {}
    f["sqkv_w"] = jnp.concatenate(
        [params["sq_w"] * scale, params["sk_w"], params["sv_w"]], 1).astype(cd)
    f["sqkv_b"] = jnp.concatenate(
        [params["sq_b"] * scale, params["sk_b"], params["sv_b"]], 1).astype(f32)
    f["so_w"] = params["so_w"].astype(cd)                 # keep (D, D): single K=D matmul
    f["so_b"] = params["so_b"].astype(f32)
    f["ln1_g"], f["ln1_b"] = params["ln1_g"].astype(f32), params["ln1_b"].astype(f32)
    f["cq_w"] = (params["cq_w"] * scale).astype(cd)
    f["cq_b"] = (params["cq_b"] * scale).astype(f32)
    f["ckv_w"] = jnp.concatenate([params["ck_w"], params["cv_w"]], 1).astype(cd)
    f["ckv_b"] = jnp.concatenate([params["ck_b"], params["cv_b"]], 1).astype(f32)
    f["co_w"] = params["co_w"].astype(cd)
    f["co_b"] = params["co_b"].astype(f32)
    f["ln2_g"], f["ln2_b"] = params["ln2_g"].astype(f32), params["ln2_b"].astype(f32)
    f["fc1_w"], f["fc1_b"] = params["fc1_w"].astype(cd), params["fc1_b"].astype(f32)
    f["fc2_w"], f["fc2_b"] = params["fc2_w"].astype(cd), params["fc2_b"].astype(f32)
    f["ln3_g"], f["ln3_b"] = params["ln3_g"].astype(f32), params["ln3_b"].astype(f32)
    return f


def _largest_divisor_leq(n, cap):
    cap = max(1, min(n, cap))
    for d in range(cap, 0, -1):
        if n % d == 0:
            return d
    return 1


# --------------------------------------------------------------------------------------
# wrappers
# --------------------------------------------------------------------------------------
def transformer_decoder_layer_btd(x_btd, enc_bsd, params, num_heads, *,
                                  causal=True, need_attn=True,
                                  compute_dtype=jnp.bfloat16, batch_block=None):
    """Batch-major fast path.  x_btd: (B, T, D) f32, enc_bsd: (B, S, D) f32."""
    B, T, D = x_btd.shape
    S = enc_bsd.shape[1]
    assert D % num_heads == 0
    hd = D // num_heads
    Lmax = max(T, S)

    if batch_block is None:
        # pack batches until the linear layers see >=~128 rows on the MXU M dimension
        batch_block = _largest_divisor_leq(B, max(1, 128 // max(T, 1)))
    assert B % batch_block == 0, "batch_block must divide the batch size"
    Bb = batch_block

    fused = fuse_params(params, num_heads, compute_dtype)
    param_arrays = [fused[n] for n in PARAM_NAMES]

    def seq_spec(shape):
        return pl.BlockSpec((Bb,) + tuple(shape[1:]), lambda g: (g, 0, 0))

    def param_spec(a):
        nd = a.ndim
        # constant index map -> never re-fetched; single-buffer to avoid 2x VMEM
        return pl.BlockSpec(a.shape, lambda g, _nd=nd: (0,) * _nd,
                            pipeline_mode=pl.Buffered(1))

    in_specs = [seq_spec(x_btd.shape), seq_spec(enc_bsd.shape)]
    in_specs += [param_spec(a) for a in param_arrays]

    y_shape = jax.ShapeDtypeStruct((B, T, D), jnp.float32)
    y_spec = pl.BlockSpec((Bb, T, D), lambda g: (g, 0, 0))
    if need_attn:
        out_shape = (y_shape, jax.ShapeDtypeStruct((B, T, S), jnp.float32))
        out_specs = (y_spec, pl.BlockSpec((Bb, T, S), lambda g: (g, 0, 0)))
    else:
        out_shape = y_shape
        out_specs = y_spec

    # bf16 head-staging slabs sized per role + one merged-context slab
    scratch_shapes = [
        pltpu.VMEM((Bb * num_heads, T, hd), compute_dtype),      # q heads
        pltpu.VMEM((Bb * num_heads, Lmax, hd), compute_dtype),   # k heads (self uses :T, cross :S)
        pltpu.VMEM((Bb * num_heads, Lmax, hd), compute_dtype),   # v heads
        pltpu.VMEM((Bb * T, D), compute_dtype),                  # merged attention context
    ]

    # explicit VMEM budget: single-buffered weights + double-buffered blocks + scratch
    cd_bytes = jnp.dtype(compute_dtype).itemsize
    param_bytes = sum(int(a.size) * a.dtype.itemsize for a in param_arrays)
    act_bytes = 2 * 4 * (Bb * T * D * 2 + Bb * S * D)
    if need_attn:
        act_bytes += 2 * 4 * Bb * T * S
    scratch_bytes = cd_bytes * (Bb * num_heads * (T + 2 * Lmax) * hd + Bb * T * D)
    vmem_limit = int(min(max(2 * (param_bytes + act_bytes + scratch_bytes), 16 << 20),
                         64 << 20))

    F = fused["fc1_w"].shape[1]
    flops = 2 * B * (T * D * 3 * D + 3 * T * D * D + 2 * S * D * D
                     + 2 * T * T * D + 2 * T * S * D + 2 * T * D * F)
    transcendentals = B * num_heads * (T * T + T * S)
    bytes_accessed = (param_bytes + 4 * B * (2 * T * D + S * D)
                      + (4 * B * T * S if need_attn else 0))

    outs = pl.pallas_call(
        functools.partial(decoder_layer_kernel, num_heads, causal, need_attn, compute_dtype),
        grid=(B // Bb,),
        in_specs=in_specs,
        out_specs=out_specs,
        out_shape=out_shape,
        scratch_shapes=scratch_shapes,
        compiler_params=pltpu.CompilerParams(
            dimension_semantics=("parallel",),
            vmem_limit_bytes=vmem_limit),
        cost_estimate=pl.CostEstimate(flops=int(flops),
                                      transcendentals=int(transcendentals),
                                      bytes_accessed=int(bytes_accessed)),
    )(x_btd, enc_bsd, *param_arrays)

    if need_attn:
        return outs[0], outs[1]
    return outs, None


def transformer_decoder_layer(x_tbd, enc_sbd, params, num_heads, *,
                              causal=True, need_attn=True,
                              compute_dtype=jnp.bfloat16, batch_block=None):
    """fairseq-layout wrapper.  x_tbd: (T, B, D), enc_sbd: (S, B, D).  Returns
    ((T, B, D) output, head-averaged cross-attn weights (B, T, S) or None)."""
    x_btd = jnp.transpose(x_tbd, (1, 0, 2))
    enc_bsd = jnp.transpose(enc_sbd, (1, 0, 2))
    y_btd, attn = transformer_decoder_layer_btd(
        x_btd, enc_bsd, params, num_heads, causal=causal, need_attn=need_attn,
        compute_dtype=compute_dtype, batch_block=batch_block)
    return jnp.transpose(y_btd, (1, 0, 2)), attn


# --------------------------------------------------------------------------------------
# pure-JAX reference (same fused bf16 weights, exact-division softmax)
# --------------------------------------------------------------------------------------
def reference_decoder_layer(x_btd, enc_bsd, fused, num_heads, *,
                            causal=True, need_attn=True, compute_dtype=jnp.bfloat16):
    B, T, D = x_btd.shape
    S = enc_bsd.shape[1]
    H = num_heads
    hd = D // H
    cd = compute_dtype

    def split(a):                      # (B, L, D) -> (B, H, L, hd)
        Bx, L, _ = a.shape
        return jnp.transpose(a.reshape(Bx, L, H, hd), (0, 2, 1, 3))

    def merge(a):                      # (B, H, T, hd) -> (B, T, D)
        return jnp.transpose(a, (0, 2, 1, 3)).reshape(a.shape[0], T, D)

    def dot(a, w):
        return jnp.einsum("bld,de->ble", a.astype(cd), w.astype(cd),
                          preferred_element_type=jnp.float32)

    # self attention
    residual = x_btd
    qkv = dot(x_btd, fused["sqkv_w"]) + fused["sqkv_b"]
    qh, kh, vh = split(qkv[..., :D]), split(qkv[..., D:2 * D]), split(qkv[..., 2 * D:])
    s = jnp.einsum("bhtd,bhsd->bhts", qh.astype(cd), kh.astype(cd),
                   preferred_element_type=jnp.float32)
    if causal:
        rows = jnp.arange(T)[:, None]
        cols = jnp.arange(T)[None, :]
        s = jnp.where((cols <= rows)[None, None], s, -1e9)
    p = jax.nn.softmax(s, axis=-1)
    ctx = jnp.einsum("bhts,bhsd->bhtd", p.astype(cd), vh.astype(cd),
                     preferred_element_type=jnp.float32)
    h = dot(merge(ctx), fused["so_w"]) + fused["so_b"]
    x = _layer_norm(residual + h, fused["ln1_g"], fused["ln1_b"])

    # cross attention
    residual = x
    q = dot(x, fused["cq_w"]) + fused["cq_b"]
    kv = dot(enc_bsd, fused["ckv_w"]) + fused["ckv_b"]
    qh, kh, vh = split(q), split(kv[..., :D]), split(kv[..., D:])
    s = jnp.einsum("bhtd,bhsd->bhts", qh.astype(cd), kh.astype(cd),
                   preferred_element_type=jnp.float32)
    p = jax.nn.softmax(s, axis=-1)
    ctx = jnp.einsum("bhts,bhsd->bhtd", p.astype(cd), vh.astype(cd),
                     preferred_element_type=jnp.float32)
    h = dot(merge(ctx), fused["co_w"]) + fused["co_b"]
    x = _layer_norm(residual + h, fused["ln2_g"], fused["ln2_b"])
    attn = jnp.mean(p, axis=1) if need_attn else None

    # feed-forward
    residual = x
    h1 = jnp.maximum(dot(x, fused["fc1_w"]) + fused["fc1_b"], 0.0)
    h2 = dot(h1, fused["fc2_w"]) + fused["fc2_b"]
    x = _layer_norm(residual + h2, fused["ln3_g"], fused["ln3_b"])
    return x, attn


# --------------------------------------------------------------------------------------
# demo / correctness check
# --------------------------------------------------------------------------------------
if __name__ == "__main__":
    # NOTE: intentionally tiny demo shapes; real deployments should use hd >= 128 lanes
    # and T/S multiples of 8/128 to avoid masked (low-utilization) lowering.
    T, B, D, H, F, S = 8, 2, 32, 4, 64, 8   # seq, batch, embed, heads, ffn, enc-seq

    key = jax.random.PRNGKey(0)
    ks = iter(jax.random.split(key, 40))

    def lin_w(din, dout):
        return jax.random.normal(next(ks), (din, dout), jnp.float32) / math.sqrt(din)

    def vec(dim, scale=0.02):
        return scale * jax.random.normal(next(ks), (1, dim), jnp.float32)

    params = {}
    for pre in ("s", "c"):                        # self / cross attention projections
        for nm in ("q", "k", "v", "o"):
            params[f"{pre}{nm}_w"] = lin_w(D, D)
            params[f"{pre}{nm}_b"] = vec(D)
    params["fc1_w"] = lin_w(D, F); params["fc1_b"] = vec(F)
    params["fc2_w"] = lin_w(F, D); params["fc2_b"] = vec(D)
    for i in (1, 2, 3):
        params[f"ln{i}_g"] = 1.0 + vec(D)
        params[f"ln{i}_b"] = vec(D)

    x = jax.random.normal(next(ks), (T, B, D), jnp.float32)      # (seq, batch, embed)
    enc = jax.random.normal(next(ks), (S, B, D), jnp.float32)    # encoder_out (src, batch, embed)

    # ---- Pallas kernel (with and without the attention-weights output) ----
    y, attn = transformer_decoder_layer(x, enc, params, H, causal=True, need_attn=True)
    y = jax.block_until_ready(y)
    attn = jax.block_until_ready(attn)

    y_na, attn_none = transformer_decoder_layer(x, enc, params, H,
                                                causal=True, need_attn=False)
    y_na = jax.block_until_ready(y_na)

    # ---- pure-JAX reference ----
    fused = fuse_params(params, H, jnp.bfloat16)
    x_btd = jnp.transpose(x, (1, 0, 2))
    enc_bsd = jnp.transpose(enc, (1, 0, 2))
    y_ref_btd, attn_ref = reference_decoder_layer(x_btd, enc_bsd, fused, H,
                                                  causal=True, need_attn=True)
    y_ref = jnp.transpose(y_ref_btd, (1, 0, 2))

    assert y.shape == (T, B, D) and attn.shape == (B, T, S)
    assert attn_none is None and y_na.shape == (T, B, D)
    assert jnp.allclose(y, y_ref, atol=2e-2, rtol=2e-2), float(jnp.max(jnp.abs(y - y_ref)))
    assert jnp.allclose(attn, attn_ref, atol=2e-2, rtol=2e-2)
    assert jnp.allclose(y_na, y, atol=1e-3, rtol=1e-3)
    print("KERNEL_OK")
</pallas_src>

<mosaic_0001>
module attributes {stable_mosaic.version = 11 : i64} {
  func.func @decoder_layer_kernel(%arg0: i32, %arg1: memref<2x8x32xf32, #tpu.memory_space<vmem>>, %arg2: memref<2x8x32xf32, #tpu.memory_space<vmem>>, %arg3: memref<32x96xbf16, #tpu.memory_space<vmem>>, %arg4: memref<1x96xf32, #tpu.memory_space<vmem>>, %arg5: memref<32x32xbf16, #tpu.memory_space<vmem>>, %arg6: memref<1x32xf32, #tpu.memory_space<vmem>>, %arg7: memref<1x32xf32, #tpu.memory_space<vmem>>, %arg8: memref<1x32xf32, #tpu.memory_space<vmem>>, %arg9: memref<32x32xbf16, #tpu.memory_space<vmem>>, %arg10: memref<1x32xf32, #tpu.memory_space<vmem>>, %arg11: memref<32x64xbf16, #tpu.memory_space<vmem>>, %arg12: memref<1x64xf32, #tpu.memory_space<vmem>>, %arg13: memref<32x32xbf16, #tpu.memory_space<vmem>>, %arg14: memref<1x32xf32, #tpu.memory_space<vmem>>, %arg15: memref<1x32xf32, #tpu.memory_space<vmem>>, %arg16: memref<1x32xf32, #tpu.memory_space<vmem>>, %arg17: memref<32x64xbf16, #tpu.memory_space<vmem>>, %arg18: memref<1x64xf32, #tpu.memory_space<vmem>>, %arg19: memref<64x32xbf16, #tpu.memory_space<vmem>>, %arg20: memref<1x32xf32, #tpu.memory_space<vmem>>, %arg21: memref<1x32xf32, #tpu.memory_space<vmem>>, %arg22: memref<1x32xf32, #tpu.memory_space<vmem>>, %arg23: memref<2x8x32xf32, #tpu.memory_space<vmem>>, %arg24: memref<2x8x8xf32, #tpu.memory_space<vmem>>, %arg25: memref<8x8x8xbf16, #tpu.memory_space<vmem>>, %arg26: memref<8x8x8xbf16, #tpu.memory_space<vmem>>, %arg27: memref<8x8x8xbf16, #tpu.memory_space<vmem>>, %arg28: memref<16x32xbf16, #tpu.memory_space<vmem>>) attributes {dimension_semantics = [#tpu.dimension_semantics<parallel>], iteration_bounds = array<i64: 1>, scalar_prefetch = 0 : i64, scratch_operands = 4 : i64, tpu.core_type = #tpu.core_type<tc>, window_params = [{transform_indices = @transform_0, window_bounds = array<i64: 2, 8, 32>}, {transform_indices = @transform_1, window_bounds = array<i64: 2, 8, 32>}, {pipeline_mode = #tpu.pipeline_mode<synchronous>, transform_indices = @transform_2, window_bounds = array<i64: 32, 96>}, {pipeline_mode = #tpu.pipeline_mode<synchronous>, transform_indices = @transform_3, window_bounds = array<i64: 1, 96>}, {pipeline_mode = #tpu.pipeline_mode<synchronous>, transform_indices = @transform_4, window_bounds = array<i64: 32, 32>}, {pipeline_mode = #tpu.pipeline_mode<synchronous>, transform_indices = @transform_5, window_bounds = array<i64: 1, 32>}, {pipeline_mode = #tpu.pipeline_mode<synchronous>, transform_indices = @transform_6, window_bounds = array<i64: 1, 32>}, {pipeline_mode = #tpu.pipeline_mode<synchronous>, transform_indices = @transform_7, window_bounds = array<i64: 1, 32>}, {pipeline_mode = #tpu.pipeline_mode<synchronous>, transform_indices = @transform_8, window_bounds = array<i64: 32, 32>}, {pipeline_mode = #tpu.pipeline_mode<synchronous>, transform_indices = @transform_9, window_bounds = array<i64: 1, 32>}, {pipeline_mode = #tpu.pipeline_mode<synchronous>, transform_indices = @transform_10, window_bounds = array<i64: 32, 64>}, {pipeline_mode = #tpu.pipeline_mode<synchronous>, transform_indices = @transform_11, window_bounds = array<i64: 1, 64>}, {pipeline_mode = #tpu.pipeline_mode<synchronous>, transform_indices = @transform_12, window_bounds = array<i64: 32, 32>}, {pipeline_mode = #tpu.pipeline_mode<synchronous>, transform_indices = @transform_13, window_bounds = array<i64: 1, 32>}, {pipeline_mode = #tpu.pipeline_mode<synchronous>, transform_indices = @transform_14, window_bounds = array<i64: 1, 32>}, {pipeline_mode = #tpu.pipeline_mode<synchronous>, transform_indices = @transform_15, window_bounds = array<i64: 1, 32>}, {pipeline_mode = #tpu.pipeline_mode<synchronous>, transform_indices = @transform_16, window_bounds = array<i64: 32, 64>}, {pipeline_mode = #tpu.pipeline_mode<synchronous>, transform_indices = @transform_17, window_bounds = array<i64: 1, 64>}, {pipeline_mode = #tpu.pipeline_mode<synchronous>, transform_indices = @transform_18, window_bounds = array<i64: 64, 32>}, {pipeline_mode = #tpu.pipeline_mode<synchronous>, transform_indices = @transform_19, window_bounds = array<i64: 1, 32>}, {pipeline_mode = #tpu.pipeline_mode<synchronous>, transform_indices = @transform_20, window_bounds = array<i64: 1, 32>}, {pipeline_mode = #tpu.pipeline_mode<synchronous>, transform_indices = @transform_21, window_bounds = array<i64: 1, 32>}, {transform_indices = @transform_22, window_bounds = array<i64: 2, 8, 32>}, {transform_indices = @transform_23, window_bounds = array<i64: 2, 8, 8>}]} {
    %c0 = arith.constant 0 : index
    %c0_0 = arith.constant 0 : index
    %c0_1 = arith.constant 0 : index
    %0 = vector.load %arg1[%c0, %c0_0, %c0_1] : memref<2x8x32xf32, #tpu.memory_space<vmem>>, vector<2x8x32xf32>
    %1 = vector.shape_cast %0 : vector<2x8x32xf32> to vector<16x32xf32>
    %c0_2 = arith.constant 0 : index
    %c0_3 = arith.constant 0 : index
    %c0_4 = arith.constant 0 : index
    %2 = vector.load %arg2[%c0_2, %c0_3, %c0_4] : memref<2x8x32xf32, #tpu.memory_space<vmem>>, vector<2x8x32xf32>
    %3 = vector.shape_cast %2 : vector<2x8x32xf32> to vector<16x32xf32>
    %4 = arith.truncf %1 : vector<16x32xf32> to vector<16x32xbf16>
    %c0_5 = arith.constant 0 : index
    %c0_6 = arith.constant 0 : index
    %5 = vector.load %arg3[%c0_5, %c0_6] : memref<32x96xbf16, #tpu.memory_space<vmem>>, vector<32x96xbf16>
    %cst = arith.constant dense<0.000000e+00> : vector<16x96xf32>
    %6 = tpu.matmul %4, %5, %cst {dimension_numbers = #tpu.dot_dimension_numbers<[1], [0], [0], [1], [0, 0, 1, 1], [], []>} : vector<16x32xbf16>, vector<32x96xbf16>, vector<16x96xf32> -> vector<16x96xf32>
    %c0_7 = arith.constant 0 : index
    %c0_8 = arith.constant 0 : index
    %7 = vector.load %arg4[%c0_7, %c0_8] : memref<1x96xf32, #tpu.memory_space<vmem>>, vector<1x96xf32>
    %8 = vector.broadcast %7 : vector<1x96xf32> to vector<16x96xf32>
    %9 = arith.addf %6, %8 : vector<16x96xf32>
    %10 = vector.extract_strided_slice %9 {offsets = [0, 0], sizes = [16, 32], strides = [1, 1]} : vector<16x96xf32> to vector<16x32xf32>
    %11 = arith.truncf %10 : vector<16x32xf32> to vector<16x32xbf16>
    %12 = vector.extract_strided_slice %11 {offsets = [0, 0], sizes = [8, 8], strides = [1, 1]} : vector<16x32xbf16> to vector<8x8xbf16>
    %c0_9 = arith.constant 0 : index
    %c0_10 = arith.constant 0 : index
    %c0_11 = arith.constant 0 : index
    %13 = vector.load %arg25[%c0_9, %c0_10, %c0_11] : memref<8x8x8xbf16, #tpu.memory_space<vmem>>, vector<1x8x8xbf16>
    %14 = vector.shape_cast %13 : vector<1x8x8xbf16> to vector<8x8xbf16>
    %15 = vector.shape_cast %12 : vector<8x8xbf16> to vector<1x8x8xbf16>
    tpu.vector_store %arg25[%c0_9, %c0_10, %c0_11], %15 {strides = array<i32>} : memref<8x8x8xbf16, #tpu.memory_space<vmem>>, vector<1x8x8xbf16>,
    %16 = vector.extract_strided_slice %11 {offsets = [0, 8], sizes = [8, 8], strides = [1, 1]} : vector<16x32xbf16> to vector<8x8xbf16>
    %c1 = arith.constant 1 : index
    %c0_12 = arith.constant 0 : index
    %c0_13 = arith.constant 0 : index
    %17 = vector.load %arg25[%c1, %c0_12, %c0_13] : memref<8x8x8xbf16, #tpu.memory_space<vmem>>, vector<1x8x8xbf16>
    %18 = vector.shape_cast %17 : vector<1x8x8xbf16> to vector<8x8xbf16>
    %19 = vector.shape_cast %16 : vector<8x8xbf16> to vector<1x8x8xbf16>
    tpu.vector_store %arg25[%c1, %c0_12, %c0_13], %19 {strides = array<i32>} : memref<8x8x8xbf16, #tpu.memory_space<vmem>>, vector<1x8x8xbf16>,
    %20 = vector.extract_strided_slice %11 {offsets = [0, 16], sizes = [8, 8], strides = [1, 1]} : vector<16x32xbf16> to vector<8x8xbf16>
    %c2 = arith.constant 2 : index
    %c0_14 = arith.constant 0 : index
    %c0_15 = arith.constant 0 : index
    %21 = vector.load %arg25[%c2, %c0_14, %c0_15] : memref<8x8x8xbf16, #tpu.memory_space<vmem>>, vector<1x8x8xbf16>
    %22 = vector.shape_cast %21 : vector<1x8x8xbf16> to vector<8x8xbf16>
    %23 = vector.shape_cast %20 : vector<8x8xbf16> to vector<1x8x8xbf16>
    tpu.vector_store %arg25[%c2, %c0_14, %c0_15], %23 {strides = array<i32>} : memref<8x8x8xbf16, #tpu.memory_space<vmem>>, vector<1x8x8xbf16>,
    %24 = vector.extract_strided_slice %11 {offsets = [0, 24], sizes = [8, 8], strides = [1, 1]} : vector<16x32xbf16> to vector<8x8xbf16>
    %c3 = arith.constant 3 : index
    %c0_16 = arith.constant 0 : index
    %c0_17 = arith.constant 0 : index
    %25 = vector.load %arg25[%c3, %c0_16, %c0_17] : memref<8x8x8xbf16, #tpu.memory_space<vmem>>, vector<1x8x8xbf16>
    %26 = vector.shape_cast %25 : vector<1x8x8xbf16> to vector<8x8xbf16>
    %27 = vector.shape_cast %24 : vector<8x8xbf16> to vector<1x8x8xbf16>
    tpu.vector_store %arg25[%c3, %c0_16, %c0_17], %27 {strides = array<i32>} : memref<8x8x8xbf16, #tpu.memory_space<vmem>>, vector<1x8x8xbf16>,
    %28 = vector.extract_strided_slice %11 {offsets = [8, 0], sizes = [8, 8], strides = [1, 1]} : vector<16x32xbf16> to vector<8x8xbf16>
    %c4 = arith.constant 4 : index
    %c0_18 = arith.constant 0 : index
    %c0_19 = arith.constant 0 : index
    %29 = vector.load %arg25[%c4, %c0_18, %c0_19] : memref<8x8x8xbf16, #tpu.memory_space<vmem>>, vector<1x8x8xbf16>
    %30 = vector.shape_cast %29 : vector<1x8x8xbf16> to vector<8x8xbf16>
    %31 = vector.shape_cast %28 : vector<8x8xbf16> to vector<1x8x8xbf16>
    tpu.vector_store %arg25[%c4, %c0_18, %c0_19], %31 {strides = array<i32>} : memref<8x8x8xbf16, #tpu.memory_space<vmem>>, vector<1x8x8xbf16>,
    %32 = vector.extract_strided_slice %11 {offsets = [8, 8], sizes = [8, 8], strides = [1, 1]} : vector<16x32xbf16> to vector<8x8xbf16>
    %c5 = arith.constant 5 : index
    %c0_20 = arith.constant 0 : index
    %c0_21 = arith.constant 0 : index
    %33 = vector.load %arg25[%c5, %c0_20, %c0_21] : memref<8x8x8xbf16, #tpu.memory_space<vmem>>, vector<1x8x8xbf16>
    %34 = vector.shape_cast %33 : vector<1x8x8xbf16> to vector<8x8xbf16>
    %35 = vector.shape_cast %32 : vector<8x8xbf16> to vector<1x8x8xbf16>
    tpu.vector_store %arg25[%c5, %c0_20, %c0_21], %35 {strides = array<i32>} : memref<8x8x8xbf16, #tpu.memory_space<vmem>>, vector<1x8x8xbf16>,
    %36 = vector.extract_strided_slice %11 {offsets = [8, 16], sizes = [8, 8], strides = [1, 1]} : vector<16x32xbf16> to vector<8x8xbf16>
    %c6 = arith.constant 6 : index
    %c0_22 = arith.constant 0 : index
    %c0_23 = arith.constant 0 : index
    %37 = vector.load %arg25[%c6, %c0_22, %c0_23] : memref<8x8x8xbf16, #tpu.memory_space<vmem>>, vector<1x8x8xbf16>
    %38 = vector.shape_cast %37 : vector<1x8x8xbf16> to vector<8x8xbf16>
    %39 = vector.shape_cast %36 : vector<8x8xbf16> to vector<1x8x8xbf16>
    tpu.vector_store %arg25[%c6, %c0_22, %c0_23], %39 {strides = array<i32>} : memref<8x8x8xbf16, #tpu.memory_space<vmem>>, vector<1x8x8xbf16>,
    %40 = vector.extract_strided_slice %11 {offsets = [8, 24], sizes = [8, 8], strides = [1, 1]} : vector<16x32xbf16> to vector<8x8xbf16>
    %c7 = arith.constant 7 : index
    %c0_24 = arith.constant 0 : index
    %c0_25 = arith.constant 0 : index
    %41 = vector.load %arg25[%c7, %c0_24, %c0_25] : memref<8x8x8xbf16, #tpu.memory_space<vmem>>, vector<1x8x8xbf16>
    %42 = vector.shape_cast %41 : vector<1x8x8xbf16> to vector<8x8xbf16>
    %43 = vector.shape_cast %40 : vector<8x8xbf16> to vector<1x8x8xbf16>
    tpu.vector_store %arg25[%c7, %c0_24, %c0_25], %43 {strides = array<i32>} : memref<8x8x8xbf16, #tpu.memory_space<vmem>>, vector<1x8x8xbf16>,
    %c0_26 = arith.constant 0 : index
    %c0_27 = arith.constant 0 : index
    %c0_28 = arith.constant 0 : index
    %44 = vector.load %arg25[%c0_26, %c0_27, %c0_28] : memref<8x8x8xbf16, #tpu.memory_space<vmem>>, vector<8x8x8xbf16>
    %45 = vector.extract_strided_slice %9 {offsets = [0, 32], sizes = [16, 32], strides = [1, 1]} : vector<16x96xf32> to vector<16x32xf32>
    %46 = arith.truncf %45 : vector<16x32xf32> to vector<16x32xbf16>
    %47 = vector.extract_strided_slice %46 {offsets = [0, 0], sizes = [8, 8], strides = [1, 1]} : vector<16x32xbf16> to vector<8x8xbf16>
    %c0_29 = arith.constant 0 : index
    %c0_30 = arith.constant 0 : index
    %c0_31 = arith.constant 0 : index
    %48 = vector.load %arg26[%c0_29, %c0_30, %c0_31] : memref<8x8x8xbf16, #tpu.memory_space<vmem>>, vector<1x8x8xbf16>
    %49 = vector.shape_cast %48 : vector<1x8x8xbf16> to vector<8x8xbf16>
    %50 = vector.shape_cast %47 : vector<8x8xbf16> to vector<1x8x8xbf16>
    tpu.vector_store %arg26[%c0_29, %c0_30, %c0_31], %50 {strides = array<i32>} : memref<8x8x8xbf16, #tpu.memory_space<vmem>>, vector<1x8x8xbf16>,
    %51 = vector.extract_strided_slice %46 {offsets = [0, 8], sizes = [8, 8], strides = [1, 1]} : vector<16x32xbf16> to vector<8x8xbf16>
    %c1_32 = arith.constant 1 : index
    %c0_33 = arith.constant 0 : index
    %c0_34 = arith.constant 0 : index
    %52 = vector.load %arg26[%c1_32, %c0_33, %c0_34] : memref<8x8x8xbf16, #tpu.memory_space<vmem>>, vector<1x8x8xbf16>
    %53 = vector.shape_cast %52 : vector<1x8x8xbf16> to vector<8x8xbf16>
    %54 = vector.shape_cast %51 : vector<8x8xbf16> to vector<1x8x8xbf16>
    tpu.vector_store %arg26[%c1_32, %c0_33, %c0_34], %54 {strides = array<i32>} : memref<8x8x8xbf16, #tpu.memory_space<vmem>>, vector<1x8x8xbf16>,
    %55 = vector.extract_strided_slice %46 {offsets = [0, 16], sizes = [8, 8], strides = [1, 1]} : vector<16x32xbf16> to vector<8x8xbf16>
    %c2_35 = arith.constant 2 : index
    %c0_36 = arith.constant 0 : index
    %c0_37 = arith.constant 0 : index
    %56 = vector.load %arg26[%c2_35, %c0_36, %c0_37] : memref<8x8x8xbf16, #tpu.memory_space<vmem>>, vector<1x8x8xbf16>
    %57 = vector.shape_cast %56 : vector<1x8x8xbf16> to vector<8x8xbf16>
    %58 = vector.shape_cast %55 : vector<8x8xbf16> to vector<1x8x8xbf16>
    tpu.vector_store %arg26[%c2_35, %c0_36, %c0_37], %58 {strides = array<i32>} : memref<8x8x8xbf16, #tpu.memory_space<vmem>>, vector<1x8x8xbf16>,
    %59 = vector.extract_strided_slice %46 {offsets = [0, 24], sizes = [8, 8], strides = [1, 1]} : vector<16x32xbf16> to vector<8x8xbf16>
    %c3_38 = arith.constant 3 : index
    %c0_39 = arith.constant 0 : index
    %c0_40 = arith.constant 0 : index
    %60 = vector.load %arg26[%c3_38, %c0_39, %c0_40] : memref<8x8x8xbf16, #tpu.memory_space<vmem>>, vector<1x8x8xbf16>
    %61 = vector.shape_cast %60 : vector<1x8x8xbf16> to vector<8x8xbf16>
    %62 = vector.shape_cast %59 : vector<8x8xbf16> to vector<1x8x8xbf16>
    tpu.vector_store %arg26[%c3_38, %c0_39, %c0_40], %62 {strides = array<i32>} : memref<8x8x8xbf16, #tpu.memory_space<vmem>>, vector<1x8x8xbf16>,
    %63 = vector.extract_strided_slice %46 {offsets = [8, 0], sizes = [8, 8], strides = [1, 1]} : vector<16x32xbf16> to vector<8x8xbf16>
    %c4_41 = arith.constant 4 : index
    %c0_42 = arith.constant 0 : index
    %c0_43 = arith.constant 0 : index
    %64 = vector.load %arg26[%c4_41, %c0_42, %c0_43] : memref<8x8x8xbf16, #tpu.memory_space<vmem>>, vector<1x8x8xbf16>
    %65 = vector.shape_cast %64 : vector<1x8x8xbf16> to vector<8x8xbf16>
    %66 = vector.shape_cast %63 : vector<8x8xbf16> to vector<1x8x8xbf16>
    tpu.vector_store %arg26[%c4_41, %c0_42, %c0_43], %66 {strides = array<i32>} : memref<8x8x8xbf16, #tpu.memory_space<vmem>>, vector<1x8x8xbf16>,
    %67 = vector.extract_strided_slice %46 {offsets = [8, 8], sizes = [8, 8], strides = [1, 1]} : vector<16x32xbf16> to vector<8x8xbf16>
    %c5_44 = arith.constant 5 : index
    %c0_45 = arith.constant 0 : index
    %c0_46 = arith.constant 0 : index
    %68 = vector.load %arg26[%c5_44, %c0_45, %c0_46] : memref<8x8x8xbf16, #tpu.memory_space<vmem>>, vector<1x8x8xbf16>
    %69 = vector.shape_cast %68 : vector<1x8x8xbf16> to vector<8x8xbf16>
    %70 = vector.shape_cast %67 : vector<8x8xbf16> to vector<1x8x8xbf16>
    tpu.vector_store %arg26[%c5_44, %c0_45, %c0_46], %70 {strides = array<i32>} : memref<8x8x8xbf16, #tpu.memory_space<vmem>>, vector<1x8x8xbf16>,
    %71 = vector.extract_strided_slice %46 {offsets = [8, 16], sizes = [8, 8], strides = [1, 1]} : vector<16x32xbf16> to vector<8x8xbf16>
    %c6_47 = arith.constant 6 : index
    %c0_48 = arith.constant 0 : index
    %c0_49 = arith.constant 0 : index
    %72 = vector.load %arg26[%c6_47, %c0_48, %c0_49] : memref<8x8x8xbf16, #tpu.memory_space<vmem>>, vector<1x8x8xbf16>
    %73 = vector.shape_cast %72 : vector<1x8x8xbf16> to vector<8x8xbf16>
    %74 = vector.shape_cast %71 : vector<8x8xbf16> to vector<1x8x8xbf16>
    tpu.vector_store %arg26[%c6_47, %c0_48, %c0_49], %74 {strides = array<i32>} : memref<8x8x8xbf16, #tpu.memory_space<vmem>>, vector<1x8x8xbf16>,
    %75 = vector.extract_strided_slice %46 {offsets = [8, 24], sizes = [8, 8], strides = [1, 1]} : vector<16x32xbf16> to vector<8x8xbf16>
    %c7_50 = arith.constant 7 : index
    %c0_51 = arith.constant 0 : index
    %c0_52 = arith.constant 0 : index
    %76 = vector.load %arg26[%c7_50, %c0_51, %c0_52] : memref<8x8x8xbf16, #tpu.memory_space<vmem>>, vector<1x8x8xbf16>
    %77 = vector.shape_cast %76 : vector<1x8x8xbf16> to vector<8x8xbf16>
    %78 = vector.shape_cast %75 : vector<8x8xbf16> to vector<1x8x8xbf16>
    tpu.vector_store %arg26[%c7_50, %c0_51, %c0_52], %78 {strides = array<i32>} : memref<8x8x8xbf16, #tpu.memory_space<vmem>>, vector<1x8x8xbf16>,
    %c0_53 = arith.constant 0 : index
    %c0_54 = arith.constant 0 : index
    %c0_55 = arith.constant 0 : index
    %79 = vector.load %arg26[%c0_53, %c0_54, %c0_55] : memref<8x8x8xbf16, #tpu.memory_space<vmem>>, vector<8x8x8xbf16>
    %80 = vector.extract_strided_slice %9 {offsets = [0, 64], sizes = [16, 32], strides = [1, 1]} : vector<16x96xf32> to vector<16x32xf32>
    %81 = arith.truncf %80 : vector<16x32xf32> to vector<16x32xbf16>
    %82 = vector.extract_strided_slice %81 {offsets = [0, 0], sizes = [8, 8], strides = [1, 1]} : vector<16x32xbf16> to vector<8x8xbf16>
    %c0_56 = arith.constant 0 : index
    %c0_57 = arith.constant 0 : index
    %c0_58 = arith.constant 0 : index
    %83 = vector.load %arg27[%c0_56, %c0_57, %c0_58] : memref<8x8x8xbf16, #tpu.memory_space<vmem>>, vector<1x8x8xbf16>
    %84 = vector.shape_cast %83 : vector<1x8x8xbf16> to vector<8x8xbf16>
    %85 = vector.shape_cast %82 : vector<8x8xbf16> to vector<1x8x8xbf16>
    tpu.vector_store %arg27[%c0_56, %c0_57, %c0_58], %85 {strides = array<i32>} : memref<8x8x8xbf16, #tpu.memory_space<vmem>>, vector<1x8x8xbf16>,
    %86 = vector.extract_strided_slice %81 {offsets = [0, 8], sizes = [8, 8], strides = [1, 1]} : vector<16x32xbf16> to vector<8x8xbf16>
    %c1_59 = arith.constant 1 : index
    %c0_60 = arith.constant 0 : index
    %c0_61 = arith.constant 0 : index
    %87 = vector.load %arg27[%c1_59, %c0_60, %c0_61] : memref<8x8x8xbf16, #tpu.memory_space<vmem>>, vector<1x8x8xbf16>
    %88 = vector.shape_cast %87 : vector<1x8x8xbf16> to vector<8x8xbf16>
    %89 = vector.shape_cast %86 : vector<8x8xbf16> to vector<1x8x8xbf16>
    tpu.vector_store %arg27[%c1_59, %c0_60, %c0_61], %89 {strides = array<i32>} : memref<8x8x8xbf16, #tpu.memory_space<vmem>>, vector<1x8x8xbf16>,
    %90 = vector.extract_strided_slice %81 {offsets = [0, 16], sizes = [8, 8], strides = [1, 1]} : vector<16x32xbf16> to vector<8x8xbf16>
    %c2_62 = arith.constant 2 : index
    %c0_63 = arith.constant 0 : index
    %c0_64 = arith.constant 0 : index
    %91 = vector.load %arg27[%c2_62, %c0_63, %c0_64] : memref<8x8x8xbf16, #tpu.memory_space<vmem>>, vector<1x8x8xbf16>
    %92 = vector.shape_cast %91 : vector<1x8x8xbf16> to vector<8x8xbf16>
    %93 = vector.shape_cast %90 : vector<8x8xbf16> to vector<1x8x8xbf16>
    tpu.vector_store %arg27[%c2_62, %c0_63, %c0_64], %93 {strides = array<i32>} : memref<8x8x8xbf16, #tpu.memory_space<vmem>>, vector<1x8x8xbf16>,
    %94 = vector.extract_strided_slice %81 {offsets = [0, 24], sizes = [8, 8], strides = [1, 1]} : vector<16x32xbf16> to vector<8x8xbf16>
    %c3_65 = arith.constant 3 : index
    %c0_66 = arith.constant 0 : index
    %c0_67 = arith.constant 0 : index
    %95 = vector.load %arg27[%c3_65, %c0_66, %c0_67] : memref<8x8x8xbf16, #tpu.memory_space<vmem>>, vector<1x8x8xbf16>
    %96 = vector.shape_cast %95 : vector<1x8x8xbf16> to vector<8x8xbf16>
    %97 = vector.shape_cast %94 : vector<8x8xbf16> to vector<1x8x8xbf16>
    tpu.vector_store %arg27[%c3_65, %c0_66, %c0_67], %97 {strides = array<i32>} : memref<8x8x8xbf16, #tpu.memory_space<vmem>>, vector<1x8x8xbf16>,
    %98 = vector.extract_strided_slice %81 {offsets = [8, 0], sizes = [8, 8], strides = [1, 1]} : vector<16x32xbf16> to vector<8x8xbf16>
    %c4_68 = arith.constant 4 : index
    %c0_69 = arith.constant 0 : index
    %c0_70 = arith.constant 0 : index
    %99 = vector.load %arg27[%c4_68, %c0_69, %c0_70] : memref<8x8x8xbf16, #tpu.memory_space<vmem>>, vector<1x8x8xbf16>
    %100 = vector.shape_cast %99 : vector<1x8x8xbf16> to vector<8x8xbf16>
    %101 = vector.shape_cast %98 : vector<8x8xbf16> to vector<1x8x8xbf16>
    tpu.vector_store %arg27[%c4_68, %c0_69, %c0_70], %101 {strides = array<i32>} : memref<8x8x8xbf16, #tpu.memory_space<vmem>>, vector<1x8x8xbf16>,
    %102 = vector.extract_strided_slice %81 {offsets = [8, 8], sizes = [8, 8], strides = [1, 1]} : vector<16x32xbf16> to vector<8x8xbf16>
    %c5_71 = arith.constant 5 : index
    %c0_72 = arith.constant 0 : index
    %c0_73 = arith.constant 0 : index
    %103 = vector.load %arg27[%c5_71, %c0_72, %c0_73] : memref<8x8x8xbf16, #tpu.memory_space<vmem>>, vector<1x8x8xbf16>
    %104 = vector.shape_cast %103 : vector<1x8x8xbf16> to vector<8x8xbf16>
    %105 = vector.shape_cast %102 : vector<8x8xbf16> to vector<1x8x8xbf16>
    tpu.vector_store %arg27[%c5_71, %c0_72, %c0_73], %105 {strides = array<i32>} : memref<8x8x8xbf16, #tpu.memory_space<vmem>>, vector<1x8x8xbf16>,
    %106 = vector.extract_strided_slice %81 {offsets = [8, 16], sizes = [8, 8], strides = [1, 1]} : vector<16x32xbf16> to vector<8x8xbf16>
    %c6_74 = arith.constant 6 : index
    %c0_75 = arith.constant 0 : index
    %c0_76 = arith.constant 0 : index
    %107 = vector.load %arg27[%c6_74, %c0_75, %c0_76] : memref<8x8x8xbf16, #tpu.memory_space<vmem>>, vector<1x8x8xbf16>
    %108 = vector.shape_cast %107 : vector<1x8x8xbf16> to vector<8x8xbf16>
    %109 = vector.shape_cast %106 : vector<8x8xbf16> to vector<1x8x8xbf16>
    tpu.vector_store %arg27[%c6_74, %c0_75, %c0_76], %109 {strides = array<i32>} : memref<8x8x8xbf16, #tpu.memory_space<vmem>>, vector<1x8x8xbf16>,
    %110 = vector.extract_strided_slice %81 {offsets = [8, 24], sizes = [8, 8], strides = [1, 1]} : vector<16x32xbf16> to vector<8x8xbf16>
    %c7_77 = arith.constant 7 : index
    %c0_78 = arith.constant 0 : index
    %c0_79 = arith.constant 0 : index
    %111 = vector.load %arg27[%c7_77, %c0_78, %c0_79] : memref<8x8x8xbf16, #tpu.memory_space<vmem>>, vector<1x8x8xbf16>
    %112 = vector.shape_cast %111 : vector<1x8x8xbf16> to vector<8x8xbf16>
    %113 = vector.shape_cast %110 : vector<8x8xbf16> to vector<1x8x8xbf16>
    tpu.vector_store %arg27[%c7_77, %c0_78, %c0_79], %113 {strides = array<i32>} : memref<8x8x8xbf16, #tpu.memory_space<vmem>>, vector<1x8x8xbf16>,
    %c0_80 = arith.constant 0 : index
    %c0_81 = arith.constant 0 : index
    %c0_82 = arith.constant 0 : index
    %114 = vector.load %arg27[%c0_80, %c0_81, %c0_82] : memref<8x8x8xbf16, #tpu.memory_space<vmem>>, vector<8x8x8xbf16>
    "tpu.trace_start"() <{level = 10 : i32, message = "gtd,gsd->gts"}> : () -> ()
    %cst_83 = arith.constant dense<0.000000e+00> : vector<8x8x8xf32>
    %115 = tpu.matmul %44, %79, %cst_83 {dimension_numbers = #tpu.dot_dimension_numbers<[2], [2], [1], [1], [0, 0, 0, 1, 1, 1], [0], [0]>} : vector<8x8x8xbf16>, vector<8x8x8xbf16>, vector<8x8x8xf32> -> vector<8x8x8xf32>
    "tpu.trace_stop"() : () -> ()
    %116 = tpu.iota {dimensions = array<i32: 0>} : vector<8x8xi32>
    %117 = tpu.iota {dimensions = array<i32: 1>} : vector<8x8xi32>
    %118 = arith.cmpi sle, %117, %116 : vector<8x8xi32>
    %119 = vector.shape_cast %118 : vector<8x8xi1> to vector<1x8x8xi1>
    %cst_84 = arith.constant -1.000000e+09 : f32
    %120 = vector.shape_cast %119 : vector<1x8x8xi1> to vector<1x8x8xi1>
    %121 = vector.broadcast %120 : vector<1x8x8xi1> to vector<8x8x8xi1>
    %122 = vector.broadcast %cst_84 : f32 to vector<8x8x8xf32>
    %123 = arith.select %121, %115, %122 : vector<8x8x8xi1>, vector<8x8x8xf32>
    %cst_85 = arith.constant dense<0xFF800000> : vector<8x8xf32>
    %124 = vector.multi_reduction <maximumf>, %123, %cst_85 [2] : vector<8x8x8xf32> to vector<8x8xf32>
    %125 = vector.shape_cast %124 : vector<8x8xf32> to vector<8x8x1xf32>
    %126 = vector.broadcast %125 : vector<8x8x1xf32> to vector<8x8x8xf32>
    %127 = arith.subf %123, %126 : vector<8x8x8xf32>
    %128 = math.exp %127 : vector<8x8x8xf32>
    %cst_86 = arith.constant dense<0.000000e+00> : vector<8x8xf32>
    %129 = vector.multi_reduction <add>, %128, %cst_86 [2] : vector<8x8x8xf32> to vector<8x8xf32>
    %130 = vector.shape_cast %129 : vector<8x8xf32> to vector<8x8x1xf32>
    %131 = tpu.reciprocal %130 {approx = true} : vector<8x8x1xf32> -> vector<8x8x1xf32>
    %132 = vector.broadcast %131 : vector<8x8x1xf32> to vector<8x8x8xf32>
    %133 = arith.mulf %128, %132 : vector<8x8x8xf32>
    %134 = arith.truncf %133 : vector<8x8x8xf32> to vector<8x8x8xbf16>
    "tpu.trace_start"() <{level = 10 : i32, message = "gts,gsd->gtd"}> : () -> ()
    %cst_87 = arith.constant dense<0.000000e+00> : vector<8x8x8xf32>
    %135 = tpu.matmul %134, %114, %cst_87 {dimension_numbers = #tpu.dot_dimension_numbers<[2], [1], [1], [2], [0, 0, 0, 1, 1, 2], [0], [0]>} : vector<8x8x8xbf16>, vector<8x8x8xbf16>, vector<8x8x8xf32> -> vector<8x8x8xf32>
    "tpu.trace_stop"() : () -> ()
    %136 = arith.truncf %135 : vector<8x8x8xf32> to vector<8x8x8xbf16>
    %137 = vector.extract_strided_slice %136 {offsets = [0, 0, 0], sizes = [1, 8, 8], strides = [1, 1, 1]} : vector<8x8x8xbf16> to vector<1x8x8xbf16>
    %138 = vector.shape_cast %137 : vector<1x8x8xbf16> to vector<8x8xbf16>
    %c0_88 = arith.constant 0 : index
    %c0_89 = arith.constant 0 : index
    %139 = vector.load %arg28[%c0_88, %c0_89] : memref<16x32xbf16, #tpu.memory_space<vmem>>, vector<8x8xbf16>
    tpu.vector_store %arg28[%c0_88, %c0_89], %138 {strides = array<i32>} : memref<16x32xbf16, #tpu.memory_space<vmem>>, vector<8x8xbf16>,
    %140 = vector.extract_strided_slice %136 {offsets = [1, 0, 0], sizes = [1, 8, 8], strides = [1, 1, 1]} : vector<8x8x8xbf16> to vector<1x8x8xbf16>
    %141 = vector.shape_cast %140 : vector<1x8x8xbf16> to vector<8x8xbf16>
    %c0_90 = arith.constant 0 : index
    %c8 = arith.constant 8 : index
    %142 = vector.load %arg28[%c0_90, %c8] : memref<16x32xbf16, #tpu.memory_space<vmem>>, vector<8x8xbf16>
    tpu.vector_store %arg28[%c0_90, %c8], %141 {strides = array<i32>} : memref<16x32xbf16, #tpu.memory_space<vmem>>, vector<8x8xbf16>,
    %143 = vector.extract_strided_slice %136 {offsets = [2, 0, 0], sizes = [1, 8, 8], strides = [1, 1, 1]} : vector<8x8x8xbf16> to vector<1x8x8xbf16>
    %144 = vector.shape_cast %143 : vector<1x8x8xbf16> to vector<8x8xbf16>
    %c0_91 = arith.constant 0 : index
    %c16 = arith.constant 16 : index
    %145 = vector.load %arg28[%c0_91, %c16] : memref<16x32xbf16, #tpu.memory_space<vmem>>, vector<8x8xbf16>
    tpu.vector_store %arg28[%c0_91, %c16], %144 {strides = array<i32>} : memref<16x32xbf16, #tpu.memory_space<vmem>>, vector<8x8xbf16>,
    %146 = vector.extract_strided_slice %136 {offsets = [3, 0, 0], sizes = [1, 8, 8], strides = [1, 1, 1]} : vector<8x8x8xbf16> to vector<1x8x8xbf16>
    %147 = vector.shape_cast %146 : vector<1x8x8xbf16> to vector<8x8xbf16>
    %c0_92 = arith.constant 0 : index
    %c24 = arith.constant 24 : index
    %148 = vector.load %arg28[%c0_92, %c24] : memref<16x32xbf16, #tpu.memory_space<vmem>>, vector<8x8xbf16>
    tpu.vector_store %arg28[%c0_92, %c24], %147 {strides = array<i32>} : memref<16x32xbf16, #tpu.memory_space<vmem>>, vector<8x8xbf16>,
    %149 = vector.extract_strided_slice %136 {offsets = [4, 0, 0], sizes = [1, 8, 8], strides = [1, 1, 1]} : vector<8x8x8xbf16> to vector<1x8x8xbf16>
    %150 = vector.shape_cast %149 : vector<1x8x8xbf16> to vector<8x8xbf16>
    %c8_93 = arith.constant 8 : index
    %c0_94 = arith.constant 0 : index
    %151 = vector.load %arg28[%c8_93, %c0_94] : memref<16x32xbf16, #tpu.memory_space<vmem>>, vector<8x8xbf16>
    tpu.vector_store %arg28[%c8_93, %c0_94], %150 {strides = array<i32>} : memref<16x32xbf16, #tpu.memory_space<vmem>>, vector<8x8xbf16>,
    %152 = vector.extract_strided_slice %136 {offsets = [5, 0, 0], sizes = [1, 8, 8], strides = [1, 1, 1]} : vector<8x8x8xbf16> to vector<1x8x8xbf16>
    %153 = vector.shape_cast %152 : vector<1x8x8xbf16> to vector<8x8xbf16>
    %c8_95 = arith.constant 8 : index
    %c8_96 = arith.constant 8 : index
    %154 = vector.load %arg28[%c8_95, %c8_96] : memref<16x32xbf16, #tpu.memory_space<vmem>>, vector<8x8xbf16>
    tpu.vector_store %arg28[%c8_95, %c8_96], %153 {strides = array<i32>} : memref<16x32xbf16, #tpu.memory_space<vmem>>, vector<8x8xbf16>,
    %155 = vector.extract_strided_slice %136 {offsets = [6, 0, 0], sizes = [1, 8, 8], strides = [1, 1, 1]} : vector<8x8x8xbf16> to vector<1x8x8xbf16>
    %156 = vector.shape_cast %155 : vector<1x8x8xbf16> to vector<8x8xbf16>
    %c8_97 = arith.constant 8 : index
    %c16_98 = arith.constant 16 : index
    %157 = vector.load %arg28[%c8_97, %c16_98] : memref<16x32xbf16, #tpu.memory_space<vmem>>, vector<8x8xbf16>
    tpu.vector_store %arg28[%c8_97, %c16_98], %156 {strides = array<i32>} : memref<16x32xbf16, #tpu.memory_space<vmem>>, vector<8x8xbf16>,
    %158 = vector.extract_strided_slice %136 {offsets = [7, 0, 0], sizes = [1, 8, 8], strides = [1, 1, 1]} : vector<8x8x8xbf16> to vector<1x8x8xbf16>
    %159 = vector.shape_cast %158 : vector<1x8x8xbf16> to vector<8x8xbf16>
    %c8_99 = arith.constant 8 : index
    %c24_100 = arith.constant 24 : index
    %160 = vector.load %arg28[%c8_99, %c24_100] : memref<16x32xbf16, #tpu.memory_space<vmem>>, vector<8x8xbf16>
    tpu.vector_store %arg28[%c8_99, %c24_100], %159 {strides = array<i32>} : memref<16x32xbf16, #tpu.memory_space<vmem>>, vector<8x8xbf16>,
    %c0_101 = arith.constant 0 : index
    %c0_102 = arith.constant 0 : index
    %161 = vector.load %arg28[%c0_101, %c0_102] : memref<16x32xbf16, #tpu.memory_space<vmem>>, vector<16x32xbf16>
    %c0_103 = arith.constant 0 : index
    %c0_104 = arith.constant 0 : index
    %162 = vector.load %arg5[%c0_103, %c0_104] : memref<32x32xbf16, #tpu.memory_space<vmem>>, vector<32x32xbf16>
    %cst_105 = arith.constant dense<0.000000e+00> : vector<16x32xf32>
    %163 = tpu.matmul %161, %162, %cst_105 {dimension_numbers = #tpu.dot_dimension_numbers<[1], [0], [0], [1], [0, 0, 1, 1], [], []>} : vector<16x32xbf16>, vector<32x32xbf16>, vector<16x32xf32> -> vector<16x32xf32>
    %c0_106 = arith.constant 0 : index
    %c0_107 = arith.constant 0 : index
    %164 = vector.load %arg6[%c0_106, %c0_107] : memref<1x32xf32, #tpu.memory_space<vmem>>, vector<1x32xf32>
    %165 = vector.broadcast %164 : vector<1x32xf32> to vector<16x32xf32>
    %166 = arith.addf %163, %165 : vector<16x32xf32>
    %167 = arith.addf %1, %166 : vector<16x32xf32>
    %c0_108 = arith.constant 0 : index
    %c0_109 = arith.constant 0 : index
    %168 = vector.load %arg7[%c0_108, %c0_109] : memref<1x32xf32, #tpu.memory_space<vmem>>, vector<1x32xf32>
    %c0_110 = arith.constant 0 : index
    %c0_111 = arith.constant 0 : index
    %169 = vector.load %arg8[%c0_110, %c0_111] : memref<1x32xf32, #tpu.memory_space<vmem>>, vector<1x32xf32>
    %cst_112 = arith.constant dense<0.000000e+00> : vector<16xf32>
    %170 = vector.multi_reduction <add>, %167, %cst_112 [1] : vector<16x32xf32> to vector<16xf32>
    %171 = vector.shape_cast %170 : vector<16xf32> to vector<16x1xf32>
    %cst_113 = arith.constant 3.200000e+01 : f32
    %172 = vector.broadcast %cst_113 : f32 to vector<16x1xf32>
    %173 = arith.divf %171, %172 : vector<16x1xf32>
    %174 = vector.broadcast %173 : vector<16x1xf32> to vector<16x32xf32>
    %175 = arith.subf %167, %174 : vector<16x32xf32>
    %176 = arith.mulf %175, %175 : vector<16x32xf32>
    %cst_114 = arith.constant dense<0.000000e+00> : vector<16xf32>
    %177 = vector.multi_reduction <add>, %176, %cst_114 [1] : vector<16x32xf32> to vector<16xf32>
    %178 = vector.shape_cast %177 : vector<16xf32> to vector<16x1xf32>
    %cst_115 = arith.constant 3.200000e+01 : f32
    %179 = vector.broadcast %cst_115 : f32 to vector<16x1xf32>
    %180 = arith.divf %178, %179 : vector<16x1xf32>
    %cst_116 = arith.constant 9.99999974E-6 : f32
    %181 = vector.broadcast %cst_116 : f32 to vector<16x1xf32>
    %182 = arith.addf %180, %181 : vector<16x1xf32>
    %183 = math.rsqrt %182 : vector<16x1xf32>
    %184 = vector.broadcast %183 : vector<16x1xf32> to vector<16x32xf32>
    %185 = arith.mulf %175, %184 : vector<16x32xf32>
    %186 = vector.broadcast %168 : vector<1x32xf32> to vector<16x32xf32>
    %187 = arith.mulf %185, %186 : vector<16x32xf32>
    %188 = vector.broadcast %169 : vector<1x32xf32> to vector<16x32xf32>
    %189 = arith.addf %187, %188 : vector<16x32xf32>
    %190 = arith.truncf %189 : vector<16x32xf32> to vector<16x32xbf16>
    %c0_117 = arith.constant 0 : index
    %c0_118 = arith.constant 0 : index
    %191 = vector.load %arg9[%c0_117, %c0_118] : memref<32x32xbf16, #tpu.memory_space<vmem>>, vector<32x32xbf16>
    %cst_119 = arith.constant dense<0.000000e+00> : vector<16x32xf32>
    %192 = tpu.matmul %190, %191, %cst_119 {dimension_numbers = #tpu.dot_dimension_numbers<[1], [0], [0], [1], [0, 0, 1, 1], [], []>} : vector<16x32xbf16>, vector<32x32xbf16>, vector<16x32xf32> -> vector<16x32xf32>
    %c0_120 = arith.constant 0 : index
    %c0_121 = arith.constant 0 : index
    %193 = vector.load %arg10[%c0_120, %c0_121] : memref<1x32xf32, #tpu.memory_space<vmem>>, vector<1x32xf32>
    %194 = vector.broadcast %193 : vector<1x32xf32> to vector<16x32xf32>
    %195 = arith.addf %192, %194 : vector<16x32xf32>
    %196 = arith.truncf %3 : vector<16x32xf32> to vector<16x32xbf16>
    %c0_122 = arith.constant 0 : index
    %c0_123 = arith.constant 0 : index
    %197 = vector.load %arg11[%c0_122, %c0_123] : memref<32x64xbf16, #tpu.memory_space<vmem>>, vector<32x64xbf16>
    %cst_124 = arith.constant dense<0.000000e+00> : vector<16x64xf32>
    %198 = tpu.matmul %196, %197, %cst_124 {dimension_numbers = #tpu.dot_dimension_numbers<[1], [0], [0], [1], [0, 0, 1, 1], [], []>} : vector<16x32xbf16>, vector<32x64xbf16>, vector<16x64xf32> -> vector<16x64xf32>
    %c0_125 = arith.constant 0 : index
    %c0_126 = arith.constant 0 : index
    %199 = vector.load %arg12[%c0_125, %c0_126] : memref<1x64xf32, #tpu.memory_space<vmem>>, vector<1x64xf32>
    %200 = vector.broadcast %199 : vector<1x64xf32> to vector<16x64xf32>
    %201 = arith.addf %198, %200 : vector<16x64xf32>
    %202 = arith.truncf %195 : vector<16x32xf32> to vector<16x32xbf16>
    %203 = vector.extract_strided_slice %202 {offsets = [0, 0], sizes = [8, 8], strides = [1, 1]} : vector<16x32xbf16> to vector<8x8xbf16>
    %c0_127 = arith.constant 0 : index
    %c0_128 = arith.constant 0 : index
    %c0_129 = arith.constant 0 : index
    %204 = vector.load %arg25[%c0_127, %c0_128, %c0_129] : memref<8x8x8xbf16, #tpu.memory_space<vmem>>, vector<1x8x8xbf16>
    %205 = vector.shape_cast %204 : vector<1x8x8xbf16> to vector<8x8xbf16>
    %206 = vector.shape_cast %203 : vector<8x8xbf16> to vector<1x8x8xbf16>
    tpu.vector_store %arg25[%c0_127, %c0_128, %c0_129], %206 {strides = array<i32>} : memref<8x8x8xbf16, #tpu.memory_space<vmem>>, vector<1x8x8xbf16>,
    %207 = vector.extract_strided_slice %202 {offsets = [0, 8], sizes = [8, 8], strides = [1, 1]} : vector<16x32xbf16> to vector<8x8xbf16>
    %c1_130 = arith.constant 1 : index
    %c0_131 = arith.constant 0 : index
    %c0_132 = arith.constant 0 : index
    %208 = vector.load %arg25[%c1_130, %c0_131, %c0_132] : memref<8x8x8xbf16, #tpu.memory_space<vmem>>, vector<1x8x8xbf16>
    %209 = vector.shape_cast %208 : vector<1x8x8xbf16> to vector<8x8xbf16>
    %210 = vector.shape_cast %207 : vector<8x8xbf16> to vector<1x8x8xbf16>
    tpu.vector_store %arg25[%c1_130, %c0_131, %c0_132], %210 {strides = array<i32>} : memref<8x8x8xbf16, #tpu.memory_space<vmem>>, vector<1x8x8xbf16>,
    %211 = vector.extract_strided_slice %202 {offsets = [0, 16], sizes = [8, 8], strides = [1, 1]} : vector<16x32xbf16> to vector<8x8xbf16>
    %c2_133 = arith.constant 2 : index
    %c0_134 = arith.constant 0 : index
    %c0_135 = arith.constant 0 : index
    %212 = vector.load %arg25[%c2_133, %c0_134, %c0_135] : memref<8x8x8xbf16, #tpu.memory_space<vmem>>, vector<1x8x8xbf16>
    %213 = vector.shape_cast %212 : vector<1x8x8xbf16> to vector<8x8xbf16>
    %214 = vector.shape_cast %211 : vector<8x8xbf16> to vector<1x8x8xbf16>
    tpu.vector_store %arg25[%c2_133, %c0_134, %c0_135], %214 {strides = array<i32>} : memref<8x8x8xbf16, #tpu.memory_space<vmem>>, vector<1x8x8xbf16>,
    %215 = vector.extract_strided_slice %202 {offsets = [0, 24], sizes = [8, 8], strides = [1, 1]} : vector<16x32xbf16> to vector<8x8xbf16>
    %c3_136 = arith.constant 3 : index
    %c0_137 = arith.constant 0 : index
    %c0_138 = arith.constant 0 : index
    %216 = vector.load %arg25[%c3_136, %c0_137, %c0_138] : memref<8x8x8xbf16, #tpu.memory_space<vmem>>, vector<1x8x8xbf16>
    %217 = vector.shape_cast %216 : vector<1x8x8xbf16> to vector<8x8xbf16>
    %218 = vector.shape_cast %215 : vector<8x8xbf16> to vector<1x8x8xbf16>
    tpu.vector_store %arg25[%c3_136, %c0_137, %c0_138], %218 {strides = array<i32>} : memref<8x8x8xbf16, #tpu.memory_space<vmem>>, vector<1x8x8xbf16>,
    %219 = vector.extract_strided_slice %202 {offsets = [8, 0], sizes = [8, 8], strides = [1, 1]} : vector<16x32xbf16> to vector<8x8xbf16>
    %c4_139 = arith.constant 4 : index
    %c0_140 = arith.constant 0 : index
    %c0_141 = arith.constant 0 : index
    %220 = vector.load %arg25[%c4_139, %c0_140, %c0_141] : memref<8x8x8xbf16, #tpu.memory_space<vmem>>, vector<1x8x8xbf16>
    %221 = vector.shape_cast %220 : vector<1x8x8xbf16> to vector<8x8xbf16>
    %222 = vector.shape_cast %219 : vector<8x8xbf16> to vector<1x8x8xbf16>
    tpu.vector_store %arg25[%c4_139, %c0_140, %c0_141], %222 {strides = array<i32>} : memref<8x8x8xbf16, #tpu.memory_space<vmem>>, vector<1x8x8xbf16>,
    %223 = vector.extract_strided_slice %202 {offsets = [8, 8], sizes = [8, 8], strides = [1, 1]} : vector<16x32xbf16> to vector<8x8xbf16>
    %c5_142 = arith.constant 5 : index
    %c0_143 = arith.constant 0 : index
    %c0_144 = arith.constant 0 : index
    %224 = vector.load %arg25[%c5_142, %c0_143, %c0_144] : memref<8x8x8xbf16, #tpu.memory_space<vmem>>, vector<1x8x8xbf16>
    %225 = vector.shape_cast %224 : vector<1x8x8xbf16> to vector<8x8xbf16>
    %226 = vector.shape_cast %223 : vector<8x8xbf16> to vector<1x8x8xbf16>
    tpu.vector_store %arg25[%c5_142, %c0_143, %c0_144], %226 {strides = array<i32>} : memref<8x8x8xbf16, #tpu.memory_space<vmem>>, vector<1x8x8xbf16>,
    %227 = vector.extract_strided_slice %202 {offsets = [8, 16], sizes = [8, 8], strides = [1, 1]} : vector<16x32xbf16> to vector<8x8xbf16>
    %c6_145 = arith.constant 6 : index
    %c0_146 = arith.constant 0 : index
    %c0_147 = arith.constant 0 : index
    %228 = vector.load %arg25[%c6_145, %c0_146, %c0_147] : memref<8x8x8xbf16, #tpu.memory_space<vmem>>, vector<1x8x8xbf16>
    %229 = vector.shape_cast %228 : vector<1x8x8xbf16> to vector<8x8xbf16>
    %230 = vector.shape_cast %227 : vector<8x8xbf16> to vector<1x8x8xbf16>
    tpu.vector_store %arg25[%c6_145, %c0_146, %c0_147], %230 {strides = array<i32>} : memref<8x8x8xbf16, #tpu.memory_space<vmem>>, vector<1x8x8xbf16>,
    %231 = vector.extract_strided_slice %202 {offsets = [8, 24], sizes = [8, 8], strides = [1, 1]} : vector<16x32xbf16> to vector<8x8xbf16>
    %c7_148 = arith.constant 7 : index
    %c0_149 = arith.constant 0 : index
    %c0_150 = arith.constant 0 : index
    %232 = vector.load %arg25[%c7_148, %c0_149, %c0_150] : memref<8x8x8xbf16, #tpu.memory_space<vmem>>, vector<1x8x8xbf16>
    %233 = vector.shape_cast %232 : vector<1x8x8xbf16> to vector<8x8xbf16>
    %234 = vector.shape_cast %231 : vector<8x8xbf16> to vector<1x8x8xbf16>
    tpu.vector_store %arg25[%c7_148, %c0_149, %c0_150], %234 {strides = array<i32>} : memref<8x8x8xbf16, #tpu.memory_space<vmem>>, vector<1x8x8xbf16>,
    %c0_151 = arith.constant 0 : index
    %c0_152 = arith.constant 0 : index
    %c0_153 = arith.constant 0 : index
    %235 = vector.load %arg25[%c0_151, %c0_152, %c0_153] : memref<8x8x8xbf16, #tpu.memory_space<vmem>>, vector<8x8x8xbf16>
    %236 = vector.extract_strided_slice %201 {offsets = [0, 0], sizes = [16, 32], strides = [1, 1]} : vector<16x64xf32> to vector<16x32xf32>
    %237 = arith.truncf %236 : vector<16x32xf32> to vector<16x32xbf16>
    %238 = vector.extract_strided_slice %237 {offsets = [0, 0], sizes = [8, 8], strides = [1, 1]} : vector<16x32xbf16> to vector<8x8xbf16>
    %c0_154 = arith.constant 0 : index
    %c0_155 = arith.constant 0 : index
    %c0_156 = arith.constant 0 : index
    %239 = vector.load %arg26[%c0_154, %c0_155, %c0_156] : memref<8x8x8xbf16, #tpu.memory_space<vmem>>, vector<1x8x8xbf16>
    %240 = vector.shape_cast %239 : vector<1x8x8xbf16> to vector<8x8xbf16>
    %241 = vector.shape_cast %238 : vector<8x8xbf16> to vector<1x8x8xbf16>
    tpu.vector_store %arg26[%c0_154, %c0_155, %c0_156], %241 {strides = array<i32>} : memref<8x8x8xbf16, #tpu.memory_space<vmem>>, vector<1x8x8xbf16>,
    %242 = vector.extract_strided_slice %237 {offsets = [0, 8], sizes = [8, 8], strides = [1, 1]} : vector<16x32xbf16> to vector<8x8xbf16>
    %c1_157 = arith.constant 1 : index
    %c0_158 = arith.constant 0 : index
    %c0_159 = arith.constant 0 : index
    %243 = vector.load %arg26[%c1_157, %c0_158, %c0_159] : memref<8x8x8xbf16, #tpu.memory_space<vmem>>, vector<1x8x8xbf16>
    %244 = vector.shape_cast %243 : vector<1x8x8xbf16> to vector<8x8xbf16>
    %245 = vector.shape_cast %242 : vector<8x8xbf16> to vector<1x8x8xbf16>
    tpu.vector_store %arg26[%c1_157, %c0_158, %c0_159], %245 {strides = array<i32>} : memref<8x8x8xbf16, #tpu.memory_space<vmem>>, vector<1x8x8xbf16>,
    %246 = vector.extract_strided_slice %237 {offsets = [0, 16], sizes = [8, 8], strides = [1, 1]} : vector<16x32xbf16> to vector<8x8xbf16>
    %c2_160 = arith.constant 2 : index
    %c0_161 = arith.constant 0 : index
    %c0_162 = arith.constant 0 : index
    %247 = vector.load %arg26[%c2_160, %c0_161, %c0_162] : memref<8x8x8xbf16, #tpu.memory_space<vmem>>, vector<1x8x8xbf16>
    %248 = vector.shape_cast %247 : vector<1x8x8xbf16> to vector<8x8xbf16>
    %249 = vector.shape_cast %246 : vector<8x8xbf16> to vector<1x8x8xbf16>
    tpu.vector_store %arg26[%c2_160, %c0_161, %c0_162], %249 {strides = array<i32>} : memref<8x8x8xbf16, #tpu.memory_space<vmem>>, vector<1x8x8xbf16>,
    %250 = vector.extract_strided_slice %237 {offsets = [0, 24], sizes = [8, 8], strides = [1, 1]} : vector<16x32xbf16> to vector<8x8xbf16>
    %c3_163 = arith.constant 3 : index
    %c0_164 = arith.constant 0 : index
    %c0_165 = arith.constant 0 : index
    %251 = vector.load %arg26[%c3_163, %c0_164, %c0_165] : memref<8x8x8xbf16, #tpu.memory_space<vmem>>, vector<1x8x8xbf16>
    %252 = vector.shape_cast %251 : vector<1x8x8xbf16> to vector<8x8xbf16>
    %253 = vector.shape_cast %250 : vector<8x8xbf16> to vector<1x8x8xbf16>
    tpu.vector_store %arg26[%c3_163, %c0_164, %c0_165], %253 {strides = array<i32>} : memref<8x8x8xbf16, #tpu.memory_space<vmem>>, vector<1x8x8xbf16>,
    %254 = vector.extract_strided_slice %237 {offsets = [8, 0], sizes = [8, 8], strides = [1, 1]} : vector<16x32xbf16> to vector<8x8xbf16>
    %c4_166 = arith.constant 4 : index
    %c0_167 = arith.constant 0 : index
    %c0_168 = arith.constant 0 : index
    %255 = vector.load %arg26[%c4_166, %c0_167, %c0_168] : memref<8x8x8xbf16, #tpu.memory_space<vmem>>, vector<1x8x8xbf16>
    %256 = vector.shape_cast %255 : vector<1x8x8xbf16> to vector<8x8xbf16>
    %257 = vector.shape_cast %254 : vector<8x8xbf16> to vector<1x8x8xbf16>
    tpu.vector_store %arg26[%c4_166, %c0_167, %c0_168], %257 {strides = array<i32>} : memref<8x8x8xbf16, #tpu.memory_space<vmem>>, vector<1x8x8xbf16>,
    %258 = vector.extract_strided_slice %237 {offsets = [8, 8], sizes = [8, 8], strides = [1, 1]} : vector<16x32xbf16> to vector<8x8xbf16>
    %c5_169 = arith.constant 5 : index
    %c0_170 = arith.constant 0 : index
    %c0_171 = arith.constant 0 : index
    %259 = vector.load %arg26[%c5_169, %c0_170, %c0_171] : memref<8x8x8xbf16, #tpu.memory_space<vmem>>, vector<1x8x8xbf16>
    %260 = vector.shape_cast %259 : vector<1x8x8xbf16> to vector<8x8xbf16>
    %261 = vector.shape_cast %258 : vector<8x8xbf16> to vector<1x8x8xbf16>
    tpu.vector_store %arg26[%c5_169, %c0_170, %c0_171], %261 {strides = array<i32>} : memref<8x8x8xbf16, #tpu.memory_space<vmem>>, vector<1x8x8xbf16>,
    %262 = vector.extract_strided_slice %237 {offsets = [8, 16], sizes = [8, 8], strides = [1, 1]} : vector<16x32xbf16> to vector<8x8xbf16>
    %c6_172 = arith.constant 6 : index
    %c0_173 = arith.constant 0 : index
    %c0_174 = arith.constant 0 : index
    %263 = vector.load %arg26[%c6_172, %c0_173, %c0_174] : memref<8x8x8xbf16, #tpu.memory_space<vmem>>, vector<1x8x8xbf16>
    %264 = vector.shape_cast %263 : vector<1x8x8xbf16> to vector<8x8xbf16>
    %265 = vector.shape_cast %262 : vector<8x8xbf16> to vector<1x8x8xbf16>
    tpu.vector_store %arg26[%c6_172, %c0_173, %c0_174], %265 {strides = array<i32>} : memref<8x8x8xbf16, #tpu.memory_space<vmem>>, vector<1x8x8xbf16>,
    %266 = vector.extract_strided_slice %237 {offsets = [8, 24], sizes = [8, 8], strides = [1, 1]} : vector<16x32xbf16> to vector<8x8xbf16>
    %c7_175 = arith.constant 7 : index
    %c0_176 = arith.constant 0 : index
    %c0_177 = arith.constant 0 : index
    %267 = vector.load %arg26[%c7_175, %c0_176, %c0_177] : memref<8x8x8xbf16, #tpu.memory_space<vmem>>, vector<1x8x8xbf16>
    %268 = vector.shape_cast %267 : vector<1x8x8xbf16> to vector<8x8xbf16>
    %269 = vector.shape_cast %266 : vector<8x8xbf16> to vector<1x8x8xbf16>
    tpu.vector_store %arg26[%c7_175, %c0_176, %c0_177], %269 {strides = array<i32>} : memref<8x8x8xbf16, #tpu.memory_space<vmem>>, vector<1x8x8xbf16>,
    %c0_178 = arith.constant 0 : index
    %c0_179 = arith.constant 0 : index
    %c0_180 = arith.constant 0 : index
    %270 = vector.load %arg26[%c0_178, %c0_179, %c0_180] : memref<8x8x8xbf16, #tpu.memory_space<vmem>>, vector<8x8x8xbf16>
    %271 = vector.extract_strided_slice %201 {offsets = [0, 32], sizes = [16, 32], strides = [1, 1]} : vector<16x64xf32> to vector<16x32xf32>
    %272 = arith.truncf %271 : vector<16x32xf32> to vector<16x32xbf16>
    %273 = vector.extract_strided_slice %272 {offsets = [0, 0], sizes = [8, 8], strides = [1, 1]} : vector<16x32xbf16> to vector<8x8xbf16>
    %c0_181 = arith.constant 0 : index
    %c0_182 = arith.constant 0 : index
    %c0_183 = arith.constant 0 : index
    %274 = vector.load %arg27[%c0_181, %c0_182, %c0_183] : memref<8x8x8xbf16, #tpu.memory_space<vmem>>, vector<1x8x8xbf16>
    %275 = vector.shape_cast %274 : vector<1x8x8xbf16> to vector<8x8xbf16>
    %276 = vector.shape_cast %273 : vector<8x8xbf16> to vector<1x8x8xbf16>
    tpu.vector_store %arg27[%c0_181, %c0_182, %c0_183], %276 {strides = array<i32>} : memref<8x8x8xbf16, #tpu.memory_space<vmem>>, vector<1x8x8xbf16>,
    %277 = vector.extract_strided_slice %272 {offsets = [0, 8], sizes = [8, 8], strides = [1, 1]} : vector<16x32xbf16> to vector<8x8xbf16>
    %c1_184 = arith.constant 1 : index
    %c0_185 = arith.constant 0 : index
    %c0_186 = arith.constant 0 : index
    %278 = vector.load %arg27[%c1_184, %c0_185, %c0_186] : memref<8x8x8xbf16, #tpu.memory_space<vmem>>, vector<1x8x8xbf16>
    %279 = vector.shape_cast %278 : vector<1x8x8xbf16> to vector<8x8xbf16>
    %280 = vector.shape_cast %277 : vector<8x8xbf16> to vector<1x8x8xbf16>
    tpu.vector_store %arg27[%c1_184, %c0_185, %c0_186], %280 {strides = array<i32>} : memref<8x8x8xbf16, #tpu.memory_space<vmem>>, vector<1x8x8xbf16>,
    %281 = vector.extract_strided_slice %272 {offsets = [0, 16], sizes = [8, 8], strides = [1, 1]} : vector<16x32xbf16> to vector<8x8xbf16>
    %c2_187 = arith.constant 2 : index
    %c0_188 = arith.constant 0 : index
    %c0_189 = arith.constant 0 : index
    %282 = vector.load %arg27[%c2_187, %c0_188, %c0_189] : memref<8x8x8xbf16, #tpu.memory_space<vmem>>, vector<1x8x8xbf16>
    %283 = vector.shape_cast %282 : vector<1x8x8xbf16> to vector<8x8xbf16>
    %284 = vector.shape_cast %281 : vector<8x8xbf16> to vector<1x8x8xbf16>
    tpu.vector_store %arg27[%c2_187, %c0_188, %c0_189], %284 {strides = array<i32>} : memref<8x8x8xbf16, #tpu.memory_space<vmem>>, vector<1x8x8xbf16>,
    %285 = vector.extract_strided_slice %272 {offsets = [0, 24], sizes = [8, 8], strides = [1, 1]} : vector<16x32xbf16> to vector<8x8xbf16>
    %c3_190 = arith.constant 3 : index
    %c0_191 = arith.constant 0 : index
    %c0_192 = arith.constant 0 : index
    %286 = vector.load %arg27[%c3_190, %c0_191, %c0_192] : memref<8x8x8xbf16, #tpu.memory_space<vmem>>, vector<1x8x8xbf16>
    %287 = vector.shape_cast %286 : vector<1x8x8xbf16> to vector<8x8xbf16>
    %288 = vector.shape_cast %285 : vector<8x8xbf16> to vector<1x8x8xbf16>
    tpu.vector_store %arg27[%c3_190, %c0_191, %c0_192], %288 {strides = array<i32>} : memref<8x8x8xbf16, #tpu.memory_space<vmem>>, vector<1x8x8xbf16>,
    %289 = vector.extract_strided_slice %272 {offsets = [8, 0], sizes = [8, 8], strides = [1, 1]} : vector<16x32xbf16> to vector<8x8xbf16>
    %c4_193 = arith.constant 4 : index
    %c0_194 = arith.constant 0 : index
    %c0_195 = arith.constant 0 : index
    %290 = vector.load %arg27[%c4_193, %c0_194, %c0_195] : memref<8x8x8xbf16, #tpu.memory_space<vmem>>, vector<1x8x8xbf16>
    %291 = vector.shape_cast %290 : vector<1x8x8xbf16> to vector<8x8xbf16>
    %292 = vector.shape_cast %289 : vector<8x8xbf16> to vector<1x8x8xbf16>
    tpu.vector_store %arg27[%c4_193, %c0_194, %c0_195], %292 {strides = array<i32>} : memref<8x8x8xbf16, #tpu.memory_space<vmem>>, vector<1x8x8xbf16>,
    %293 = vector.extract_strided_slice %272 {offsets = [8, 8], sizes = [8, 8], strides = [1, 1]} : vector<16x32xbf16> to vector<8x8xbf16>
    %c5_196 = arith.constant 5 : index
    %c0_197 = arith.constant 0 : index
    %c0_198 = arith.constant 0 : index
    %294 = vector.load %arg27[%c5_196, %c0_197, %c0_198] : memref<8x8x8xbf16, #tpu.memory_space<vmem>>, vector<1x8x8xbf16>
    %295 = vector.shape_cast %294 : vector<1x8x8xbf16> to vector<8x8xbf16>
    %296 = vector.shape_cast %293 : vector<8x8xbf16> to vector<1x8x8xbf16>
    tpu.vector_store %arg27[%c5_196, %c0_197, %c0_198], %296 {strides = array<i32>} : memref<8x8x8xbf16, #tpu.memory_space<vmem>>, vector<1x8x8xbf16>,
    %297 = vector.extract_strided_slice %272 {offsets = [8, 16], sizes = [8, 8], strides = [1, 1]} : vector<16x32xbf16> to vector<8x8xbf16>
    %c6_199 = arith.constant 6 : index
    %c0_200 = arith.constant 0 : index
    %c0_201 = arith.constant 0 : index
    %298 = vector.load %arg27[%c6_199, %c0_200, %c0_201] : memref<8x8x8xbf16, #tpu.memory_space<vmem>>, vector<1x8x8xbf16>
    %299 = vector.shape_cast %298 : vector<1x8x8xbf16> to vector<8x8xbf16>
    %300 = vector.shape_cast %297 : vector<8x8xbf16> to vector<1x8x8xbf16>
    tpu.vector_store %arg27[%c6_199, %c0_200, %c0_201], %300 {strides = array<i32>} : memref<8x8x8xbf16, #tpu.memory_space<vmem>>, vector<1x8x8xbf16>,
    %301 = vector.extract_strided_slice %272 {offsets = [8, 24], sizes = [8, 8], strides = [1, 1]} : vector<16x32xbf16> to vector<8x8xbf16>
    %c7_202 = arith.constant 7 : index
    %c0_203 = arith.constant 0 : index
    %c0_204 = arith.constant 0 : index
    %302 = vector.load %arg27[%c7_202, %c0_203, %c0_204] : memref<8x8x8xbf16, #tpu.memory_space<vmem>>, vector<1x8x8xbf16>
    %303 = vector.shape_cast %302 : vector<1x8x8xbf16> to vector<8x8xbf16>
    %304 = vector.shape_cast %301 : vector<8x8xbf16> to vector<1x8x8xbf16>
    tpu.vector_store %arg27[%c7_202, %c0_203, %c0_204], %304 {strides = array<i32>} : memref<8x8x8xbf16, #tpu.memory_space<vmem>>, vector<1x8x8xbf16>,
    %c0_205 = arith.constant 0 : index
    %c0_206 = arith.constant 0 : index
    %c0_207 = arith.constant 0 : index
    %305 = vector.load %arg27[%c0_205, %c0_206, %c0_207] : memref<8x8x8xbf16, #tpu.memory_space<vmem>>, vector<8x8x8xbf16>
    "tpu.trace_start"() <{level = 10 : i32, message = "gtd,gsd->gts"}> : () -> ()
    %cst_208 = arith.constant dense<0.000000e+00> : vector<8x8x8xf32>
    %306 = tpu.matmul %235, %270, %cst_208 {dimension_numbers = #tpu.dot_dimension_numbers<[2], [2], [1], [1], [0, 0, 0, 1, 1, 1], [0], [0]>} : vector<8x8x8xbf16>, vector<8x8x8xbf16>, vector<8x8x8xf32> -> vector<8x8x8xf32>
    "tpu.trace_stop"() : () -> ()
    %cst_209 = arith.constant dense<0xFF800000> : vector<8x8xf32>
    %307 = vector.multi_reduction <maximumf>, %306, %cst_209 [2] : vector<8x8x8xf32> to vector<8x8xf32>
    %308 = vector.shape_cast %307 : vector<8x8xf32> to vector<8x8x1xf32>
    %309 = vector.broadcast %308 : vector<8x8x1xf32> to vector<8x8x8xf32>
    %310 = arith.subf %306, %309 : vector<8x8x8xf32>
    %311 = math.exp %310 : vector<8x8x8xf32>
    %cst_210 = arith.constant dense<0.000000e+00> : vector<8x8xf32>
    %312 = vector.multi_reduction <add>, %311, %cst_210 [2] : vector<8x8x8xf32> to vector<8x8xf32>
    %313 = vector.shape_cast %312 : vector<8x8xf32> to vector<8x8x1xf32>
    %314 = tpu.reciprocal %313 {approx = true} : vector<8x8x1xf32> -> vector<8x8x1xf32>
    %315 = vector.broadcast %314 : vector<8x8x1xf32> to vector<8x8x8xf32>
    %316 = arith.mulf %311, %315 : vector<8x8x8xf32>
    %317 = arith.truncf %316 : vector<8x8x8xf32> to vector<8x8x8xbf16>
    "tpu.trace_start"() <{level = 10 : i32, message = "gts,gsd->gtd"}> : () -> ()
    %cst_211 = arith.constant dense<0.000000e+00> : vector<8x8x8xf32>
    %318 = tpu.matmul %317, %305, %cst_211 {dimension_numbers = #tpu.dot_dimension_numbers<[2], [1], [1], [2], [0, 0, 0, 1, 1, 2], [0], [0]>} : vector<8x8x8xbf16>, vector<8x8x8xbf16>, vector<8x8x8xf32> -> vector<8x8x8xf32>
    "tpu.trace_stop"() : () -> ()
    %319 = arith.truncf %318 : vector<8x8x8xf32> to vector<8x8x8xbf16>
    %320 = vector.extract_strided_slice %319 {offsets = [0, 0, 0], sizes = [1, 8, 8], strides = [1, 1, 1]} : vector<8x8x8xbf16> to vector<1x8x8xbf16>
    %321 = vector.shape_cast %320 : vector<1x8x8xbf16> to vector<8x8xbf16>
    %c0_212 = arith.constant 0 : index
    %c0_213 = arith.constant 0 : index
    %322 = vector.load %arg28[%c0_212, %c0_213] : memref<16x32xbf16, #tpu.memory_space<vmem>>, vector<8x8xbf16>
    tpu.vector_store %arg28[%c0_212, %c0_213], %321 {strides = array<i32>} : memref<16x32xbf16, #tpu.memory_space<vmem>>, vector<8x8xbf16>,
    %323 = vector.extract_strided_slice %319 {offsets = [1, 0, 0], sizes = [1, 8, 8], strides = [1, 1, 1]} : vector<8x8x8xbf16> to vector<1x8x8xbf16>
    %324 = vector.shape_cast %323 : vector<1x8x8xbf16> to vector<8x8xbf16>
    %c0_214 = arith.constant 0 : index
    %c8_215 = arith.constant 8 : index
    %325 = vector.load %arg28[%c0_214, %c8_215] : memref<16x32xbf16, #tpu.memory_space<vmem>>, vector<8x8xbf16>
    tpu.vector_store %arg28[%c0_214, %c8_215], %324 {strides = array<i32>} : memref<16x32xbf16, #tpu.memory_space<vmem>>, vector<8x8xbf16>,
    %326 = vector.extract_strided_slice %319 {offsets = [2, 0, 0], sizes = [1, 8, 8], strides = [1, 1, 1]} : vector<8x8x8xbf16> to vector<1x8x8xbf16>
    %327 = vector.shape_cast %326 : vector<1x8x8xbf16> to vector<8x8xbf16>
    %c0_216 = arith.constant 0 : index
    %c16_217 = arith.constant 16 : index
    %328 = vector.load %arg28[%c0_216, %c16_217] : memref<16x32xbf16, #tpu.memory_space<vmem>>, vector<8x8xbf16>
    tpu.vector_store %arg28[%c0_216, %c16_217], %327 {strides = array<i32>} : memref<16x32xbf16, #tpu.memory_space<vmem>>, vector<8x8xbf16>,
    %329 = vector.extract_strided_slice %319 {offsets = [3, 0, 0], sizes = [1, 8, 8], strides = [1, 1, 1]} : vector<8x8x8xbf16> to vector<1x8x8xbf16>
    %330 = vector.shape_cast %329 : vector<1x8x8xbf16> to vector<8x8xbf16>
    %c0_218 = arith.constant 0 : index
    %c24_219 = arith.constant 24 : index
    %331 = vector.load %arg28[%c0_218, %c24_219] : memref<16x32xbf16, #tpu.memory_space<vmem>>, vector<8x8xbf16>
    tpu.vector_store %arg28[%c0_218, %c24_219], %330 {strides = array<i32>} : memref<16x32xbf16, #tpu.memory_space<vmem>>, vector<8x8xbf16>,
    %332 = vector.extract_strided_slice %319 {offsets = [4, 0, 0], sizes = [1, 8, 8], strides = [1, 1, 1]} : vector<8x8x8xbf16> to vector<1x8x8xbf16>
    %333 = vector.shape_cast %332 : vector<1x8x8xbf16> to vector<8x8xbf16>
    %c8_220 = arith.constant 8 : index
    %c0_221 = arith.constant 0 : index
    %334 = vector.load %arg28[%c8_220, %c0_221] : memref<16x32xbf16, #tpu.memory_space<vmem>>, vector<8x8xbf16>
    tpu.vector_store %arg28[%c8_220, %c0_221], %333 {strides = array<i32>} : memref<16x32xbf16, #tpu.memory_space<vmem>>, vector<8x8xbf16>,
    %335 = vector.extract_strided_slice %319 {offsets = [5, 0, 0], sizes = [1, 8, 8], strides = [1, 1, 1]} : vector<8x8x8xbf16> to vector<1x8x8xbf16>
    %336 = vector.shape_cast %335 : vector<1x8x8xbf16> to vector<8x8xbf16>
    %c8_222 = arith.constant 8 : index
    %c8_223 = arith.constant 8 : index
    %337 = vector.load %arg28[%c8_222, %c8_223] : memref<16x32xbf16, #tpu.memory_space<vmem>>, vector<8x8xbf16>
    tpu.vector_store %arg28[%c8_222, %c8_223], %336 {strides = array<i32>} : memref<16x32xbf16, #tpu.memory_space<vmem>>, vector<8x8xbf16>,
    %338 = vector.extract_strided_slice %319 {offsets = [6, 0, 0], sizes = [1, 8, 8], strides = [1, 1, 1]} : vector<8x8x8xbf16> to vector<1x8x8xbf16>
    %339 = vector.shape_cast %338 : vector<1x8x8xbf16> to vector<8x8xbf16>
    %c8_224 = arith.constant 8 : index
    %c16_225 = arith.constant 16 : index
    %340 = vector.load %arg28[%c8_224, %c16_225] : memref<16x32xbf16, #tpu.memory_space<vmem>>, vector<8x8xbf16>
    tpu.vector_store %arg28[%c8_224, %c16_225], %339 {strides = array<i32>} : memref<16x32xbf16, #tpu.memory_space<vmem>>, vector<8x8xbf16>,
    %341 = vector.extract_strided_slice %319 {offsets = [7, 0, 0], sizes = [1, 8, 8], strides = [1, 1, 1]} : vector<8x8x8xbf16> to vector<1x8x8xbf16>
    %342 = vector.shape_cast %341 : vector<1x8x8xbf16> to vector<8x8xbf16>
    %c8_226 = arith.constant 8 : index
    %c24_227 = arith.constant 24 : index
    %343 = vector.load %arg28[%c8_226, %c24_227] : memref<16x32xbf16, #tpu.memory_space<vmem>>, vector<8x8xbf16>
    tpu.vector_store %arg28[%c8_226, %c24_227], %342 {strides = array<i32>} : memref<16x32xbf16, #tpu.memory_space<vmem>>, vector<8x8xbf16>,
    %c0_228 = arith.constant 0 : index
    %c0_229 = arith.constant 0 : index
    %344 = vector.load %arg28[%c0_228, %c0_229] : memref<16x32xbf16, #tpu.memory_space<vmem>>, vector<16x32xbf16>
    %c0_230 = arith.constant 0 : index
    %c0_231 = arith.constant 0 : index
    %345 = vector.load %arg13[%c0_230, %c0_231] : memref<32x32xbf16, #tpu.memory_space<vmem>>, vector<32x32xbf16>
    %cst_232 = arith.constant dense<0.000000e+00> : vector<16x32xf32>
    %346 = tpu.matmul %344, %345, %cst_232 {dimension_numbers = #tpu.dot_dimension_numbers<[1], [0], [0], [1], [0, 0, 1, 1], [], []>} : vector<16x32xbf16>, vector<32x32xbf16>, vector<16x32xf32> -> vector<16x32xf32>
    %c0_233 = arith.constant 0 : index
    %c0_234 = arith.constant 0 : index
    %347 = vector.load %arg14[%c0_233, %c0_234] : memref<1x32xf32, #tpu.memory_space<vmem>>, vector<1x32xf32>
    %348 = vector.broadcast %347 : vector<1x32xf32> to vector<16x32xf32>
    %349 = arith.addf %346, %348 : vector<16x32xf32>
    %350 = arith.addf %189, %349 : vector<16x32xf32>
    %c0_235 = arith.constant 0 : index
    %c0_236 = arith.constant 0 : index
    %351 = vector.load %arg15[%c0_235, %c0_236] : memref<1x32xf32, #tpu.memory_space<vmem>>, vector<1x32xf32>
    %c0_237 = arith.constant 0 : index
    %c0_238 = arith.constant 0 : index
    %352 = vector.load %arg16[%c0_237, %c0_238] : memref<1x32xf32, #tpu.memory_space<vmem>>, vector<1x32xf32>
    %cst_239 = arith.constant dense<0.000000e+00> : vector<16xf32>
    %353 = vector.multi_reduction <add>, %350, %cst_239 [1] : vector<16x32xf32> to vector<16xf32>
    %354 = vector.shape_cast %353 : vector<16xf32> to vector<16x1xf32>
    %cst_240 = arith.constant 3.200000e+01 : f32
    %355 = vector.broadcast %cst_240 : f32 to vector<16x1xf32>
    %356 = arith.divf %354, %355 : vector<16x1xf32>
    %357 = vector.broadcast %356 : vector<16x1xf32> to vector<16x32xf32>
    %358 = arith.subf %350, %357 : vector<16x32xf32>
    %359 = arith.mulf %358, %358 : vector<16x32xf32>
    %cst_241 = arith.constant dense<0.000000e+00> : vector<16xf32>
    %360 = vector.multi_reduction <add>, %359, %cst_241 [1] : vector<16x32xf32> to vector<16xf32>
    %361 = vector.shape_cast %360 : vector<16xf32> to vector<16x1xf32>
    %cst_242 = arith.constant 3.200000e+01 : f32
    %362 = vector.broadcast %cst_242 : f32 to vector<16x1xf32>
    %363 = arith.divf %361, %362 : vector<16x1xf32>
    %cst_243 = arith.constant 9.99999974E-6 : f32
    %364 = vector.broadcast %cst_243 : f32 to vector<16x1xf32>
    %365 = arith.addf %363, %364 : vector<16x1xf32>
    %366 = math.rsqrt %365 : vector<16x1xf32>
    %367 = vector.broadcast %366 : vector<16x1xf32> to vector<16x32xf32>
    %368 = arith.mulf %358, %367 : vector<16x32xf32>
    %369 = vector.broadcast %351 : vector<1x32xf32> to vector<16x32xf32>
    %370 = arith.mulf %368, %369 : vector<16x32xf32>
    %371 = vector.broadcast %352 : vector<1x32xf32> to vector<16x32xf32>
    %372 = arith.addf %370, %371 : vector<16x32xf32>
    %373 = vector.shape_cast %316 : vector<8x8x8xf32> to vector<2x4x8x8xf32>
    %cst_244 = arith.constant dense<0.000000e+00> : vector<2x8x8xf32>
    %374 = vector.multi_reduction <add>, %373, %cst_244 [1] : vector<2x4x8x8xf32> to vector<2x8x8xf32>
    %cst_245 = arith.constant 4.000000e+00 : f32
    %375 = vector.broadcast %cst_245 : f32 to vector<2x8x8xf32>
    %376 = arith.divf %374, %375 : vector<2x8x8xf32>
    %c0_246 = arith.constant 0 : index
    %c0_247 = arith.constant 0 : index
    %c0_248 = arith.constant 0 : index
    %377 = vector.load %arg24[%c0_246, %c0_247, %c0_248] : memref<2x8x8xf32, #tpu.memory_space<vmem>>, vector<2x8x8xf32>
    tpu.vector_store %arg24[%c0_246, %c0_247, %c0_248], %376 {strides = array<i32>} : memref<2x8x8xf32, #tpu.memory_space<vmem>>, vector<2x8x8xf32>,
    %378 = arith.truncf %372 : vector<16x32xf32> to vector<16x32xbf16>
    %c0_249 = arith.constant 0 : index
    %c0_250 = arith.constant 0 : index
    %379 = vector.load %arg17[%c0_249, %c0_250] : memref<32x64xbf16, #tpu.memory_space<vmem>>, vector<32x64xbf16>
    %cst_251 = arith.constant dense<0.000000e+00> : vector<16x64xf32>
    %380 = tpu.matmul %378, %379, %cst_251 {dimension_numbers = #tpu.dot_dimension_numbers<[1], [0], [0], [1], [0, 0, 1, 1], [], []>} : vector<16x32xbf16>, vector<32x64xbf16>, vector<16x64xf32> -> vector<16x64xf32>
    %c0_252 = arith.constant 0 : index
    %c0_253 = arith.constant 0 : index
    %381 = vector.load %arg18[%c0_252, %c0_253] : memref<1x64xf32, #tpu.memory_space<vmem>>, vector<1x64xf32>
    %382 = vector.broadcast %381 : vector<1x64xf32> to vector<16x64xf32>
    %383 = arith.addf %380, %382 : vector<16x64xf32>
    %cst_254 = arith.constant 0.000000e+00 : f32
    %384 = vector.broadcast %cst_254 : f32 to vector<16x64xf32>
    %385 = arith.maximumf %383, %384 : vector<16x64xf32>
    %386 = arith.truncf %385 : vector<16x64xf32> to vector<16x64xbf16>
    %c0_255 = arith.constant 0 : index
    %c0_256 = arith.constant 0 : index
    %387 = vector.load %arg19[%c0_255, %c0_256] : memref<64x32xbf16, #tpu.memory_space<vmem>>, vector<64x32xbf16>
    %cst_257 = arith.constant dense<0.000000e+00> : vector<16x32xf32>
    %388 = tpu.matmul %386, %387, %cst_257 {dimension_numbers = #tpu.dot_dimension_numbers<[1], [0], [0], [1], [0, 0, 1, 1], [], []>} : vector<16x64xbf16>, vector<64x32xbf16>, vector<16x32xf32> -> vector<16x32xf32>
    %c0_258 = arith.constant 0 : index
    %c0_259 = arith.constant 0 : index
    %389 = vector.load %arg20[%c0_258, %c0_259] : memref<1x32xf32, #tpu.memory_space<vmem>>, vector<1x32xf32>
    %390 = vector.broadcast %389 : vector<1x32xf32> to vector<16x32xf32>
    %391 = arith.addf %388, %390 : vector<16x32xf32>
    %392 = arith.addf %372, %391 : vector<16x32xf32>
    %c0_260 = arith.constant 0 : index
    %c0_261 = arith.constant 0 : index
    %393 = vector.load %arg21[%c0_260, %c0_261] : memref<1x32xf32, #tpu.memory_space<vmem>>, vector<1x32xf32>
    %c0_262 = arith.constant 0 : index
    %c0_263 = arith.constant 0 : index
    %394 = vector.load %arg22[%c0_262, %c0_263] : memref<1x32xf32, #tpu.memory_space<vmem>>, vector<1x32xf32>
    %cst_264 = arith.constant dense<0.000000e+00> : vector<16xf32>
    %395 = vector.multi_reduction <add>, %392, %cst_264 [1] : vector<16x32xf32> to vector<16xf32>
    %396 = vector.shape_cast %395 : vector<16xf32> to vector<16x1xf32>
    %cst_265 = arith.constant 3.200000e+01 : f32
    %397 = vector.broadcast %cst_265 : f32 to vector<16x1xf32>
    %398 = arith.divf %396, %397 : vector<16x1xf32>
    %399 = vector.broadcast %398 : vector<16x1xf32> to vector<16x32xf32>
    %400 = arith.subf %392, %399 : vector<16x32xf32>
    %401 = arith.mulf %400, %400 : vector<16x32xf32>
    %cst_266 = arith.constant dense<0.000000e+00> : vector<16xf32>
    %402 = vector.multi_reduction <add>, %401, %cst_266 [1] : vector<16x32xf32> to vector<16xf32>
    %403 = vector.shape_cast %402 : vector<16xf32> to vector<16x1xf32>
    %cst_267 = arith.constant 3.200000e+01 : f32
    %404 = vector.broadcast %cst_267 : f32 to vector<16x1xf32>
    %405 = arith.divf %403, %404 : vector<16x1xf32>
    %cst_268 = arith.constant 9.99999974E-6 : f32
    %406 = vector.broadcast %cst_268 : f32 to vector<16x1xf32>
    %407 = arith.addf %405, %406 : vector<16x1xf32>
    %408 = math.rsqrt %407 : vector<16x1xf32>
    %409 = vector.broadcast %408 : vector<16x1xf32> to vector<16x32xf32>
    %410 = arith.mulf %400, %409 : vector<16x32xf32>
    %411 = vector.broadcast %393 : vector<1x32xf32> to vector<16x32xf32>
    %412 = arith.mulf %410, %411 : vector<16x32xf32>
    %413 = vector.broadcast %394 : vector<1x32xf32> to vector<16x32xf32>
    %414 = arith.addf %412, %413 : vector<16x32xf32>
    %415 = vector.shape_cast %414 : vector<16x32xf32> to vector<2x8x32xf32>
    %c0_269 = arith.constant 0 : index
    %c0_270 = arith.constant 0 : index
    %c0_271 = arith.constant 0 : index
    %416 = vector.load %arg23[%c0_269, %c0_270, %c0_271] : memref<2x8x32xf32, #tpu.memory_space<vmem>>, vector<2x8x32xf32>
    tpu.vector_store %arg23[%c0_269, %c0_270, %c0_271], %415 {strides = array<i32>} : memref<2x8x32xf32, #tpu.memory_space<vmem>>, vector<2x8x32xf32>,
    return
  }
  func.func @transform_0(%arg0: i32) -> (i32, i32, i32) {
    %c0_i32 = arith.constant 0 : i32
    %c0_i32_0 = arith.constant 0 : i32
    %c0_i32_1 = arith.constant 0 : i32
    return %arg0, %c0_i32, %c0_i32_0 : i32, i32, i32
  }
  func.func @transform_1(%arg0: i32) -> (i32, i32, i32) {
    %c0_i32 = arith.constant 0 : i32
    %c0_i32_0 = arith.constant 0 : i32
    %c0_i32_1 = arith.constant 0 : i32
    return %arg0, %c0_i32, %c0_i32_0 : i32, i32, i32
  }
  func.func @transform_2(%arg0: i32) -> (i32, i32) {
    %c0_i32 = arith.constant 0 : i32
    %c0_i32_0 = arith.constant 0 : i32
    %c0_i32_1 = arith.constant 0 : i32
    return %c0_i32, %c0_i32_0 : i32, i32
  }
  func.func @transform_3(%arg0: i32) -> (i32, i32) {
    %c0_i32 = arith.constant 0 : i32
    %c0_i32_0 = arith.constant 0 : i32
    %c0_i32_1 = arith.constant 0 : i32
    return %c0_i32, %c0_i32_0 : i32, i32
  }
  func.func @transform_4(%arg0: i32) -> (i32, i32) {
    %c0_i32 = arith.constant 0 : i32
    %c0_i32_0 = arith.constant 0 : i32
    %c0_i32_1 = arith.constant 0 : i32
    return %c0_i32, %c0_i32_0 : i32, i32
  }
  func.func @transform_5(%arg0: i32) -> (i32, i32) {
    %c0_i32 = arith.constant 0 : i32
    %c0_i32_0 = arith.constant 0 : i32
    %c0_i32_1 = arith.constant 0 : i32
    return %c0_i32, %c0_i32_0 : i32, i32
  }
  func.func @transform_6(%arg0: i32) -> (i32, i32) {
    %c0_i32 = arith.constant 0 : i32
    %c0_i32_0 = arith.constant 0 : i32
    %c0_i32_1 = arith.constant 0 : i32
    return %c0_i32, %c0_i32_0 : i32, i32
  }
  func.func @transform_7(%arg0: i32) -> (i32, i32) {
    %c0_i32 = arith.constant 0 : i32
    %c0_i32_0 = arith.constant 0 : i32
    %c0_i32_1 = arith.constant 0 : i32
    return %c0_i32, %c0_i32_0 : i32, i32
  }
  func.func @transform_8(%arg0: i32) -> (i32, i32) {
    %c0_i32 = arith.constant 0 : i32
    %c0_i32_0 = arith.constant 0 : i32
    %c0_i32_1 = arith.constant 0 : i32
    return %c0_i32, %c0_i32_0 : i32, i32
  }
  func.func @transform_9(%arg0: i32) -> (i32, i32) {
    %c0_i32 = arith.constant 0 : i32
    %c0_i32_0 = arith.constant 0 : i32
    %c0_i32_1 = arith.constant 0 : i32
    return %c0_i32, %c0_i32_0 : i32, i32
  }
  func.func @transform_10(%arg0: i32) -> (i32, i32) {
    %c0_i32 = arith.constant 0 : i32
    %c0_i32_0 = arith.constant 0 : i32
    %c0_i32_1 = arith.constant 0 : i32
    return %c0_i32, %c0_i32_0 : i32, i32
  }
  func.func @transform_11(%arg0: i32) -> (i32, i32) {
    %c0_i32 = arith.constant 0 : i32
    %c0_i32_0 = arith.constant 0 : i32
    %c0_i32_1 = arith.constant 0 : i32
    return %c0_i32, %c0_i32_0 : i32, i32
  }
  func.func @transform_12(%arg0: i32) -> (i32, i32) {
    %c0_i32 = arith.constant 0 : i32
    %c0_i32_0 = arith.constant 0 : i32
    %c0_i32_1 = arith.constant 0 : i32
    return %c0_i32, %c0_i32_0 : i32, i32
  }
  func.func @transform_13(%arg0: i32) -> (i32, i32) {
    %c0_i32 = arith.constant 0 : i32
    %c0_i32_0 = arith.constant 0 : i32
    %c0_i32_1 = arith.constant 0 : i32
    return %c0_i32, %c0_i32_0 : i32, i32
  }
  func.func @transform_14(%arg0: i32) -> (i32, i32) {
    %c0_i32 = arith.constant 0 : i32
    %c0_i32_0 = arith.constant 0 : i32
    %c0_i32_1 = arith.constant 0 : i32
    return %c0_i32, %c0_i32_0 : i32, i32
  }
  func.func @transform_15(%arg0: i32) -> (i32, i32) {
    %c0_i32 = arith.constant 0 : i32
    %c0_i32_0 = arith.constant 0 : i32
    %c0_i32_1 = arith.constant 0 : i32
    return %c0_i32, %c0_i32_0 : i32, i32
  }
  func.func @transform_16(%arg0: i32) -> (i32, i32) {
    %c0_i32 = arith.constant 0 : i32
    %c0_i32_0 = arith.constant 0 : i32
    %c0_i32_1 = arith.constant 0 : i32
    return %c0_i32, %c0_i32_0 : i32, i32
  }
  func.func @transform_17(%arg0: i32) -> (i32, i32) {
    %c0_i32 = arith.constant 0 : i32
    %c0_i32_0 = arith.constant 0 : i32
    %c0_i32_1 = arith.constant 0 : i32
    return %c0_i32, %c0_i32_0 : i32, i32
  }
  func.func @transform_18(%arg0: i32) -> (i32, i32) {
    %c0_i32 = arith.constant 0 : i32
    %c0_i32_0 = arith.constant 0 : i32
    %c0_i32_1 = arith.constant 0 : i32
    return %c0_i32, %c0_i32_0 : i32, i32
  }
  func.func @transform_19(%arg0: i32) -> (i32, i32) {
    %c0_i32 = arith.constant 0 : i32
    %c0_i32_0 = arith.constant 0 : i32
    %c0_i32_1 = arith.constant 0 : i32
    return %c0_i32, %c0_i32_0 : i32, i32
  }
  func.func @transform_20(%arg0: i32) -> (i32, i32) {
    %c0_i32 = arith.constant 0 : i32
    %c0_i32_0 = arith.constant 0 : i32
    %c0_i32_1 = arith.constant 0 : i32
    return %c0_i32, %c0_i32_0 : i32, i32
  }
  func.func @transform_21(%arg0: i32) -> (i32, i32) {
    %c0_i32 = arith.constant 0 : i32
    %c0_i32_0 = arith.constant 0 : i32
    %c0_i32_1 = arith.constant 0 : i32
    return %c0_i32, %c0_i32_0 : i32, i32
  }
  func.func @transform_22(%arg0: i32) -> (i32, i32, i32) {
    %c0_i32 = arith.constant 0 : i32
    %c0_i32_0 = arith.constant 0 : i32
    %c0_i32_1 = arith.constant 0 : i32
    return %arg0, %c0_i32, %c0_i32_0 : i32, i32, i32
  }
  func.func @transform_23(%arg0: i32) -> (i32, i32, i32) {
    %c0_i32 = arith.constant 0 : i32
    %c0_i32_0 = arith.constant 0 : i32
    %c0_i32_1 = arith.constant 0 : i32
    return %arg0, %c0_i32, %c0_i32_0 : i32, i32, i32
  }
}

</mosaic_0001>

<bundles_post_ra>
// kernel: tpu_custom_call.1
= control target key start
LH: loop header
LB: loop body
LE: loop exit
PB: predicated region body
PF: predicated region fallthrough
CT: control target
= control target key end

     0   :  { %s4711_s0 = inlined_call_operand.vmem [shape: f32[2,8,32], index: 0, kind: input, shape index: {}]   ;;  %s4712_s1 = inlined_call_operand.vmem [shape: f32[2,8,32], index: 1, kind: input, shape index: {}]   ;;  %s4713_s2 = inlined_call_operand.vmem [shape: bf16[32,96], index: 2, kind: input, shape index: {}]   ;;  %s4714_s3 = inlined_call_operand.hbm [shape: f32[1,96], index: 3, kind: input, shape index: {}]   ;;  %s4715_s4 = inlined_call_operand.hbm [shape: bf16[32,32], index: 4, kind: input, shape index: {}]   ;;  %s4716_s5 = inlined_call_operand.hbm [shape: f32[1,32], index: 5, kind: input, shape index: {}]   ;;  %s4717_s6 = inlined_call_operand.hbm [shape: f32[1,32], index: 6, kind: input, shape index: {}]   ;;  %s4718_s7 = inlined_call_operand.hbm [shape: f32[1,32], index: 7, kind: input, shape index: {}]   ;;  %s4719_s8 = inlined_call_operand.hbm [shape: bf16[32,32], index: 8, kind: input, shape index: {}]   ;;  %s4720_s9 = inlined_call_operand.hbm [shape: f32[1,32], index: 9, kind: input, shape index: {}]   ;;  %s4721_s10 = inlined_call_operand.vmem [shape: bf16[32,64], index: 10, kind: input, shape index: {}]   ;;  %s4722_s11 = inlined_call_operand.hbm [shape: f32[1,64], index: 11, kind: input, shape index: {}]   ;;  %s4723_s12 = inlined_call_operand.hbm [shape: bf16[32,32], index: 12, kind: input, shape index: {}]   ;;  %s4724_s13 = inlined_call_operand.hbm [shape: f32[1,32], index: 13, kind: input, shape index: {}]   ;;  %s4725_s14 = inlined_call_operand.hbm [shape: f32[1,32], index: 14, kind: input, shape index: {}]   ;;  %s4726_s15 = inlined_call_operand.hbm [shape: f32[1,32], index: 15, kind: input, shape index: {}]   ;;  %s4727_s16 = inlined_call_operand.hbm [shape: bf16[32,64], index: 16, kind: input, shape index: {}]   ;;  %s4728_s17 = inlined_call_operand.hbm [shape: f32[1,64], index: 17, kind: input, shape index: {}]   ;;  %s4729_s18 = inlined_call_operand.vmem [shape: bf16[64,32], index: 18, kind: input, shape index: {}]   ;;  %s4730_s19 = inlined_call_operand.vmem [shape: f32[1,32], index: 19, kind: input, shape index: {}]   ;;  %s4731_s20 = inlined_call_operand.vmem [shape: f32[1,32], index: 20, kind: input, shape index: {}]   ;;  %s4732_s21 = inlined_call_operand.vmem [shape: f32[1,32], index: 21, kind: input, shape index: {}]   ;;  %s4733_s22 = inlined_call_operand.hbm [shape: f32[2,8,32], index: 22, kind: output, shape index: {0}]   ;;  %s4734_s23 = inlined_call_operand.hbm [shape: f32[2,8,8], index: 23, kind: output, shape index: {1}]  }
   0x1   :  { %4738 = sst [smem:[#allocation42_spill]] %s4711_s0 }
   0x2   :  { %4739 = sst [smem:[#allocation43_spill]] %s4712_s1 }
   0x3   :  { %4740 = sst [smem:[#allocation44_spill]] %s4713_s2 }
   0x4   :  { %4741 = sst [smem:[#allocation45_spill]] %s4714_s3 }
   0x5   :  { %4742 = sst [smem:[#allocation46_spill]] %s4715_s4 }
   0x6   :  { %4743 = sst [smem:[#allocation47_spill]] %s4716_s5 }
   0x7   :  { %4744 = sst [smem:[#allocation48_spill]] %s4717_s6 }
   0x8   :  { %4745 = sst [smem:[#allocation49_spill]] %s4718_s7 }
   0x9   :  { %29 = vsyncpa [#allocation7], 0 }
   0xa   :  { %30 = vsyncpa [#allocation10], 0 }
   0xb   :  { %31 = vsyncpa [#allocation13], 0 }
   0xc   :  { %32 = vsyncpa [#allocation16], 0 }
   0xd   :  { %33 = vsyncpa [#allocation19], 0 }
   0xe   :  { %34 = vsyncpa [#allocation22], 0 }
   0xf   :  { %35 = vsyncpa [#allocation25], 0 }
  0x10   :  { %36 = vsyncpa [#allocation28], 0 }
  0x11   :  { %37 = vsyncpa [#allocation8], 0 }
  0x12   :  { %38 = vsyncpa [#allocation31], 0  ;;  %s3924_s4 = smov [#allocation9]  }
  0x13   :  { %s60_s30 = sshll.u32 %s3924_s4, 4  ;;  %s61_s30 = int_to_ptr.vmem [resolvable:$true] %s60_s30 }
  0x14   :  { %s3592_s24 = scalar_lea.vmem %s61_s30, 256  ;;  %p3597_p1 = scmp.lt.s32.totalorder %s61_s30, %s61_s30 }
  0x15   :  { %p3593_p0 = scmp.ne.s32.totalorder %s61_s30, %s3592_s24  ;;  %p3598_p2 = scmp.lt.s32.totalorder %s3592_s24, %s3592_s24 }
  0x17   :  { %p3599_p3 = por %p3598_p2, %p3597_p1 }
  0x19   :  { %p3600_p4 = pnand %p3599_p3, %p3593_p0 }
  0x1b   :  { %3603 = shalt.err (!%p3600_p4)
}
  0x1c   :  { %s3925_s25 = smov 64   ;;  %s3926_s5 = smov 4  }
  0x1d   :  { %s4746_s2 = sld [smem:[#allocation46_spill]]  ;;  %s3927_s6 = smov [#allocation12]  }
  0x1e   :  { %s83_s27 = sshll.u32 %s3927_s6, 4  ;;  %s3928_s7 = smov [#allocation15]   ;;  %s84_s27 = int_to_ptr.vmem [resolvable:$true] %s83_s27 }
  0x1f   :  { %s102_s28 = sshll.u32 %s3928_s7, 4  ;;  %s3612_s29 = scalar_lea.vmem %s84_s27, 16  ;;  %s103_s28 = int_to_ptr.vmem [resolvable:$true] %s102_s28 }
  0x20   :  { %p3613_p5 = scmp.ne.s32.totalorder %s84_s27, %s3612_s29  ;;  %s3616_s3 = scalar_lea.vmem %s84_s27, 32 }
  0x21   :  { %p3617_p6 = scmp.lt.s32.totalorder %s84_s27, %s84_s27  ;;  %p3618_p7 = scmp.lt.s32.totalorder %s3616_s3, %s3612_s29 }
  0x23   :  { %66 = dma.hbm_to_vmem [thread:$0]  %s4746_s2, 256, %s61_s30, [#allocation10], %s3925_s25, %s3925_s25, %s3926_s5  }
  0x24   :  { %p3619_p8 = por %p3618_p7, %p3617_p6 }
  0x26   :  { %p3620_p9 = pnand %p3619_p8, %p3613_p5 }
  0x28   :  { %3623 = shalt.err (!%p3620_p9)
}
  0x29   :  { %s4747_s24 = sld [smem:[#allocation48_spill]]  ;;  %s3632_s1 = scalar_lea.vmem %s103_s28, 256 }
  0x2a   :  { %p3633_p10 = scmp.ne.s32.totalorder %s103_s28, %s3632_s1  ;;  %p3637_p11 = scmp.lt.s32.totalorder %s103_s28, %s103_s28 }
  0x2b   :  { %p3638_p12 = scmp.lt.s32.totalorder %s3632_s1, %s3632_s1 }
  0x2d   :  { %p3639_p13 = por %p3638_p12, %p3637_p11 }
  0x2f   :  { %86 = dma.hbm_to_vmem [thread:$0]  %s4747_s24, 16, %s84_s27, [#allocation13]  }
  0x30   :  { %p3640_p0 = pnand %p3639_p13, %p3633_p10 }
  0x32   :  { %3643 = shalt.err (!%p3640_p0)
}
  0x33   :  { %108 = dma.hbm_to_vmem [thread:$0]  %s4719_s8, 256, %s103_s28, [#allocation16], %s3925_s25, %s3925_s25, %s3926_s5  }
  0x34   :  { %s3929_s2 = smov [#allocation18]   ;;  %s3930_s7 = smov [#allocation21]  }
  0x35   :  { %s127_s6 = sshll.u32 %s3929_s2, 4  ;;  %s149_s27 = sshll.u32 %s3930_s7, 4  ;;  %s128_s6 = int_to_ptr.vmem [resolvable:$true] %s127_s6  ;;  %s150_s27 = int_to_ptr.vmem [resolvable:$true] %s149_s27 }
  0x36   :  { %s3652_s29 = scalar_lea.vmem %s128_s6, 16  ;;  %s3656_s3 = scalar_lea.vmem %s128_s6, 32 }
  0x37   :  { %p3653_p1 = scmp.ne.s32.totalorder %s128_s6, %s3652_s29  ;;  %p3657_p2 = scmp.lt.s32.totalorder %s128_s6, %s128_s6 }
  0x38   :  { %p3658_p3 = scmp.lt.s32.totalorder %s3656_s3, %s3652_s29 }
  0x3a   :  { %p3659_p4 = por %p3658_p3, %p3657_p2 }
  0x3c   :  { %p3660_p5 = pnand %p3659_p4, %p3653_p1 }
  0x3e   :  { %3663 = shalt.err (!%p3660_p5)
}
  0x3f   :  { %130 = dma.hbm_to_vmem [thread:$0]  %s4722_s11, 16, %s128_s6, [#allocation19]  }
  0x40   :  { %s3672_s24 = scalar_lea.vmem %s150_s27, 16  ;;  %s3676_s8 = scalar_lea.vmem %s150_s27, 32 }
  0x41   :  { %p3673_p6 = scmp.ne.s32.totalorder %s150_s27, %s3672_s24  ;;  %p3677_p7 = scmp.lt.s32.totalorder %s150_s27, %s150_s27 }
  0x42   :  { %p3678_p8 = scmp.lt.s32.totalorder %s3676_s8, %s3672_s24 }
  0x44   :  { %p3679_p9 = por %p3678_p8, %p3677_p7 }
  0x46   :  { %p3680_p10 = pnand %p3679_p9, %p3673_p6 }
  0x48   :  { %3683 = shalt.err (!%p3680_p10)
}
  0x49   :  { %152 = dma.hbm_to_vmem [thread:$0]  %s4724_s13, 16, %s150_s27, [#allocation22]  }
  0x4a   :  { %s3931_s30 = smov [#allocation24]   ;;  %s3932_s2 = smov [#allocation6]  }
  0x4b   :  { %s169_s26 = sshll.u32 %s3931_s30, 4  ;;  %s51_s7 = sshll.u32 %s3932_s2, 4  ;;  %s170_s26 = int_to_ptr.vmem [resolvable:$true] %s169_s26  ;;  %s52_s7 = int_to_ptr.vmem [resolvable:$true] %s51_s7 }
  0x4c   :  { %s3692_s29 = scalar_lea.vmem %s170_s26, 16  ;;  %s3696_s11 = scalar_lea.vmem %s170_s26, 32 }
  0x4d   :  { %p3693_p11 = scmp.ne.s32.totalorder %s170_s26, %s3692_s29  ;;  %p3697_p12 = scmp.lt.s32.totalorder %s170_s26, %s170_s26 }
  0x4e   :  { %p3698_p13 = scmp.lt.s32.totalorder %s3696_s11, %s3692_s29 }
  0x50   :  { %p3699_p0 = por %p3698_p13, %p3697_p12 }
  0x52   :  { %p3700_p1 = pnand %p3699_p0, %p3693_p11 }
  0x54   :  { %3703 = shalt.err (!%p3700_p1)
}
  0x55   :  { %172 = dma.hbm_to_vmem [thread:$0]  %s4726_s15, 16, %s170_s26, [#allocation25]  }
  0x56   :  { %s3712_s0 = scalar_lea.vmem %s52_s7, 16  ;;  %s3716_s13 = scalar_lea.vmem %s52_s7, 32 }
  0x57   :  { %p3713_p2 = scmp.ne.s32.totalorder %s52_s7, %s3712_s0  ;;  %p3717_p3 = scmp.lt.s32.totalorder %s52_s7, %s52_s7 }
  0x58   :  { %p3718_p4 = scmp.lt.s32.totalorder %s3716_s13, %s3712_s0 }
  0x5a   :  { %p3719_p5 = por %p3718_p4, %p3717_p3 }
  0x5c   :  { %p3720_p6 = pnand %p3719_p5, %p3713_p2 }
  0x5e   :  { %3723 = shalt.err (!%p3720_p6)
}
  0x5f   :  { %s4748_s24 = sld [smem:[#allocation45_spill]]  ;;  %s3933_s8 = smov [#allocation11]  }
  0x60   :  { %s73_s28 = sshll.u32 %s3933_s8, 4  ;;  %s3934_s1 = smov [#allocation14]   ;;  %s74_s28 = int_to_ptr.vmem [resolvable:$true] %s73_s28 }
  0x61   :  { %s93_s30 = sshll.u32 %s3934_s1, 4  ;;  %s3732_s2 = scalar_lea.vmem %s74_s28, 16  ;;  %s94_s30 = int_to_ptr.vmem [resolvable:$true] %s93_s30 }
  0x62   :  { %p3733_p7 = scmp.ne.s32.totalorder %s74_s28, %s3732_s2  ;;  %s3736_s15 = scalar_lea.vmem %s74_s28, 32 }
  0x63   :  { %p3737_p8 = scmp.lt.s32.totalorder %s74_s28, %s74_s28  ;;  %p3738_p9 = scmp.lt.s32.totalorder %s3736_s15, %s3732_s2 }
  0x65   :  { %54 = dma.hbm_to_vmem [thread:$0]  %s4748_s24, 16, %s52_s7, [#allocation7]  }
  0x66   :  { %p3739_p10 = por %p3738_p9, %p3737_p8 }
  0x68   :  { %p3740_p11 = pnand %p3739_p10, %p3733_p7 }
  0x6a   :  { %3743 = shalt.err (!%p3740_p11)
}
  0x6b   :  { %s4749_s11 = sld [smem:[#allocation47_spill]]  ;;  %s3752_s6 = scalar_lea.vmem %s94_s30, 16 }
  0x6c   :  { %p3753_p12 = scmp.ne.s32.totalorder %s94_s30, %s3752_s6  ;;  %s3756_s7 = scalar_lea.vmem %s94_s30, 32 }
  0x6d   :  { %p3757_p13 = scmp.lt.s32.totalorder %s94_s30, %s94_s30  ;;  %p3758_p0 = scmp.lt.s32.totalorder %s3756_s7, %s3752_s6 }
  0x6f   :  { %p3759_p1 = por %p3758_p0, %p3757_p13 }
  0x71   :  { %76 = dma.hbm_to_vmem [thread:$0]  %s4749_s11, 16, %s74_s28, [#allocation10]  }
  0x72   :  { %p3760_p2 = pnand %p3759_p1, %p3753_p12 }
  0x74   :  { %3763 = shalt.err (!%p3760_p2)
}
  0x75   :  { %s4750_s13 = sld [smem:[#allocation49_spill]]  ;;  %s3935_s27 = smov [#allocation17]  }
  0x76   :  { %s115_s4 = sshll.u32 %s3935_s27, 4  ;;  %s3936_s24 = smov [#allocation20]   ;;  %s116_s4 = int_to_ptr.vmem [resolvable:$true] %s115_s4 }
  0x77   :  { %s136_s8 = sshll.u32 %s3936_s24, 4  ;;  %s3772_s1 = scalar_lea.vmem %s116_s4, 16  ;;  %s137_s8 = int_to_ptr.vmem [resolvable:$true] %s136_s8 }
  0x78   :  { %p3773_p3 = scmp.ne.s32.totalorder %s116_s4, %s3772_s1  ;;  %s3776_s28 = scalar_lea.vmem %s116_s4, 32 }
  0x79   :  { %p3777_p4 = scmp.lt.s32.totalorder %s116_s4, %s116_s4  ;;  %p3778_p5 = scmp.lt.s32.totalorder %s3776_s28, %s3772_s1 }
  0x7b   :  { %96 = dma.hbm_to_vmem [thread:$0]  %s4750_s13, 16, %s94_s30, [#allocation13]  }
  0x7c   :  { %p3779_p6 = por %p3778_p5, %p3777_p4 }
  0x7e   :  { %p3780_p7 = pnand %p3779_p6, %p3773_p3 }
  0x80   :  { %3783 = shalt.err (!%p3780_p7)
}
  0x81   :  { %118 = dma.hbm_to_vmem [thread:$0]  %s4720_s9, 16, %s116_s4, [#allocation16]  }
  0x82   :  { %s3792_s26 = scalar_lea.vmem %s137_s8, 256  ;;  %p3797_p9 = scmp.lt.s32.totalorder %s137_s8, %s137_s8 }
  0x83   :  { %p3793_p8 = scmp.ne.s32.totalorder %s137_s8, %s3792_s26  ;;  %p3798_p10 = scmp.lt.s32.totalorder %s3792_s26, %s3792_s26 }
  0x85   :  { %p3799_p11 = por %p3798_p10, %p3797_p9 }
  0x87   :  { %p3800_p12 = pnand %p3799_p11, %p3793_p8 }
  0x89   :  { %3803 = shalt.err (!%p3800_p12)
}
  0x8a   :  { %142 = dma.hbm_to_vmem [thread:$0]  %s4723_s12, 256, %s137_s8, [#allocation19], %s3925_s25, %s3925_s25, %s3926_s5  }
  0x8b   :  { %s3937_s11 = smov [#allocation23]   ;;  %s3938_s7 = smov [#allocation26]  }
  0x8c   :  { %s159_s6 = sshll.u32 %s3937_s11, 4  ;;  %s178_s9 = sshll.u32 %s3938_s7, 4  ;;  %s160_s6 = int_to_ptr.vmem [resolvable:$true] %s159_s6  ;;  %s179_s9 = int_to_ptr.vmem [resolvable:$true] %s178_s9 }
  0x8d   :  { %s3812_s3 = scalar_lea.vmem %s160_s6, 16  ;;  %s3816_s0 = scalar_lea.vmem %s160_s6, 32 }
  0x8e   :  { %p3813_p13 = scmp.ne.s32.totalorder %s160_s6, %s3812_s3  ;;  %p3817_p0 = scmp.lt.s32.totalorder %s160_s6, %s160_s6 }
  0x8f   :  { %p3818_p1 = scmp.lt.s32.totalorder %s3816_s0, %s3812_s3 }
  0x91   :  { %p3819_p2 = por %p3818_p1, %p3817_p0 }
  0x93   :  { %p3820_p3 = pnand %p3819_p2, %p3813_p13 }
  0x95   :  { %3823 = shalt.err (!%p3820_p3)
}
  0x96   :  { %162 = dma.hbm_to_vmem [thread:$0]  %s4725_s14, 16, %s160_s6, [#allocation22]  }
  0x97   :  { %s3832_s4 = scalar_lea.vmem %s179_s9, 256  ;;  %p3837_p5 = scmp.lt.s32.totalorder %s179_s9, %s179_s9 }
  0x98   :  { %p3833_p4 = scmp.ne.s32.totalorder %s179_s9, %s3832_s4  ;;  %p3838_p6 = scmp.lt.s32.totalorder %s3832_s4, %s3832_s4 }
  0x9a   :  { %p3839_p7 = por %p3838_p6, %p3837_p5 }
  0x9c   :  { %p3840_p8 = pnand %p3839_p7, %p3833_p4 }
  0x9e   :  { %3843 = shalt.err (!%p3840_p8)
}
  0x9f   :  { %184 = dma.hbm_to_vmem [thread:$0]  %s4727_s16, 256, %s179_s9, [#allocation25], %s3925_s25, %s3925_s25, %s3926_s5  }
  0xa0   :  { %s3939_s8 = smov [#allocation27]  }
  0xa1   :  { %s191_s1 = sshll.u32 %s3939_s8, 4  ;;  %s192_s1 = int_to_ptr.vmem [resolvable:$true] %s191_s1 }
  0xa2   :  { %s3852_s28 = scalar_lea.vmem %s192_s1, 16  ;;  %s3856_s14 = scalar_lea.vmem %s192_s1, 32 }
  0xa3   :  { %p3853_p9 = scmp.ne.s32.totalorder %s192_s1, %s3852_s28  ;;  %p3857_p10 = scmp.lt.s32.totalorder %s192_s1, %s192_s1 }
  0xa4   :  { %p3858_p11 = scmp.lt.s32.totalorder %s3856_s14, %s3852_s28 }
  0xa6   :  { %p3859_p12 = por %p3858_p11, %p3857_p10 }
  0xa8   :  { %p3860_p13 = pnand %p3859_p12, %p3853_p9 }
  0xaa   :  { %3863 = shalt.err (!%p3860_p13)
}
  0xab   :  { %194 = dma.hbm_to_vmem [thread:$0]  %s4728_s17, 16, %s192_s1, [#allocation28]  }
  0xac   :  { %3904 = dma.done.wait [#allocation7], 16  }
  0xad   :  { %3905 = vsyncadd [#allocation7], 4294967280 }
  0xae   :  { %3906 = dma.done.wait [#allocation10], 272  }
  0xaf   :  { %3907 = vsyncadd [#allocation10], 4294967024 }
  0xb0   :  { %3908 = dma.done.wait [#allocation13], 32  }
  0xb1   :  { %3909 = vsyncadd [#allocation13], 4294967264 }
  0xb2   :  { %3910 = dma.done.wait [#allocation16], 272  }
  0xb3   :  { %3911 = vsyncadd [#allocation16], 4294967024 }
  0xb4   :  { %3912 = dma.done.wait [#allocation19], 272  }
  0xb5   :  { %3913 = vsyncadd [#allocation19], 4294967024 }
  0xb6   :  { %3914 = dma.done.wait [#allocation22], 32  }
  0xb7   :  { %3915 = vsyncadd [#allocation22], 4294967264 }
  0xb8   :  { %3916 = dma.done.wait [#allocation25], 272  }
  0xb9   :  { %3917 = vsyncadd [#allocation25], 4294967024 }
  0xba   :  { %3918 = dma.done.wait [#allocation28], 16  }
  0xbb   :  { %3919 = vsyncadd [#allocation28], 4294967280  ;;  %v3940_v0 = vmov 0.0   ;;  %vm3941_vm0 = vmmov 0   ;;  %s4751_s5 = sld [smem:[#allocation44_spill]]  ;;  %vm274_vm1 = vcmask 261120   ;;  %v831_v54 = vlaneseq }
  0xbc   :  { %3204 = vmatprep.subr.bf16.mxu1 %v3940_v0  ;;  %3208 = vmatprep.mubr.msk.bf16.mxu1 %vm3941_vm0, %v3940_v0  ;;  %s4752_s6 = sld [smem:[#allocation42_spill]]  ;;  %v3011_v6 = vld [vmem:[#allocation6] ss:$0 sm:$0xff]  ;;  %s3942_s3 = smov 80   ;;  %vm320_vm2 = vcmask 60416   ;;  %vm462_vm3 = vcmask 64512  }
  0xbd   :  { %3218 = vmatprep.subr.bf16.mxu0 %v3940_v0  ;;  %3220 = vmatprep.mubr.msk.bf16.mxu0 %vm3941_vm0, %v3940_v0  ;;  %s3943_s0 = smov 96   ;;  %s3944_s13 = smov 120   ;;  %v832_v55 = vshrl.u32 %v831_v54, 7  ;;  %v834_v56 = vand.u32 127, %v831_v54  ;;  %vm945_vm5 = vcmask 1043456   ;;  %vm1326_vm6 = vcmask 126016  }
  0xbe   :  { %s3945_s27 = smov 88   ;;  %s3946_s4 = smov 112   ;;  %vm1334_vm7 = vcmask 191616   ;;  %vm1342_vm8 = vcmask 257216   ;;  %vm2878_vm9 = vcmask 523264  }
  0xbf   :  { %s3947_s12 = smov 72   ;;  %s3948_s24 = smov 104   ;;  %vm4250_vm4 = vcmp.le.s32.totalorder %v834_v56, %v832_v55 }
  0xc0   :  { %s3949_s8 = smov 48   ;;  %s3950_s1 = smov 56  }
  0xc1   :  { %v3490_v1 = vld [vmem:[%s4751_s5 + $0x8] sm:$0xff]   ;;  %v3491_v2 = vld [vmem:[%s4751_s5] sm:$0xff]   ;;  %s3951_s28 = smov 40   ;;  %s3953_s14 = smov 16  }
  0xc2   :  { %3205 = vmatpush3.bf16.msra.mxu1 %v3490_v1  ;;  %v4147_v3 = vld [vmem:[%s4752_s6] sm:$0xff]  ;;  %v4152_v4 = vld [vmem:[%s4752_s6 + $0x8] sm:$0xff]  ;;  %s3954_s2 = smov 24   ;;  %s4755_s29 = sld [smem:[#allocation43_spill]] }
  0xc3   :  { %3206 = vmatprep.subr.bf16.mxu1 %v3940_v0  ;;  %v250_v5 = vpack.c.bf16 %v4152_v4, %v4147_v3 }
  0xc6   :  { %3207 = vmatpush3.bf16.msra.mxu1 %v3491_v2 }
  0xc7   :  { %3212 = vmatprep.subr.bf16.mxu1 %v3940_v0 }
  0xc9   :  { %3209 = vmatmul.mubr.msk.bf16.vlgmr.msra.gmra.mxu1 %vm274_vm1, %v250_v5 }
  0xca   :  { %3214 = vmatprep.mubr.msk.bf16.mxu1 %vm3941_vm0, %v3940_v0 }
 0x189   :  { %v312_v7 = vpop.f32.mrf.mxu1 }
 0x18a   :  { %v313_v8 = vadd.f32 %v3011_v6, %v312_v7 }
 0x18b   :  { %v3210_v9 = vpop.f32.mrf.mxu1 }
 0x18c   :  { %v4161_v10 = vpack.c.bf16 %v313_v8, %v313_v8 }
 0x18d   :  { %v315_v11 = vpop.f32.mrf.mxu1 }
 0x18e   :  { %v316_v12 = vadd.f32 %v3011_v6, %v315_v11  ;;  %377 = vrot.lane.b32.xlu1 %v4161_v10, %s3942_s3  ;;  %368 = vrot.lane.b32.xlu0 %v4161_v10, %s3943_s0 }
 0x18f   :  { %v3211_v13 = vpop.f32.mrf.mxu1 }
 0x190   :  { %v319_v14 = vpack.c.bf16 %v316_v12, %v313_v8  ;;  %v4167_v15 = vpack.c.bf16 %v316_v12, %v316_v12 }
 0x192   :  { %321 = vst.msk [vmem:[#allocation2] sm:$0xf] %vm320_vm2, %v319_v14  ;;  %344 = vst.msk [vmem:[#allocation2 + $0x10] sm:$0xf] %vm320_vm2, %v4167_v15  ;;  %325 = vrot.lane.b32.xlu1 %v4161_v10, %s3944_s13  ;;  %372 = vrot.lane.b32.xlu0 %v4161_v10, %s3945_s27 }
 0x196   :  { %330 = vrot.lane.b32.xlu1 %v4161_v10, %s3946_s4  ;;  %382 = vrot.lane.b32.xlu0 %v4161_v10, %s3947_s12 }
 0x199   :  { %v360_v31 = vld [vmem:[#allocation2] sm:$0xf]  ;;  %v364_v47 = vld [vmem:[#allocation2 + $0x10] sm:$0xf] }
 0x19a   :  { %335 = vrot.lane.b32.xlu1 %v4161_v10, %s3948_s24  ;;  %387 = vrot.lane.b32.xlu0 %v4167_v15, %s3943_s0 }
 0x19e   :  { %397 = vrot.lane.b32.xlu1 %v4167_v15, %s3942_s3  ;;  %392 = vrot.lane.b32.xlu0 %v4167_v15, %s3945_s27 }
 0x1a2   :  { %402 = vrot.lane.b32.xlu1 %v4167_v15, %s3947_s12  ;;  %345 = vrot.lane.b32.xlu0 %v4167_v15, %s3944_s13 }
 0x1a6   :  { %355 = vrot.lane.b32.xlu1 %v4167_v15, %s3948_s24  ;;  %350 = vrot.lane.b32.xlu0 %v4167_v15, %s3946_s4 }
 0x200   :  { %v378_v16 = vpop.permute.xlu1 %377  ;;  %v369_v17 = vpop.permute.xlu0 %368 }
 0x201   :  { %381 = vst.msk [vmem:[#allocation3 + $0x8] sm:$0xf] %vm320_vm2, %v378_v16  ;;  %371 = vst.msk [vmem:[#allocation3] sm:$0xf] %vm320_vm2, %v369_v17 }
 0x204   :  { %v326_v18 = vpop.permute.xlu1 %325  ;;  %v373_v19 = vpop.permute.xlu0 %372 }
 0x205   :  { %329 = vst.msk [vmem:[#allocation2 + $0x4] sm:$0xf] %vm320_vm2, %v326_v18  ;;  %376 = vst.msk [vmem:[#allocation3 + $0x4] sm:$0xf] %vm320_vm2, %v373_v19 }
 0x208   :  { %v331_v20 = vpop.permute.xlu1 %330  ;;  %v383_v21 = vpop.permute.xlu0 %382  ;;  %v407_v22 = vld [vmem:[#allocation3] sm:$0xf]  ;;  %v409_v28 = vld [vmem:[#allocation3 + $0x8] sm:$0xf] }
 0x209   :  { %334 = vst.msk [vmem:[#allocation2 + $0x8] sm:$0xf] %vm320_vm2, %v331_v20  ;;  %386 = vst.msk [vmem:[#allocation3 + $0xc] sm:$0xf] %vm320_vm2, %v383_v21  ;;  %v467_v23 = vsel %vm462_vm3, %v407_v22, 0  ;;  %v559_v32 = vsel %vm462_vm3, %v409_v28, 0 }
 0x20a   :  { %3213 = vmatpush3.bf16.xpose.msra.mxu1 %v467_v23 }
 0x20b   :  { %3224 = vmatprep.subr.bf16.mxu1 %v3940_v0 }
 0x20c   :  { %v336_v24 = vpop.permute.xlu1 %335  ;;  %v388_v25 = vpop.permute.xlu0 %387  ;;  %v408_v26 = vld [vmem:[#allocation3 + $0x4] sm:$0xf] }
 0x20d   :  { %339 = vst.msk [vmem:[#allocation2 + $0xc] sm:$0xf] %vm320_vm2, %v336_v24  ;;  %391 = vst.msk [vmem:[#allocation3 + $0x10] sm:$0xf] %vm320_vm2, %v388_v25  ;;  %v513_v27 = vsel %vm462_vm3, %v408_v26, 0 }
 0x20e   :  { %3219 = vmatpush3.bf16.xpose.msra.mxu0 %v513_v27  ;;  %v361_v36 = vld [vmem:[#allocation2 + $0x4] sm:$0xf] }
 0x20f   :  { %3230 = vmatprep.subr.bf16.mxu0 %v3940_v0 }
 0x210   :  { %v398_v29 = vpop.permute.xlu1 %397  ;;  %v393_v30 = vpop.permute.xlu0 %392  ;;  %v410_v33 = vld [vmem:[#allocation3 + $0xc] sm:$0xf]  ;;  %v362_v41 = vld [vmem:[#allocation2 + $0x8] sm:$0xf] }
 0x211   :  { %401 = vst.msk [vmem:[#allocation3 + $0x18] sm:$0xf] %vm320_vm2, %v398_v29  ;;  %396 = vst.msk [vmem:[#allocation3 + $0x14] sm:$0xf] %vm320_vm2, %v393_v30  ;;  %3215 = vmatmul.mubr.msk.bf16.vlgmr.msra.gmra.mxu1 %vm462_vm3, %v360_v31  ;;  %v605_v37 = vsel %vm462_vm3, %v410_v33, 0 }
 0x212   :  { %3225 = vmatpush3.bf16.xpose.msra.mxu1 %v559_v32  ;;  %3226 = vmatprep.mubr.msk.bf16.mxu1 %vm3941_vm0, %v3940_v0 }
 0x213   :  { %3236 = vmatprep.subr.bf16.mxu1 %v3940_v0 }
 0x214   :  { %v403_v34 = vpop.permute.xlu1 %402  ;;  %v346_v35 = vpop.permute.xlu0 %345  ;;  %v411_v38 = vld [vmem:[#allocation3 + $0x10] sm:$0xf]  ;;  %v363_v44 = vld [vmem:[#allocation2 + $0xc] sm:$0xf] }
 0x215   :  { %406 = vst.msk [vmem:[#allocation3 + $0x1c] sm:$0xf] %vm320_vm2, %v403_v34  ;;  %349 = vst.msk [vmem:[#allocation2 + $0x14] sm:$0xf] %vm320_vm2, %v346_v35  ;;  %3221 = vmatmul.mubr.msk.bf16.vlgmr.msra.gmra.mxu0 %vm462_vm3, %v361_v36  ;;  %v651_v42 = vsel %vm462_vm3, %v411_v38, 0 }
 0x216   :  { %3231 = vmatpush3.bf16.xpose.msra.mxu0 %v605_v37  ;;  %3232 = vmatprep.mubr.msk.bf16.mxu0 %vm3941_vm0, %v3940_v0 }
 0x217   :  { %3242 = vmatprep.subr.bf16.mxu0 %v3940_v0 }
 0x218   :  { %v356_v39 = vpop.permute.xlu1 %355  ;;  %v351_v40 = vpop.permute.xlu0 %350  ;;  %v412_v43 = vld [vmem:[#allocation3 + $0x14] sm:$0xf]  ;;  %v413_v46 = vld [vmem:[#allocation3 + $0x18] sm:$0xf] }
 0x219   :  { %359 = vst.msk [vmem:[#allocation2 + $0x1c] sm:$0xf] %vm320_vm2, %v356_v39  ;;  %354 = vst.msk [vmem:[#allocation2 + $0x18] sm:$0xf] %vm320_vm2, %v351_v40  ;;  %3227 = vmatmul.mubr.msk.bf16.vlgmr.msra.gmra.mxu1 %vm462_vm3, %v362_v41  ;;  %v697_v45 = vsel %vm462_vm3, %v412_v43, 0  ;;  %v743_v48 = vsel %vm462_vm3, %v413_v46, 0 }
 0x21a   :  { %3237 = vmatpush3.bf16.xpose.msra.mxu1 %v651_v42  ;;  %3238 = vmatprep.mubr.msk.bf16.mxu1 %vm3941_vm0, %v3940_v0 }
 0x21b   :  { %3248 = vmatprep.subr.bf16.mxu1 %v3940_v0 }
 0x21c   :  { %v414_v49 = vld [vmem:[#allocation3 + $0x1c] sm:$0xf]  ;;  %v365_v50 = vld [vmem:[#allocation2 + $0x14] sm:$0xf] }
 0x21d   :  { %3233 = vmatmul.mubr.msk.bf16.vlgmr.msra.gmra.mxu0 %vm462_vm3, %v363_v44  ;;  %v789_v51 = vsel %vm462_vm3, %v414_v49, 0 }
 0x21e   :  { %3243 = vmatpush3.bf16.xpose.msra.mxu0 %v697_v45  ;;  %3244 = vmatprep.mubr.msk.bf16.mxu0 %vm3941_vm0, %v3940_v0 }
 0x21f   :  { %3254 = vmatprep.subr.bf16.mxu0 %v3940_v0 }
 0x220   :  { %v366_v52 = vld [vmem:[#allocation2 + $0x18] sm:$0xf]  ;;  %v367_v53 = vld [vmem:[#allocation2 + $0x1c] sm:$0xf] }
 0x221   :  { %3239 = vmatmul.mubr.msk.bf16.vlgmr.msra.gmra.mxu1 %vm462_vm3, %v364_v47 }
 0x222   :  { %3249 = vmatpush3.bf16.xpose.msra.mxu1 %v743_v48  ;;  %3250 = vmatprep.mubr.msk.bf16.mxu1 %vm3941_vm0, %v3940_v0 }
 0x223   :  { %3260 = vmatprep.subr.bf16.mxu1 %v3940_v0 }
 0x225   :  { %3245 = vmatmul.mubr.msk.bf16.vlgmr.msra.gmra.mxu0 %vm462_vm3, %v365_v50 }
 0x226   :  { %3255 = vmatpush3.bf16.xpose.msra.mxu0 %v789_v51  ;;  %3256 = vmatprep.mubr.msk.bf16.mxu0 %vm3941_vm0, %v3940_v0 }
 0x227   :  { %3266 = vmatprep.subr.bf16.mxu0 %v3940_v0 }
 0x229   :  { %3251 = vmatmul.mubr.msk.bf16.vlgmr.msra.gmra.mxu1 %vm462_vm3, %v366_v52 }
 0x22a   :  { %3262 = vmatprep.mubr.msk.bf16.mxu1 %vm3941_vm0, %v3940_v0 }
 0x22d   :  { %3257 = vmatmul.mubr.msk.bf16.vlgmr.msra.gmra.mxu0 %vm462_vm3, %v367_v53 }
 0x22e   :  { %3268 = vmatprep.mubr.msk.bf16.mxu0 %vm3941_vm0, %v3940_v0 }
 0x2d1   :  { %v503_v58 = vpop.f32.mrf.mxu1 }
 0x2d2   :  { %v4256_v59 = vsel %vm4250_vm4, %v503_v58, -1e+09 }
 0x2d3   :  { %v3216_v60 = vpop.f32.mrf.mxu1  ;;  %v846_v61 = vsel %vm462_vm3, %v4256_v59, -inf }
 0x2d4   :  { %847 = vmax.xlane.f32.xlu0 %v846_v61 }
 0x2d5   :  { %v506_v62 = vpop.f32.mrf.mxu1  ;;  %v549_v63 = vpop.f32.mrf.mxu0 }
 0x2d6   :  { %v4262_v1 = vsel %vm4250_vm4, %v549_v63, -1e+09 }
 0x2d7   :  { %v3217_v2 = vpop.f32.mrf.mxu1  ;;  %v3222_v5 = vpop.f32.mrf.mxu0  ;;  %v849_v6 = vsel %vm462_vm3, %v4262_v1, -inf }
 0x2d8   :  { %850 = vmax.xlane.f32.xlu1 %v849_v6 }
 0x2d9   :  { %v552_v7 = vpop.f32.mrf.mxu0  ;;  %v595_v8 = vpop.f32.mrf.mxu1 }
 0x2da   :  { %v840_v9 = vsel %vm4250_vm4, %v595_v8, -1e+09 }
 0x2db   :  { %v3223_v11 = vpop.f32.mrf.mxu0  ;;  %v3228_v12 = vpop.f32.mrf.mxu1  ;;  %v852_v13 = vsel %vm462_vm3, %v840_v9, -inf }
 0x2dc   :  { %853 = vmax.xlane.f32.xlu0 %v852_v13 }
 0x2dd   :  { %v598_v14 = vpop.f32.mrf.mxu1  ;;  %v641_v16 = vpop.f32.mrf.mxu0 }
 0x2de   :  { %v841_v17 = vsel %vm4250_vm4, %v641_v16, -1e+09 }
 0x2df   :  { %v3229_v18 = vpop.f32.mrf.mxu1  ;;  %v3234_v19 = vpop.f32.mrf.mxu0  ;;  %v855_v20 = vsel %vm462_vm3, %v841_v17, -inf }
 0x2e0   :  { %856 = vmax.xlane.f32.xlu0 %v855_v20 }
 0x2e1   :  { %v644_v21 = vpop.f32.mrf.mxu0  ;;  %v687_v22 = vpop.f32.mrf.mxu1 }
 0x2e2   :  { %v842_v23 = vsel %vm4250_vm4, %v687_v22, -1e+09 }
 0x2e3   :  { %v3235_v24 = vpop.f32.mrf.mxu0  ;;  %v3240_v25 = vpop.f32.mrf.mxu1  ;;  %v858_v26 = vsel %vm462_vm3, %v842_v23, -inf }
 0x2e4   :  { %859 = vmax.xlane.f32.xlu1 %v858_v26 }
 0x2e5   :  { %v690_v27 = vpop.f32.mrf.mxu1  ;;  %v733_v28 = vpop.f32.mrf.mxu0 }
 0x2e6   :  { %v843_v29 = vsel %vm4250_vm4, %v733_v28, -1e+09 }
 0x2e7   :  { %v3241_v30 = vpop.f32.mrf.mxu1  ;;  %v3246_v31 = vpop.f32.mrf.mxu0  ;;  %v861_v32 = vsel %vm462_vm3, %v843_v29, -inf }
 0x2e8   :  { %862 = vmax.xlane.f32.xlu0 %v861_v32 }
 0x2e9   :  { %v736_v33 = vpop.f32.mrf.mxu0  ;;  %v779_v34 = vpop.f32.mrf.mxu1 }
 0x2ea   :  { %v844_v35 = vsel %vm4250_vm4, %v779_v34, -1e+09 }
 0x2eb   :  { %v3247_v36 = vpop.f32.mrf.mxu0  ;;  %v3252_v37 = vpop.f32.mrf.mxu1  ;;  %v864_v38 = vsel %vm462_vm3, %v844_v35, -inf }
 0x2ec   :  { %865 = vmax.xlane.f32.xlu1 %v864_v38 }
 0x2ed   :  { %v782_v39 = vpop.f32.mrf.mxu1  ;;  %v825_v40 = vpop.f32.mrf.mxu0 }
 0x2ee   :  { %v845_v41 = vsel %vm4250_vm4, %v825_v40, -1e+09 }
 0x2ef   :  { %v3253_v42 = vpop.f32.mrf.mxu1  ;;  %v3258_v43 = vpop.f32.mrf.mxu0  ;;  %v867_v44 = vsel %vm462_vm3, %v845_v41, -inf }
 0x2f0   :  { %868 = vmax.xlane.f32.xlu0 %v867_v44 }
 0x2f1   :  { %v828_v45 = vpop.f32.mrf.mxu0 }
 0x2f3   :  { %v3259_v46 = vpop.f32.mrf.mxu0 }
 0x2fd   :  { %415 = vrot.lane.b32.xlu1 %v4161_v10, %s3925_s25 }
 0x301   :  { %424 = vrot.lane.b32.xlu1 %v4161_v10, %s3949_s8 }
 0x305   :  { %434 = vrot.lane.b32.xlu1 %v4167_v15, %s3925_s25  ;;  %s3952_s25 = smov 8  }
 0x306   :  { %419 = vrot.lane.b32.xlu0 %v4161_v10, %s3950_s1 }
 0x309   :  { %439 = vrot.lane.b32.xlu1 %v4167_v15, %s3950_s1 }
 0x30a   :  { %429 = vrot.lane.b32.xlu0 %v4161_v10, %s3951_s28 }
 0x35d   :  { %v848_v47 = vpop.xlane.xlu0 %847 }
 0x35e   :  { %v870_v48 = vsub.f32 %v4256_v59, %v848_v47 }
 0x360   :  { %v878_v49 = vmul.f32 1.442695, %v870_v48 }
 0x361   :  { %v851_v50 = vpop.xlane.xlu1 %850 }
 0x362   :  { %3508 = vpow2.f32 %v878_v49  ;;  %v871_v51 = vsub.f32 %v4262_v1, %v851_v50 }
 0x364   :  { %v880_v52 = vmul.f32 1.442695, %v871_v51 }
 0x365   :  { %v854_v53 = vpop.xlane.xlu0 %853 }
 0x366   :  { %3510 = vpow2.f32 %v880_v52  ;;  %v872_v54 = vsub.f32 %v840_v9, %v854_v53 }
 0x368   :  { %v882_v55 = vmul.f32 1.442695, %v872_v54 }
 0x369   :  { %v857_v56 = vpop.xlane.xlu0 %856 }
 0x36a   :  { %3512 = vpow2.f32 %v882_v55  ;;  %v873_v57 = vsub.f32 %v841_v17, %v857_v56 }
 0x36c   :  { %v884_v58 = vmul.f32 1.442695, %v873_v57 }
 0x36d   :  { %v860_v60 = vpop.xlane.xlu1 %859 }
 0x36e   :  { %3514 = vpow2.f32 %v884_v58  ;;  %v874_v10 = vsub.f32 %v842_v23, %v860_v60 }
 0x36f   :  { %v4296_v61 = vpop.eup %3508 }
 0x370   :  { %v886_v59 = vmul.f32 1.442695, %v874_v10  ;;  %v894_v62 = vsel %vm462_vm3, %v4296_v61, 0.0 }
 0x371   :  { %v863_v63 = vpop.xlane.xlu0 %862  ;;  %895 = vadd.xlane.f32.xlu1 %v894_v62 }
 0x372   :  { %3516 = vpow2.f32 %v886_v59  ;;  %v875_v1 = vsub.f32 %v843_v29, %v863_v63 }
 0x373   :  { %v4300_v2 = vpop.eup %3510 }
 0x374   :  { %v888_v5 = vmul.f32 1.442695, %v875_v1  ;;  %v897_v6 = vsel %vm462_vm3, %v4300_v2, 0.0 }
 0x375   :  { %898 = vadd.xlane.f32.xlu0 %v897_v6  ;;  %v866_v7 = vpop.xlane.xlu1 %865 }
 0x376   :  { %3518 = vpow2.f32 %v888_v5  ;;  %v876_v8 = vsub.f32 %v844_v35, %v866_v7 }
 0x377   :  { %v4304_v9 = vpop.eup %3512 }
 0x378   :  { %v890_v11 = vmul.f32 1.442695, %v876_v8  ;;  %v900_v12 = vsel %vm462_vm3, %v4304_v9, 0.0 }
 0x379   :  { %v869_v13 = vpop.xlane.xlu0 %868  ;;  %901 = vadd.xlane.f32.xlu1 %v900_v12  ;;  %v416_v14 = vpop.permute.xlu1 %415 }
 0x37a   :  { %3520 = vpow2.f32 %v890_v11  ;;  %v877_v16 = vsub.f32 %v845_v41, %v869_v13  ;;  %418 = vst.msk [vmem:[#allocation4] sm:$0xf] %vm320_vm2, %v416_v14 }
 0x37b   :  { %v4309_v17 = vpop.eup %3514 }
 0x37c   :  { %v892_v18 = vmul.f32 1.442695, %v877_v16  ;;  %v903_v19 = vsel %vm462_vm3, %v4309_v17, 0.0 }
 0x37d   :  { %904 = vadd.xlane.f32.xlu0 %v903_v19  ;;  %v420_v20 = vpop.permute.xlu0 %419  ;;  %v425_v21 = vpop.permute.xlu1 %424 }
 0x37e   :  { %3522 = vpow2.f32 %v892_v18  ;;  %423 = vst.msk [vmem:[#allocation4 + $0x4] sm:$0xf] %vm320_vm2, %v420_v20  ;;  %428 = vst.msk [vmem:[#allocation4 + $0x8] sm:$0xf] %vm320_vm2, %v425_v21 }
 0x37f   :  { %v4315_v22 = vpop.eup %3516 }
 0x380   :  { %v906_v23 = vsel %vm462_vm3, %v4315_v22, 0.0 }
 0x381   :  { %v430_v24 = vpop.permute.xlu0 %429  ;;  %907 = vadd.xlane.f32.xlu1 %v906_v23  ;;  %v435_v25 = vpop.permute.xlu1 %434  ;;  %v454_v26 = vld [vmem:[#allocation4] sm:$0xf] }
 0x382   :  { %433 = vst.msk [vmem:[#allocation4 + $0xc] sm:$0xf] %vm320_vm2, %v430_v24  ;;  %438 = vst.msk [vmem:[#allocation4 + $0x10] sm:$0xf] %vm320_vm2, %v435_v25  ;;  %v947_v27 = vsel %vm945_vm5, %v454_v26, 0 }
 0x383   :  { %v4322_v28 = vpop.eup %3518  ;;  %3261 = vmatpush3.bf16.msra.mxu1 %v947_v27 }
 0x384   :  { %v909_v29 = vsel %vm462_vm3, %v4322_v28, 0.0  ;;  %3272 = vmatprep.subr.bf16.mxu1 %v3940_v0 }
 0x385   :  { %910 = vadd.xlane.f32.xlu0 %v909_v29  ;;  %v440_v30 = vpop.permute.xlu1 %439  ;;  %v455_v31 = vld [vmem:[#allocation4 + $0x4] sm:$0xf]  ;;  %v456_v44 = vld [vmem:[#allocation4 + $0x8] sm:$0xf] }
 0x386   :  { %443 = vst.msk [vmem:[#allocation4 + $0x14] sm:$0xf] %vm320_vm2, %v440_v30  ;;  %v993_v32 = vsel %vm945_vm5, %v455_v31, 0 }
 0x387   :  { %v4329_v33 = vpop.eup %3520  ;;  %3267 = vmatpush3.bf16.msra.mxu0 %v993_v32 }
 0x388   :  { %v912_v34 = vsel %vm462_vm3, %v4329_v33, 0.0  ;;  %3278 = vmatprep.subr.bf16.mxu0 %v3940_v0 }
 0x389   :  { %913 = vadd.xlane.f32.xlu1 %v912_v34  ;;  %v457_v49 = vld [vmem:[#allocation4 + $0xc] sm:$0xf]  ;;  %v458_v55 = vld [vmem:[#allocation4 + $0x10] sm:$0xf] }
 0x38a   :  { %v1085_v52 = vsel %vm945_vm5, %v457_v49, 0  ;;  %v1131_v58 = vsel %vm945_vm5, %v458_v55, 0 }
 0x38b   :  { %v4334_v35 = vpop.eup %3522 }
 0x38c   :  { %v915_v36 = vsel %vm462_vm3, %v4334_v35, 0.0 }
 0x38d   :  { %916 = vadd.xlane.f32.xlu0 %v915_v36  ;;  %v459_v59 = vld [vmem:[#allocation4 + $0x14] sm:$0xf] }
 0x38e   :  { %v1177_v1 = vsel %vm945_vm5, %v459_v59, 0 }
 0x39a   :  { %449 = vrot.lane.b32.xlu1 %v4167_v15, %s3951_s28 }
 0x3a3   :  { %444 = vrot.lane.b32.xlu0 %v4167_v15, %s3949_s8  ;;  %v1039_v15 = vsel %vm945_vm5, %v456_v44, 0 }
 0x3fa   :  { %v896_v37 = vpop.xlane.xlu1 %895 }
 0x3fb   :  { %3524 = vrcp.f32 %v896_v37 }
 0x3fe   :  { %v899_v38 = vpop.xlane.xlu0 %898 }
 0x3ff   :  { %3526 = vrcp.f32 %v899_v38 }
 0x402   :  { %v902_v39 = vpop.xlane.xlu1 %901 }
 0x403   :  { %3528 = vrcp.f32 %v902_v39 }
 0x406   :  { %v905_v40 = vpop.xlane.xlu0 %904 }
 0x407   :  { %3530 = vrcp.f32 %v905_v40 }
 0x408   :  { %v3525_v41 = vpop.eup %3524 }
 0x409   :  { %v926_v42 = vmul.f32 %v3525_v41, %v4296_v61 }
 0x40a   :  { %v908_v43 = vpop.xlane.xlu1 %907 }
 0x40b   :  { %3532 = vrcp.f32 %v908_v43  ;;  %v934_v45 = vpack.c.bf16 %v926_v42, %v926_v42 }
 0x40c   :  { %v3527_v46 = vpop.eup %3526 }
 0x40d   :  { %3263 = vmatmul.mubr.msk.bf16.vlgmr.msra.gmra.mxu1 %vm462_vm3, %v934_v45  ;;  %v927_v47 = vmul.f32 %v3527_v46, %v4300_v2 }
 0x40e   :  { %3273 = vmatpush3.bf16.msra.mxu1 %v1039_v15  ;;  %v911_v48 = vpop.xlane.xlu0 %910  ;;  %3274 = vmatprep.mubr.msk.bf16.mxu1 %vm3941_vm0, %v3940_v0  ;;  %v3492_v15 = vld [vmem:[#allocation9 + $0x8] sm:$0xff]  }
 0x40f   :  { %3534 = vrcp.f32 %v911_v48  ;;  %v935_v50 = vpack.c.bf16 %v927_v47, %v927_v47  ;;  %3284 = vmatprep.subr.bf16.mxu1 %v3940_v0 }
 0x410   :  { %v3529_v51 = vpop.eup %3528 }
 0x411   :  { %3269 = vmatmul.mubr.msk.bf16.vlgmr.msra.gmra.mxu0 %vm462_vm3, %v935_v50  ;;  %v928_v53 = vmul.f32 %v3529_v51, %v4304_v9  ;;  %v3493_v50 = vld [vmem:[#allocation9] sm:$0xff]  }
 0x412   :  { %3279 = vmatpush3.bf16.msra.mxu0 %v1085_v52  ;;  %v914_v54 = vpop.xlane.xlu1 %913  ;;  %3280 = vmatprep.mubr.msk.bf16.mxu0 %vm3941_vm0, %v3940_v0 }
 0x413   :  { %3536 = vrcp.f32 %v914_v54  ;;  %v936_v56 = vpack.c.bf16 %v928_v53, %v928_v53  ;;  %3290 = vmatprep.subr.bf16.mxu0 %v3940_v0 }
 0x414   :  { %v3531_v57 = vpop.eup %3530 }
 0x415   :  { %3275 = vmatmul.mubr.msk.bf16.vlgmr.msra.gmra.mxu1 %vm462_vm3, %v936_v56  ;;  %v929_v60 = vmul.f32 %v3531_v57, %v4309_v17 }
 0x416   :  { %3285 = vmatpush3.bf16.msra.mxu1 %v1131_v58  ;;  %v917_v10 = vpop.xlane.xlu0 %916  ;;  %v450_v61 = vpop.permute.xlu1 %449  ;;  %3286 = vmatprep.mubr.msk.bf16.mxu1 %vm3941_vm0, %v3940_v0 }
 0x417   :  { %3538 = vrcp.f32 %v917_v10  ;;  %453 = vst.msk [vmem:[#allocation4 + $0x1c] sm:$0xf] %vm320_vm2, %v450_v61  ;;  %v937_v62 = vpack.c.bf16 %v929_v60, %v929_v60  ;;  %3296 = vmatprep.subr.bf16.mxu1 %v3940_v0 }
 0x418   :  { %v3533_v63 = vpop.eup %3532 }
 0x419   :  { %3281 = vmatmul.mubr.msk.bf16.vlgmr.msra.gmra.mxu0 %vm462_vm3, %v937_v62  ;;  %v930_v2 = vmul.f32 %v3533_v63, %v4315_v22 }
 0x41a   :  { %3291 = vmatpush3.bf16.msra.mxu0 %v1177_v1  ;;  %v445_v5 = vpop.permute.xlu0 %444  ;;  %3292 = vmatprep.mubr.msk.bf16.mxu0 %vm3941_vm0, %v3940_v0 }
 0x41b   :  { %448 = vst.msk [vmem:[#allocation4 + $0x18] sm:$0xf] %vm320_vm2, %v445_v5  ;;  %v938_v6 = vpack.c.bf16 %v930_v2, %v930_v2  ;;  %3302 = vmatprep.subr.bf16.mxu0 %v3940_v0 }
 0x41c   :  { %v3535_v7 = vpop.eup %3534 }
 0x41d   :  { %3287 = vmatmul.mubr.msk.bf16.vlgmr.msra.gmra.mxu1 %vm462_vm3, %v938_v6  ;;  %v931_v8 = vmul.f32 %v3535_v7, %v4322_v28 }
 0x41e   :  { %v461_v9 = vld [vmem:[#allocation4 + $0x1c] sm:$0xf]  ;;  %3298 = vmatprep.mubr.msk.bf16.mxu1 %vm3941_vm0, %v3940_v0 }
 0x41f   :  { %v939_v11 = vpack.c.bf16 %v931_v8, %v931_v8  ;;  %v1269_v12 = vsel %vm945_vm5, %v461_v9, 0  ;;  %v3039_v8 = vld [vmem:[#allocation11] ss:$0 sm:$0xff] }
 0x420   :  { %v3537_v13 = vpop.eup %3536 }
 0x421   :  { %3293 = vmatmul.mubr.msk.bf16.vlgmr.msra.gmra.mxu0 %vm462_vm3, %v939_v11  ;;  %v932_v14 = vmul.f32 %v3537_v13, %v4329_v33 }
 0x422   :  { %3303 = vmatpush3.bf16.msra.mxu0 %v1269_v12  ;;  %v460_v16 = vld [vmem:[#allocation4 + $0x18] sm:$0xf]  ;;  %3304 = vmatprep.mubr.msk.bf16.mxu0 %vm3941_vm0, %v3940_v0 }
 0x423   :  { %v1223_v17 = vsel %vm945_vm5, %v460_v16, 0  ;;  %3316 = vmatprep.subr.bf16.mxu0 %v3940_v0  ;;  %v940_v19 = vpack.c.bf16 %v932_v14, %v932_v14 }
 0x424   :  { %v3539_v18 = vpop.eup %3538  ;;  %3297 = vmatpush3.bf16.msra.mxu1 %v1223_v17 }
 0x425   :  { %v933_v20 = vmul.f32 %v3539_v18, %v4334_v35  ;;  %3308 = vmatprep.subr.bf16.mxu1 %v3940_v0 }
 0x427   :  { %3299 = vmatmul.mubr.msk.bf16.vlgmr.msra.gmra.mxu1 %vm462_vm3, %v940_v19  ;;  %v941_v21 = vpack.c.bf16 %v933_v20, %v933_v20 }
 0x428   :  { %3312 = vmatprep.mubr.msk.bf16.mxu1 %vm3941_vm0, %v3940_v0  ;;  %3309 = vmatpush3.bf16.msra.mxu1 %v3492_v15 }
 0x429   :  { %3305 = vmatmul.mubr.msk.bf16.vlgmr.msra.gmra.mxu0 %vm462_vm3, %v941_v21  ;;  %3310 = vmatprep.subr.bf16.mxu1 %v3940_v0 }
 0x42a   :  { %3320 = vmatprep.mubr.msk.bf16.mxu0 %vm3941_vm0, %v3940_v0 }
 0x42c   :  { %3311 = vmatpush3.bf16.msra.mxu1 %v3493_v50 }
 0x42d   :  { %3324 = vmatprep.subr.bf16.mxu1 %v3940_v0 }
 0x4cd   :  { %v983_v22 = vpop.f32.mrf.mxu1 }
 0x4ce   :  { %v1311_v23 = vpack.c.bf16 %v983_v22, %v983_v22 }
 0x4cf   :  { %v3264_v24 = vpop.f32.mrf.mxu1 }
 0x4d0   :  { %1319 = vst.msk [vmem:[#allocation5] sm:$0xf] %vm320_vm2, %v1311_v23 }
 0x4d1   :  { %v986_v25 = vpop.f32.mrf.mxu1  ;;  %v1029_v26 = vpop.f32.mrf.mxu0 }
 0x4d2   :  { %v3101_v27 = vpack.c.bf16 %v1029_v26, %v1029_v26 }
 0x4d3   :  { %v3265_v28 = vpop.f32.mrf.mxu1  ;;  %v3270_v29 = vpop.f32.mrf.mxu0 }
 0x4d4   :  { %1323 = vrot.lane.b32.xlu0 %v3101_v27, %s3952_s25 }
 0x4d5   :  { %v1032_v30 = vpop.f32.mrf.mxu0  ;;  %v1075_v31 = vpop.f32.mrf.mxu1 }
 0x4d6   :  { %v3102_v32 = vpack.c.bf16 %v1075_v31, %v1075_v31  ;;  %v3496_v30 = vld [vmem:[%s4721_s10] sm:$0xff]  }
 0x4d7   :  { %v3271_v33 = vpop.f32.mrf.mxu0  ;;  %v3276_v34 = vpop.f32.mrf.mxu1  ;;  %v248_v31 = vld [vmem:[%s4755_s29] sm:$0xff] }
 0x4d8   :  { %1331 = vrot.lane.b32.xlu0 %v3102_v32, %s3953_s14  ;;  %v249_v32 = vld [vmem:[%s4755_s29 + $0x8] sm:$0xff] }
 0x4d9   :  { %v1078_v35 = vpop.f32.mrf.mxu1  ;;  %v1121_v36 = vpop.f32.mrf.mxu0  ;;  %v1555_v33 = vpack.c.bf16 %v249_v32, %v248_v31  ;;  %v3497_v34 = vld [vmem:[#allocation15 + $0x8] sm:$0xff]  }
 0x4da   :  { %v3103_v37 = vpack.c.bf16 %v1121_v36, %v1121_v36  ;;  %3317 = vmatpush3.bf16.msra.mxu0 %v3497_v34  ;;  %v3498_v35 = vld [vmem:[#allocation15] sm:$0xff]  }
 0x4db   :  { %v3277_v38 = vpop.f32.mrf.mxu1  ;;  %v3282_v39 = vpop.f32.mrf.mxu0  ;;  %3318 = vmatprep.subr.bf16.mxu0 %v3940_v0 }
 0x4dc   :  { %1339 = vrot.lane.b32.xlu0 %v3103_v37, %s3954_s2 }
 0x4dd   :  { %v1124_v40 = vpop.f32.mrf.mxu0  ;;  %v1167_v41 = vpop.f32.mrf.mxu1 }
 0x4de   :  { %v1315_v42 = vpack.c.bf16 %v1167_v41, %v1167_v41  ;;  %3319 = vmatpush3.bf16.msra.mxu0 %v3498_v35 }
 0x4df   :  { %v3283_v43 = vpop.f32.mrf.mxu0  ;;  %v3288_v44 = vpop.f32.mrf.mxu1  ;;  %3332 = vmatprep.subr.bf16.mxu0 %v3940_v0 }
 0x4e0   :  { %1344 = vst.msk [vmem:[#allocation5 + $0x4] sm:$0xf] %vm320_vm2, %v1315_v42  ;;  %v3044_v44 = vld [vmem:[#allocation12] ss:$0 sm:$0xff] }
 0x4e1   :  { %v1170_v45 = vpop.f32.mrf.mxu1  ;;  %v1213_v46 = vpop.f32.mrf.mxu0 }
 0x4e2   :  { %v3104_v47 = vpack.c.bf16 %v1213_v46, %v1213_v46 }
 0x4e3   :  { %v3289_v48 = vpop.f32.mrf.mxu1  ;;  %v3294_v49 = vpop.f32.mrf.mxu0 }
 0x4e4   :  { %1348 = vrot.lane.b32.xlu1 %v3104_v47, %s3952_s25  ;;  %v3045_v47 = vld [vmem:[#allocation14] ss:$0 sm:$0xff] }
 0x4e5   :  { %v1216_v51 = vpop.f32.mrf.mxu0 }
 0x4e7   :  { %v3295_v52 = vpop.f32.mrf.mxu0  ;;  %v1259_v53 = vpop.f32.mrf.mxu1 }
 0x4e8   :  { %v3105_v54 = vpack.c.bf16 %v1259_v53, %v1259_v53  ;;  %v3050_v52 = vld [vmem:[#allocation18] ss:$0 sm:$0xff] }
 0x4e9   :  { %v3300_v55 = vpop.f32.mrf.mxu1  ;;  %v1305_v56 = vpop.f32.mrf.mxu0 }
 0x4ea   :  { %1355 = vrot.lane.b32.xlu1 %v3105_v54, %s3953_s14  ;;  %v3106_v60 = vpack.c.bf16 %v1305_v56, %v1305_v56 }
 0x4eb   :  { %v1262_v57 = vpop.f32.mrf.mxu1  ;;  %v3306_v58 = vpop.f32.mrf.mxu0 }
 0x4ed   :  { %v3301_v10 = vpop.f32.mrf.mxu1  ;;  %v1308_v61 = vpop.f32.mrf.mxu0 }
 0x4ee   :  { %1362 = vrot.lane.b32.xlu1 %v3106_v60, %s3954_s2 }
 0x4ef   :  { %v3307_v59 = vpop.f32.mrf.mxu0 }
 0x546   :  { %v1324_v62 = vpop.permute.xlu0 %1323 }
 0x547   :  { %1327 = vst.msk [vmem:[#allocation5] sm:$0xf] %vm1326_vm6, %v1324_v62 }
 0x54a   :  { %v1332_v63 = vpop.permute.xlu0 %1331 }
 0x54b   :  { %1335 = vst.msk [vmem:[#allocation5] sm:$0xf] %vm1334_vm7, %v1332_v63 }
 0x54e   :  { %v1340_v1 = vpop.permute.xlu0 %1339 }
 0x54f   :  { %1343 = vst.msk [vmem:[#allocation5] sm:$0xf] %vm1342_vm8, %v1340_v1 }
 0x556   :  { %v1349_v2 = vpop.permute.xlu1 %1348 }
 0x557   :  { %1351 = vst.msk [vmem:[#allocation5 + $0x4] sm:$0xf] %vm1326_vm6, %v1349_v2 }
 0x55c   :  { %v1356_v5 = vpop.permute.xlu1 %1355 }
 0x55d   :  { %1358 = vst.msk [vmem:[#allocation5 + $0x4] sm:$0xf] %vm1334_vm7, %v1356_v5 }
 0x560   :  { %v1363_v6 = vpop.permute.xlu1 %1362 }
 0x561   :  { %1365 = vst.msk [vmem:[#allocation5 + $0x4] sm:$0xf] %vm1342_vm8, %v1363_v6  ;;  %v3046_v6 = vld [vmem:[#allocation17] ss:$0 sm:$0xff] }
 0x568   :  { %v3494_v7 = vld [vmem:[#allocation5] sm:$0xff]  }
 0x569   :  { %3313 = vmatmul.mubr.msk.bf16.vlgmr.msra.gmra.mxu1 %vm274_vm1, %v3494_v7 }
 0x56a   :  { %3328 = vmatprep.mubr.msk.bf16.mxu1 %vm3941_vm0, %v3940_v0 }
 0x629   :  { %v1433_v9 = vpop.f32.mrf.mxu1 }
 0x62a   :  { %v1434_v11 = vadd.f32 %v3039_v8, %v1433_v9 }
 0x62b   :  { %v3314_v12 = vpop.f32.mrf.mxu1 }
 0x62c   :  { %v1440_v13 = vadd.f32 %v1434_v11, %v4147_v3 }
 0x62d   :  { %v1436_v14 = vpop.f32.mrf.mxu1 }
 0x62e   :  { %v1437_v16 = vadd.f32 %v3039_v8, %v1436_v14  ;;  %v1444_v17 = vsel %vm274_vm1, %v1440_v13, 0.0 }
 0x62f   :  { %1445 = vadd.xlane.f32.xlu0 %v1444_v17  ;;  %v3315_v18 = vpop.f32.mrf.mxu1 }
 0x630   :  { %v1441_v19 = vadd.f32 %v1437_v16, %v4152_v4  ;;  %v3495_v4 = vld [vmem:[%s4721_s10 + $0x8] sm:$0xff]  }
 0x631   :  { %3325 = vmatpush3.bf16.msra.mxu1 %v3495_v4 }
 0x632   :  { %v1447_v20 = vsel %vm274_vm1, %v1441_v19, 0.0  ;;  %3326 = vmatprep.subr.bf16.mxu1 %v3940_v0 }
 0x633   :  { %1448 = vadd.xlane.f32.xlu1 %v1447_v20 }
 0x635   :  { %3327 = vmatpush3.bf16.msra.mxu1 %v3496_v30 }
 0x636   :  { %3338 = vmatprep.subr.bf16.mxu1 %v3940_v0 }
 0x638   :  { %3329 = vmatmul.mubr.msk.bf16.vlgmr.msra.gmra.mxu1 %vm274_vm1, %v1555_v33 }
 0x639   :  { %3340 = vmatprep.mubr.msk.bf16.mxu1 %vm3941_vm0, %v3940_v0 }
 0x6b8   :  { %v1446_v21 = vpop.xlane.xlu0 %1445 }
 0x6b9   :  { %v1451_v22 = vmul.f32 0.03125, %v1446_v21 }
 0x6bb   :  { %v1453_v23 = vsub.f32 %v1440_v13, %v1451_v22 }
 0x6bc   :  { %v1449_v24 = vpop.xlane.xlu1 %1448 }
 0x6bd   :  { %v1452_v25 = vmul.f32 0.03125, %v1449_v24  ;;  %v1455_v26 = vmul.f32 %v1453_v23, %v1453_v23 }
 0x6bf   :  { %v1454_v27 = vsub.f32 %v1441_v19, %v1452_v25  ;;  %v1457_v3 = vsel %vm274_vm1, %v1455_v26, 0.0 }
 0x6c0   :  { %1458 = vadd.xlane.f32.xlu0 %v1457_v3 }
 0x6c1   :  { %v1456_v28 = vmul.f32 %v1454_v27, %v1454_v27 }
 0x6c3   :  { %v1460_v29 = vsel %vm274_vm1, %v1456_v28, 0.0 }
 0x6c4   :  { %1461 = vadd.xlane.f32.xlu0 %v1460_v29 }
 0x6f8   :  { %v1616_v53 = vpop.f32.mrf.mxu1 }
 0x6f9   :  { %v1617_v54 = vadd.f32 %v3050_v52, %v1616_v53 }
 0x6fa   :  { %v3330_v55 = vpop.f32.mrf.mxu1 }
 0x6fb   :  { %v4441_v56 = vpack.c.bf16 %v1617_v54, %v1617_v54 }
 0x6fc   :  { %v1619_v57 = vpop.f32.mrf.mxu1 }
 0x6fd   :  { %v1620_v58 = vadd.f32 %v3050_v52, %v1619_v57  ;;  %1673 = vrot.lane.b32.xlu0 %v4441_v56, %s3946_s4  ;;  %1669 = vrot.lane.b32.xlu1 %v4441_v56, %s3944_s13 }
 0x6fe   :  { %v3331_v60 = vpop.f32.mrf.mxu1 }
 0x6ff   :  { %v1664_v10 = vpack.c.bf16 %v1620_v58, %v1617_v54  ;;  %v4447_v61 = vpack.c.bf16 %v1620_v58, %v1620_v58 }
 0x701   :  { %1665 = vst.msk [vmem:[#allocation3] sm:$0xf] %vm320_vm2, %v1664_v10  ;;  %1684 = vst.msk [vmem:[#allocation3 + $0x10] sm:$0xf] %vm320_vm2, %v4447_v61 }
 0x708   :  { %v1697_v59 = vld [vmem:[#allocation3] sm:$0xf]  ;;  %v1701_v25 = vld [vmem:[#allocation3 + $0x10] sm:$0xf] }
 0x709   :  { %v1749_v62 = vsel %vm462_vm3, %v1697_v59, 0  ;;  %v1933_v29 = vsel %vm462_vm3, %v1701_v25, 0 }
 0x749   :  { %v1459_v36 = vpop.xlane.xlu0 %1458 }
 0x74a   :  { %v1463_v37 = vmul.f32 0.03125, %v1459_v36 }
 0x74c   :  { %v1465_v38 = vadd.f32 1e-05, %v1463_v37 }
 0x74d   :  { %v1462_v39 = vpop.xlane.xlu0 %1461 }
 0x74e   :  { %3540 = vrsqrt.f32 %v1465_v38  ;;  %v1464_v40 = vmul.f32 0.03125, %v1462_v39 }
 0x750   :  { %v1466_v41 = vadd.f32 1e-05, %v1464_v40 }
 0x752   :  { %3542 = vrsqrt.f32 %v1466_v41 }
 0x75b   :  { %v3541_v42 = vpop.eup %3540 }
 0x75c   :  { %v1469_v43 = vmul.f32 %v3541_v42, %v1453_v23 }
 0x75e   :  { %v1477_v15 = vmul.f32 %v3044_v44, %v1469_v43 }
 0x75f   :  { %v3543_v45 = vpop.eup %3542 }
 0x760   :  { %v1470_v46 = vmul.f32 %v3543_v45, %v1454_v27  ;;  %v4432_v49 = vadd.f32 %v3045_v47, %v1477_v15 }
 0x762   :  { %v1478_v48 = vmul.f32 %v3044_v44, %v1470_v46 }
 0x764   :  { %v4434_v50 = vadd.f32 %v3045_v47, %v1478_v48 }
 0x766   :  { %v1487_v51 = vpack.c.bf16 %v4434_v50, %v4432_v49 }
 0x768   :  { %3321 = vmatmul.mubr.msk.bf16.vlgmr.msra.gmra.mxu0 %vm274_vm1, %v1487_v51 }
 0x769   :  { %3334 = vmatprep.mubr.msk.bf16.mxu0 %vm3941_vm0, %v3940_v0  ;;  %3333 = vmatpush3.bf16.xpose.msra.mxu0 %v1749_v62 }
 0x76a   :  { %3344 = vmatprep.subr.bf16.mxu0 %v3940_v0 }
 0x76f   :  { %v1674_v63 = vpop.permute.xlu0 %1673  ;;  %v1670_v1 = vpop.permute.xlu1 %1669 }
 0x770   :  { %1676 = vst.msk [vmem:[#allocation3 + $0x8] sm:$0xf] %vm320_vm2, %v1674_v63  ;;  %1672 = vst.msk [vmem:[#allocation3 + $0x4] sm:$0xf] %vm320_vm2, %v1670_v1 }
 0x777   :  { %v1698_v2 = vld [vmem:[#allocation3 + $0x4] sm:$0xf]  ;;  %v1699_v18 = vld [vmem:[#allocation3 + $0x8] sm:$0xf] }
 0x778   :  { %v1795_v5 = vsel %vm462_vm3, %v1698_v2, 0  ;;  %v1841_v20 = vsel %vm462_vm3, %v1699_v18, 0 }
 0x779   :  { %3339 = vmatpush3.bf16.xpose.msra.mxu1 %v1795_v5 }
 0x77a   :  { %3350 = vmatprep.subr.bf16.mxu1 %v3940_v0 }
 0x828   :  { %v1548_v7 = vpop.f32.mrf.mxu0 }
 0x829   :  { %v1549_v8 = vadd.f32 %v3046_v6, %v1548_v7 }
 0x82a   :  { %v3322_v9 = vpop.f32.mrf.mxu0 }
 0x82b   :  { %v3107_v11 = vpack.c.bf16 %v1549_v8, %v1549_v8 }
 0x82c   :  { %v1551_v12 = vpop.f32.mrf.mxu0 }
 0x82d   :  { %v1552_v13 = vadd.f32 %v3046_v6, %v1551_v12  ;;  %1632 = vrot.lane.b32.xlu0 %v3107_v11, %s3946_s4  ;;  %1628 = vrot.lane.b32.xlu1 %v3107_v11, %s3944_s13 }
 0x82e   :  { %v3323_v14 = vpop.f32.mrf.mxu0 }
 0x82f   :  { %v1623_v16 = vpack.c.bf16 %v1552_v13, %v1549_v8  ;;  %v3108_v17 = vpack.c.bf16 %v1552_v13, %v1552_v13 }
 0x831   :  { %1624 = vst.msk [vmem:[#allocation2] sm:$0xf] %vm320_vm2, %v1623_v16  ;;  %1643 = vst.msk [vmem:[#allocation2 + $0x10] sm:$0xf] %vm320_vm2, %v3108_v17  ;;  %1677 = vrot.lane.b32.xlu1 %v4441_v56, %s3948_s24  ;;  %1685 = vrot.lane.b32.xlu0 %v4447_v61, %s3944_s13 }
 0x835   :  { %1636 = vrot.lane.b32.xlu1 %v3107_v11, %s3948_s24  ;;  %1644 = vrot.lane.b32.xlu0 %v3108_v17, %s3944_s13 }
 0x838   :  { %v1656_v19 = vld [vmem:[#allocation2] sm:$0xf]  ;;  %v1660_v34 = vld [vmem:[#allocation2 + $0x10] sm:$0xf] }
 0x839   :  { %1689 = vrot.lane.b32.xlu1 %v4447_v61, %s3946_s4  ;;  %1648 = vrot.lane.b32.xlu0 %v3108_v17, %s3946_s4 }
 0x83a   :  { %3335 = vmatmul.mubr.msk.bf16.vlgmr.msra.gmra.mxu0 %vm462_vm3, %v1656_v19 }
 0x83b   :  { %3345 = vmatpush3.bf16.xpose.msra.mxu0 %v1841_v20  ;;  %3346 = vmatprep.mubr.msk.bf16.mxu0 %vm3941_vm0, %v3940_v0 }
 0x83c   :  { %3356 = vmatprep.subr.bf16.mxu0 %v3940_v0 }
 0x83d   :  { %1693 = vrot.lane.b32.xlu1 %v4447_v61, %s3948_s24 }
 0x841   :  { %1652 = vrot.lane.b32.xlu1 %v3108_v17, %s3948_s24 }
 0x89f   :  { %v1633_v21 = vpop.permute.xlu0 %1632  ;;  %v1629_v22 = vpop.permute.xlu1 %1628 }
 0x8a0   :  { %1635 = vst.msk [vmem:[#allocation2 + $0x8] sm:$0xf] %vm320_vm2, %v1633_v21  ;;  %1631 = vst.msk [vmem:[#allocation2 + $0x4] sm:$0xf] %vm320_vm2, %v1629_v22 }
 0x8a3   :  { %v1678_v23 = vpop.permute.xlu1 %1677  ;;  %v1686_v24 = vpop.permute.xlu0 %1685 }
 0x8a4   :  { %1680 = vst.msk [vmem:[#allocation3 + $0xc] sm:$0xf] %vm320_vm2, %v1678_v23  ;;  %1688 = vst.msk [vmem:[#allocation3 + $0x14] sm:$0xf] %vm320_vm2, %v1686_v24 }
 0x8a7   :  { %v1637_v26 = vpop.permute.xlu1 %1636  ;;  %v1645_v27 = vpop.permute.xlu0 %1644  ;;  %v1657_v3 = vld [vmem:[#allocation2 + $0x4] sm:$0xf]  ;;  %v1658_v28 = vld [vmem:[#allocation2 + $0x8] sm:$0xf] }
 0x8a8   :  { %1639 = vst.msk [vmem:[#allocation2 + $0xc] sm:$0xf] %vm320_vm2, %v1637_v26  ;;  %1647 = vst.msk [vmem:[#allocation2 + $0x14] sm:$0xf] %vm320_vm2, %v1645_v27  ;;  %3341 = vmatmul.mubr.msk.bf16.vlgmr.msra.gmra.mxu1 %vm462_vm3, %v1657_v3  ;;  %3347 = vmatmul.mubr.msk.bf16.vlgmr.msra.gmra.mxu0 %vm462_vm3, %v1658_v28 }
 0x8a9   :  { %3357 = vmatpush3.bf16.xpose.msra.mxu0 %v1933_v29  ;;  %3358 = vmatprep.mubr.msk.bf16.mxu0 %vm3941_vm0, %v3940_v0 }
 0x8aa   :  { %3352 = vmatprep.mubr.msk.bf16.mxu1 %vm3941_vm0, %v3940_v0  ;;  %3368 = vmatprep.subr.bf16.mxu0 %v3940_v0 }
 0x8ab   :  { %v1690_v4 = vpop.permute.xlu1 %1689  ;;  %v1649_v30 = vpop.permute.xlu0 %1648  ;;  %v1700_v31 = vld [vmem:[#allocation3 + $0xc] sm:$0xf]  ;;  %v1702_v35 = vld [vmem:[#allocation3 + $0x14] sm:$0xf] }
 0x8ac   :  { %1692 = vst.msk [vmem:[#allocation3 + $0x18] sm:$0xf] %vm320_vm2, %v1690_v4  ;;  %1651 = vst.msk [vmem:[#allocation2 + $0x18] sm:$0xf] %vm320_vm2, %v1649_v30  ;;  %v1887_v32 = vsel %vm462_vm3, %v1700_v31, 0  ;;  %v1979_v39 = vsel %vm462_vm3, %v1702_v35, 0 }
 0x8ad   :  { %3351 = vmatpush3.bf16.xpose.msra.mxu1 %v1887_v32 }
 0x8ae   :  { %3362 = vmatprep.subr.bf16.mxu1 %v3940_v0 }
 0x8af   :  { %v1694_v33 = vpop.permute.xlu1 %1693  ;;  %v1659_v37 = vld [vmem:[#allocation2 + $0xc] sm:$0xf]  ;;  %v1661_v42 = vld [vmem:[#allocation2 + $0x14] sm:$0xf] }
 0x8b0   :  { %1696 = vst.msk [vmem:[#allocation3 + $0x1c] sm:$0xf] %vm320_vm2, %v1694_v33  ;;  %3359 = vmatmul.mubr.msk.bf16.vlgmr.msra.gmra.mxu0 %vm462_vm3, %v1660_v34 }
 0x8b1   :  { %3370 = vmatprep.mubr.msk.bf16.mxu0 %vm3941_vm0, %v3940_v0 }
 0x8b3   :  { %v1653_v36 = vpop.permute.xlu1 %1652  ;;  %v1703_v38 = vld [vmem:[#allocation3 + $0x18] sm:$0xf] }
 0x8b4   :  { %1655 = vst.msk [vmem:[#allocation2 + $0x1c] sm:$0xf] %vm320_vm2, %v1653_v36  ;;  %3353 = vmatmul.mubr.msk.bf16.vlgmr.msra.gmra.mxu1 %vm462_vm3, %v1659_v37  ;;  %v2025_v40 = vsel %vm462_vm3, %v1703_v38, 0  ;;  %v1662_v43 = vld [vmem:[#allocation2 + $0x18] sm:$0xf] }
 0x8b5   :  { %3363 = vmatpush3.bf16.xpose.msra.mxu1 %v1979_v39  ;;  %3369 = vmatpush3.bf16.xpose.msra.mxu0 %v2025_v40 }
 0x8b6   :  { %3364 = vmatprep.mubr.msk.bf16.mxu1 %vm3941_vm0, %v3940_v0  ;;  %3374 = vmatprep.subr.bf16.mxu1 %v3940_v0 }
 0x8b7   :  { %3380 = vmatprep.subr.bf16.mxu0 %v3940_v0  ;;  %v1704_v41 = vld [vmem:[#allocation3 + $0x1c] sm:$0xf] }
 0x8b8   :  { %v2071_v44 = vsel %vm462_vm3, %v1704_v41, 0 }
 0x8bb   :  { %v1663_v45 = vld [vmem:[#allocation2 + $0x1c] sm:$0xf] }
 0x8bc   :  { %3365 = vmatmul.mubr.msk.bf16.vlgmr.msra.gmra.mxu1 %vm462_vm3, %v1661_v42  ;;  %3371 = vmatmul.mubr.msk.bf16.vlgmr.msra.gmra.mxu0 %vm462_vm3, %v1662_v43 }
 0x8bd   :  { %3375 = vmatpush3.bf16.xpose.msra.mxu1 %v2071_v44  ;;  %3376 = vmatprep.mubr.msk.bf16.mxu1 %vm3941_vm0, %v3940_v0 }
 0x8be   :  { %3386 = vmatprep.subr.bf16.mxu1 %v3940_v0  ;;  %3382 = vmatprep.mubr.msk.bf16.mxu0 %vm3941_vm0, %v3940_v0 }
 0x8c4   :  { %3377 = vmatmul.mubr.msk.bf16.vlgmr.msra.gmra.mxu1 %vm462_vm3, %v1663_v45 }
 0x8c5   :  { %3388 = vmatprep.mubr.msk.bf16.mxu1 %vm3941_vm0, %v3940_v0 }
 0x8fa   :  { %v1785_v46 = vpop.f32.mrf.mxu0 }
 0x8fb   :  { %v2113_v15 = vsel %vm462_vm3, %v1785_v46, -inf }
 0x8fc   :  { %2114 = vmax.xlane.f32.xlu0 %v2113_v15  ;;  %v3336_v47 = vpop.f32.mrf.mxu0 }
 0x8fe   :  { %v1788_v48 = vpop.f32.mrf.mxu0 }
 0x900   :  { %v3337_v51 = vpop.f32.mrf.mxu0 }
 0x968   :  { %v1831_v52 = vpop.f32.mrf.mxu1  ;;  %v1877_v53 = vpop.f32.mrf.mxu0 }
 0x969   :  { %v2119_v54 = vsel %vm462_vm3, %v1877_v53, -inf  ;;  %v2116_v55 = vsel %vm462_vm3, %v1831_v52, -inf }
 0x96a   :  { %2120 = vmax.xlane.f32.xlu0 %v2119_v54  ;;  %v3348_v57 = vpop.f32.mrf.mxu0  ;;  %2117 = vmax.xlane.f32.xlu1 %v2116_v55  ;;  %v3342_v58 = vpop.f32.mrf.mxu1 }
 0x96c   :  { %v1834_v60 = vpop.f32.mrf.mxu1  ;;  %v1880_v10 = vpop.f32.mrf.mxu0 }
 0x96e   :  { %v3343_v59 = vpop.f32.mrf.mxu1  ;;  %v3349_v62 = vpop.f32.mrf.mxu0 }
 0x970   :  { %v1969_v63 = vpop.f32.mrf.mxu0 }
 0x971   :  { %v2125_v1 = vsel %vm462_vm3, %v1969_v63, -inf }
 0x972   :  { %v3360_v2 = vpop.f32.mrf.mxu0  ;;  %2126 = vmax.xlane.f32.xlu1 %v2125_v1 }
 0x974   :  { %v1923_v5 = vpop.f32.mrf.mxu1  ;;  %v1972_v6 = vpop.f32.mrf.mxu0 }
 0x975   :  { %v2122_v7 = vsel %vm462_vm3, %v1923_v5, -inf }
 0x976   :  { %v3361_v8 = vpop.f32.mrf.mxu0  ;;  %2123 = vmax.xlane.f32.xlu0 %v2122_v7  ;;  %v3354_v9 = vpop.f32.mrf.mxu1 }
 0x978   :  { %v1926_v11 = vpop.f32.mrf.mxu1 }
 0x97a   :  { %v3355_v12 = vpop.f32.mrf.mxu1 }
 0x97c   :  { %v2015_v13 = vpop.f32.mrf.mxu1  ;;  %v2061_v14 = vpop.f32.mrf.mxu0 }
 0x97d   :  { %v2131_v16 = vsel %vm462_vm3, %v2061_v14, -inf  ;;  %v2128_v17 = vsel %vm462_vm3, %v2015_v13, -inf }
 0x97e   :  { %v3372_v18 = vpop.f32.mrf.mxu0  ;;  %2132 = vmax.xlane.f32.xlu1 %v2131_v16  ;;  %2129 = vmax.xlane.f32.xlu0 %v2128_v17  ;;  %v3366_v19 = vpop.f32.mrf.mxu1 }
 0x980   :  { %v2018_v20 = vpop.f32.mrf.mxu1  ;;  %v2064_v21 = vpop.f32.mrf.mxu0 }
 0x982   :  { %v3367_v22 = vpop.f32.mrf.mxu1  ;;  %v3373_v23 = vpop.f32.mrf.mxu0 }
 0x984   :  { %v2107_v24 = vpop.f32.mrf.mxu1 }
 0x985   :  { %v2134_v25 = vsel %vm462_vm3, %v2107_v24, -inf  ;;  %v2115_v28 = vpop.xlane.xlu0 %2114 }
 0x986   :  { %2135 = vmax.xlane.f32.xlu0 %v2134_v25  ;;  %v3378_v26 = vpop.f32.mrf.mxu1  ;;  %v2137_v29 = vsub.f32 %v1785_v46, %v2115_v28 }
 0x988   :  { %v2110_v27 = vpop.f32.mrf.mxu1  ;;  %v2145_v4 = vmul.f32 1.442695, %v2137_v29 }
 0x98a   :  { %v3379_v3 = vpop.f32.mrf.mxu1  ;;  %3544 = vpow2.f32 %v2145_v4 }
 0x98f   :  { %1705 = vrot.lane.b32.xlu1 %v4441_v56, %s3943_s0 }
 0x993   :  { %1713 = vrot.lane.b32.xlu1 %v4441_v56, %s3942_s3 }
 0x997   :  { %1721 = vrot.lane.b32.xlu1 %v4447_v61, %s3943_s0  ;;  %v4540_v30 = vpop.eup %3544 }
 0x998   :  { %v2161_v31 = vsel %vm462_vm3, %v4540_v30, 0.0 }
 0x99b   :  { %1725 = vrot.lane.b32.xlu1 %v4447_v61, %s3945_s27 }
 0x99c   :  { %1709 = vrot.lane.b32.xlu0 %v4441_v56, %s3945_s27 }
 0x9a0   :  { %1717 = vrot.lane.b32.xlu0 %v4441_v56, %s3947_s12 }
 0x9bf   :  { %2162 = vadd.xlane.f32.xlu1 %v2161_v31 }
 0x9f3   :  { %v2121_v32 = vpop.xlane.xlu0 %2120  ;;  %v2118_v33 = vpop.xlane.xlu1 %2117 }
 0x9f4   :  { %v2139_v34 = vsub.f32 %v1877_v53, %v2121_v32  ;;  %v2138_v35 = vsub.f32 %v1831_v52, %v2118_v33 }
 0x9f6   :  { %v2149_v36 = vmul.f32 1.442695, %v2139_v34  ;;  %v2147_v37 = vmul.f32 1.442695, %v2138_v35 }
 0x9f8   :  { %3546 = vpow2.f32 %v2149_v36 }
 0x9f9   :  { %3548 = vpow2.f32 %v2147_v37 }
 0x9fb   :  { %v2127_v38 = vpop.xlane.xlu1 %2126 }
 0x9fc   :  { %v2141_v56 = vsub.f32 %v1969_v63, %v2127_v38 }
 0x9fe   :  { %v2153_v39 = vmul.f32 1.442695, %v2141_v56 }
 0x9ff   :  { %v2124_v40 = vpop.xlane.xlu0 %2123 }
 0xa00   :  { %3550 = vpow2.f32 %v2153_v39  ;;  %v2140_v41 = vsub.f32 %v1923_v5, %v2124_v40 }
 0xa02   :  { %v2151_v42 = vmul.f32 1.442695, %v2140_v41 }
 0xa04   :  { %3552 = vpow2.f32 %v2151_v42 }
 0xa05   :  { %v4544_v43 = vpop.eup %3546 }
 0xa06   :  { %v4546_v44 = vpop.eup %3548  ;;  %v2167_v45 = vsel %vm462_vm3, %v4544_v43, 0.0 }
 0xa07   :  { %2168 = vadd.xlane.f32.xlu1 %v2167_v45  ;;  %v2133_v46 = vpop.xlane.xlu1 %2132  ;;  %v2130_v15 = vpop.xlane.xlu0 %2129  ;;  %v2164_v47 = vsel %vm462_vm3, %v4546_v44, 0.0 }
 0xa08   :  { %v2143_v48 = vsub.f32 %v2061_v14, %v2133_v46  ;;  %v2142_v51 = vsub.f32 %v2015_v13, %v2130_v15  ;;  %2165 = vadd.xlane.f32.xlu0 %v2164_v47 }
 0xa0a   :  { %v2157_v52 = vmul.f32 1.442695, %v2143_v48  ;;  %v2155_v53 = vmul.f32 1.442695, %v2142_v51 }
 0xa0b   :  { %v1706_v54 = vpop.permute.xlu1 %1705 }
 0xa0c   :  { %3554 = vpow2.f32 %v2157_v52  ;;  %1708 = vst.msk [vmem:[#allocation4] sm:$0xf] %vm320_vm2, %v1706_v54 }
 0xa0d   :  { %v4553_v55 = vpop.eup %3550  ;;  %3556 = vpow2.f32 %v2155_v53 }
 0xa0e   :  { %v2173_v57 = vsel %vm462_vm3, %v4553_v55, 0.0 }
 0xa0f   :  { %2174 = vadd.xlane.f32.xlu1 %v2173_v57  ;;  %v1714_v58 = vpop.permute.xlu1 %1713  ;;  %v2136_v60 = vpop.xlane.xlu0 %2135 }
 0xa10   :  { %1716 = vst.msk [vmem:[#allocation4 + $0x8] sm:$0xf] %vm320_vm2, %v1714_v58  ;;  %v2144_v10 = vsub.f32 %v2107_v24, %v2136_v60 }
 0xa11   :  { %v4558_v59 = vpop.eup %3552 }
 0xa12   :  { %v2159_v62 = vmul.f32 1.442695, %v2144_v10  ;;  %v2170_v63 = vsel %vm462_vm3, %v4558_v59, 0.0 }
 0xa13   :  { %v1722_v1 = vpop.permute.xlu1 %1721  ;;  %2171 = vadd.xlane.f32.xlu0 %v2170_v63  ;;  %v1710_v2 = vpop.permute.xlu0 %1709  ;;  %v1737_v5 = vld [vmem:[#allocation4] sm:$0xf] }
 0xa14   :  { %3558 = vpow2.f32 %v2159_v62  ;;  %1724 = vst.msk [vmem:[#allocation4 + $0x10] sm:$0xf] %vm320_vm2, %v1722_v1  ;;  %1712 = vst.msk [vmem:[#allocation4 + $0x4] sm:$0xf] %vm320_vm2, %v1710_v2  ;;  %v2213_v6 = vsel %vm945_vm5, %v1737_v5, 0 }
 0xa15   :  { %3381 = vmatpush3.bf16.msra.mxu0 %v2213_v6 }
 0xa16   :  { %3392 = vmatprep.subr.bf16.mxu0 %v3940_v0 }
 0xa17   :  { %v1726_v7 = vpop.permute.xlu1 %1725  ;;  %v1718_v8 = vpop.permute.xlu0 %1717  ;;  %v1739_v22 = vld [vmem:[#allocation4 + $0x8] sm:$0xf] }
 0xa18   :  { %1728 = vst.msk [vmem:[#allocation4 + $0x14] sm:$0xf] %vm320_vm2, %v1726_v7  ;;  %1720 = vst.msk [vmem:[#allocation4 + $0xc] sm:$0xf] %vm320_vm2, %v1718_v8  ;;  %v2305_v24 = vsel %vm945_vm5, %v1739_v22, 0 }
 0xa19   :  { %v4568_v9 = vpop.eup %3554 }
 0xa1a   :  { %v4570_v11 = vpop.eup %3556  ;;  %v2179_v12 = vsel %vm462_vm3, %v4568_v9, 0.0 }
 0xa1b   :  { %2180 = vadd.xlane.f32.xlu1 %v2179_v12  ;;  %v2176_v13 = vsel %vm462_vm3, %v4570_v11, 0.0  ;;  %v1738_v14 = vld [vmem:[#allocation4 + $0x4] sm:$0xf] }
 0xa1c   :  { %2177 = vadd.xlane.f32.xlu0 %v2176_v13  ;;  %v2259_v16 = vsel %vm945_vm5, %v1738_v14, 0 }
 0xa1d   :  { %3387 = vmatpush3.bf16.msra.mxu1 %v2259_v16 }
 0xa1e   :  { %3398 = vmatprep.subr.bf16.mxu1 %v3940_v0 }
 0xa1f   :  { %v1740_v32 = vld [vmem:[#allocation4 + $0xc] sm:$0xf]  ;;  %v1742_v47 = vld [vmem:[#allocation4 + $0x14] sm:$0xf] }
 0xa20   :  { %v2351_v35 = vsel %vm945_vm5, %v1740_v32, 0  ;;  %v2443_v54 = vsel %vm945_vm5, %v1742_v47, 0 }
 0xa21   :  { %v4578_v17 = vpop.eup %3558 }
 0xa22   :  { %v2182_v18 = vsel %vm462_vm3, %v4578_v17, 0.0 }
 0xa23   :  { %2183 = vadd.xlane.f32.xlu0 %v2182_v18 }
 0xa2c   :  { %1733 = vrot.lane.b32.xlu1 %v4447_v61, %s3947_s12 }
 0xa39   :  { %1729 = vrot.lane.b32.xlu0 %v4447_v61, %s3942_s3 }
 0xa48   :  { %v2163_v19 = vpop.xlane.xlu1 %2162 }
 0xa49   :  { %3560 = vrcp.f32 %v2163_v19 }
 0xa56   :  { %v3561_v20 = vpop.eup %3560 }
 0xa57   :  { %v2193_v21 = vmul.f32 %v3561_v20, %v4540_v30  ;;  %v1741_v30 = vld [vmem:[#allocation4 + $0x10] sm:$0xf] }
 0xa58   :  { %v2397_v34 = vsel %vm945_vm5, %v1741_v30, 0 }
 0xa59   :  { %v2201_v23 = vpack.c.bf16 %v2193_v21, %v2193_v21  ;;  %v2749_v39 = vsel %vm462_vm3, %v2193_v21, 0.0 }
 0xa5b   :  { %3383 = vmatmul.mubr.msk.bf16.vlgmr.msra.gmra.mxu0 %vm462_vm3, %v2201_v23 }
 0xa5c   :  { %3393 = vmatpush3.bf16.msra.mxu0 %v2305_v24  ;;  %3394 = vmatprep.mubr.msk.bf16.mxu0 %vm3941_vm0, %v3940_v0 }
 0xa5d   :  { %3404 = vmatprep.subr.bf16.mxu0 %v3940_v0 }
 0xa90   :  { %v2169_v25 = vpop.xlane.xlu1 %2168 }
 0xa91   :  { %3562 = vrcp.f32 %v2169_v25  ;;  %v2166_v61 = vpop.xlane.xlu0 %2165 }
 0xa92   :  { %3564 = vrcp.f32 %v2166_v61 }
 0xa98   :  { %v2175_v26 = vpop.xlane.xlu1 %2174 }
 0xa99   :  { %3566 = vrcp.f32 %v2175_v26 }
 0xa9c   :  { %v2172_v27 = vpop.xlane.xlu0 %2171 }
 0xa9d   :  { %3568 = vrcp.f32 %v2172_v27 }
 0xa9e   :  { %v3563_v3 = vpop.eup %3562 }
 0xa9f   :  { %v3565_v28 = vpop.eup %3564  ;;  %v2195_v29 = vmul.f32 %v3563_v3, %v4544_v43 }
 0xaa0   :  { %v2194_v4 = vmul.f32 %v3565_v28, %v4546_v44 }
 0xaa1   :  { %v2203_v31 = vpack.c.bf16 %v2195_v29, %v2195_v29  ;;  %v2752_v45 = vsel %vm462_vm3, %v2195_v29, 0.0 }
 0xaa2   :  { %v2202_v33 = vpack.c.bf16 %v2194_v4, %v2194_v4  ;;  %v2750_v37 = vsel %vm462_vm3, %v2194_v4, 0.0 }
 0xaa3   :  { %3395 = vmatmul.mubr.msk.bf16.vlgmr.msra.gmra.mxu0 %vm462_vm3, %v2203_v31  ;;  %v2751_v41 = vadd.f32 %v2750_v37, %v2749_v39 }
 0xaa4   :  { %3389 = vmatmul.mubr.msk.bf16.vlgmr.msra.gmra.mxu1 %vm462_vm3, %v2202_v33  ;;  %3405 = vmatpush3.bf16.msra.mxu0 %v2397_v34  ;;  %v2181_v36 = vpop.xlane.xlu1 %2180 }
 0xaa5   :  { %3399 = vmatpush3.bf16.msra.mxu1 %v2351_v35  ;;  %v2178_v38 = vpop.xlane.xlu0 %2177  ;;  %3406 = vmatprep.mubr.msk.bf16.mxu0 %vm3941_vm0, %v3940_v0  ;;  %v2753_v48 = vadd.f32 %v2752_v45, %v2751_v41  ;;  %v3499_v41 = vld [vmem:[#allocation20 + $0x8] sm:$0xff]  }
 0xaa6   :  { %v3567_v56 = vpop.eup %3566  ;;  %3570 = vrcp.f32 %v2178_v38  ;;  %3400 = vmatprep.mubr.msk.bf16.mxu1 %vm3941_vm0, %v3940_v0  ;;  %3410 = vmatprep.subr.bf16.mxu1 %v3940_v0 }
 0xaa7   :  { %3572 = vrcp.f32 %v2181_v36  ;;  %v2197_v40 = vmul.f32 %v3567_v56, %v4553_v55  ;;  %3416 = vmatprep.subr.bf16.mxu0 %v3940_v0 }
 0xaa8   :  { %v1734_v42 = vpop.permute.xlu1 %1733 }
 0xaa9   :  { %1736 = vst.msk [vmem:[#allocation4 + $0x1c] sm:$0xf] %vm320_vm2, %v1734_v42  ;;  %v2205_v43 = vpack.c.bf16 %v2197_v40, %v2197_v40  ;;  %v2756_v1 = vsel %vm462_vm3, %v2197_v40, 0.0 }
 0xaaa   :  { %v3569_v44 = vpop.eup %3568 }
 0xaab   :  { %3407 = vmatmul.mubr.msk.bf16.vlgmr.msra.gmra.mxu0 %vm462_vm3, %v2205_v43  ;;  %v2196_v46 = vmul.f32 %v3569_v44, %v4558_v59  ;;  %v3500_v44 = vld [vmem:[#allocation20] sm:$0xff]  }
 0xaac   :  { %v2184_v15 = vpop.xlane.xlu0 %2183  ;;  %3418 = vmatprep.mubr.msk.bf16.mxu0 %vm3941_vm0, %v3940_v0 }
 0xaad   :  { %3574 = vrcp.f32 %v2184_v15  ;;  %v2204_v51 = vpack.c.bf16 %v2196_v46, %v2196_v46  ;;  %v2754_v52 = vsel %vm462_vm3, %v2196_v46, 0.0 }
 0xaae   :  { %v2755_v53 = vadd.f32 %v2754_v52, %v2753_v48 }
 0xaaf   :  { %3401 = vmatmul.mubr.msk.bf16.vlgmr.msra.gmra.mxu1 %vm462_vm3, %v2204_v51 }
 0xab0   :  { %3411 = vmatpush3.bf16.msra.mxu1 %v2443_v54  ;;  %v1730_v55 = vpop.permute.xlu0 %1729  ;;  %3412 = vmatprep.mubr.msk.bf16.mxu1 %vm3941_vm0, %v3940_v0  ;;  %v2764_v57 = vmul.f32 0.25, %v2755_v53  ;;  %v1744_v59 = vld [vmem:[#allocation4 + $0x1c] sm:$0xf] }
 0xab1   :  { %1732 = vst.msk [vmem:[#allocation4 + $0x18] sm:$0xf] %vm320_vm2, %v1730_v55  ;;  %3422 = vmatprep.subr.bf16.mxu1 %v3940_v0  ;;  %v2535_v6 = vsel %vm945_vm5, %v1744_v59, 0 }
 0xab2   :  { %2766 = vst.msk [vmem:[#allocation30] sm:$0xff] %vm462_vm3, %v2764_v57 }
 0xab3   :  { %v3571_v58 = vpop.eup %3570 }
 0xab4   :  { %v3573_v60 = vpop.eup %3572  ;;  %v2198_v10 = vmul.f32 %v3571_v58, %v4570_v11 }
 0xab5   :  { %v2199_v2 = vmul.f32 %v3573_v60, %v4568_v9 }
 0xab6   :  { %v2206_v62 = vpack.c.bf16 %v2198_v10, %v2198_v10  ;;  %v2757_v63 = vsel %vm462_vm3, %v2198_v10, 0.0 }
 0xab7   :  { %v2758_v5 = vadd.f32 %v2757_v63, %v2756_v1  ;;  %v2207_v12 = vpack.c.bf16 %v2199_v2, %v2199_v2  ;;  %v2759_v13 = vsel %vm462_vm3, %v2199_v2, 0.0 }
 0xab8   :  { %3413 = vmatmul.mubr.msk.bf16.vlgmr.msra.gmra.mxu1 %vm462_vm3, %v2206_v62  ;;  %v1743_v7 = vld [vmem:[#allocation4 + $0x18] sm:$0xf] }
 0xab9   :  { %3423 = vmatpush3.bf16.msra.mxu1 %v2535_v6  ;;  %v2489_v8 = vsel %vm945_vm5, %v1743_v7, 0  ;;  %3424 = vmatprep.mubr.msk.bf16.mxu1 %vm3941_vm0, %v3940_v0  ;;  %v2760_v14 = vadd.f32 %v2759_v13, %v2758_v5  ;;  %v3080_v6 = vld [vmem:[#allocation21] ss:$0 sm:$0xff] }
 0xaba   :  { %v3575_v11 = vpop.eup %3574  ;;  %3417 = vmatpush3.bf16.msra.mxu0 %v2489_v8  ;;  %3436 = vmatprep.subr.bf16.mxu1 %v3940_v0 }
 0xabb   :  { %v2200_v9 = vmul.f32 %v3575_v11, %v4578_v17  ;;  %3428 = vmatprep.subr.bf16.mxu0 %v3940_v0 }
 0xabd   :  { %3419 = vmatmul.mubr.msk.bf16.vlgmr.msra.gmra.mxu0 %vm462_vm3, %v2207_v12  ;;  %v2208_v16 = vpack.c.bf16 %v2200_v9, %v2200_v9  ;;  %v2761_v18 = vsel %vm462_vm3, %v2200_v9, 0.0 }
 0xabe   :  { %3432 = vmatprep.mubr.msk.bf16.mxu0 %vm3941_vm0, %v3940_v0  ;;  %v2762_v19 = vadd.f32 %v2761_v18, %v2760_v14  ;;  %3429 = vmatpush3.bf16.msra.mxu0 %v3499_v41 }
 0xabf   :  { %3430 = vmatprep.subr.bf16.mxu0 %v3940_v0 }
 0xac0   :  { %3425 = vmatmul.mubr.msk.bf16.vlgmr.msra.gmra.mxu1 %vm462_vm3, %v2208_v16  ;;  %v2765_v20 = vmul.f32 0.25, %v2762_v19 }
 0xac1   :  { %3440 = vmatprep.mubr.msk.bf16.mxu1 %vm3941_vm0, %v3940_v0 }
 0xac2   :  { %2767 = vst.msk [vmem:[#allocation30 + $0x8] sm:$0xff] %vm462_vm3, %v2765_v20  ;;  %3431 = vmatpush3.bf16.msra.mxu0 %v3500_v44  ;;  %v3506_v44 = vld [vmem:[%s4729_s18 + $0x8] sm:$0xff]  }
 0xac3   :  { %3444 = vmatprep.subr.bf16.mxu0 %v3940_v0 }
 0xb1b   :  { %v2249_v17 = vpop.f32.mrf.mxu0 }
 0xb1c   :  { %v2577_v21 = vpack.c.bf16 %v2249_v17, %v2249_v17 }
 0xb1d   :  { %v3384_v22 = vpop.f32.mrf.mxu0 }
 0xb1e   :  { %2585 = vst.msk [vmem:[#allocation5] sm:$0xf] %vm320_vm2, %v2577_v21 }
 0xb1f   :  { %v2252_v23 = vpop.f32.mrf.mxu0 }
 0xb21   :  { %v3385_v24 = vpop.f32.mrf.mxu0 }
 0xb63   :  { %v2341_v25 = vpop.f32.mrf.mxu0 }
 0xb64   :  { %v2295_v61 = vpop.f32.mrf.mxu1  ;;  %v3112_v4 = vpack.c.bf16 %v2341_v25, %v2341_v25 }
 0xb65   :  { %v3111_v26 = vpack.c.bf16 %v2295_v61, %v2295_v61  ;;  %v3396_v27 = vpop.f32.mrf.mxu0 }
 0xb66   :  { %v3390_v3 = vpop.f32.mrf.mxu1  ;;  %v3502_v27 = vld [vmem:[#allocation26 + $0x8] sm:$0xff]  }
 0xb67   :  { %2589 = vrot.lane.b32.xlu0 %v3111_v26, %s3952_s25  ;;  %v2344_v28 = vpop.f32.mrf.mxu0  ;;  %3437 = vmatpush3.bf16.msra.mxu1 %v3502_v27  ;;  %v3504_v3 = vld [vmem:[%s4729_s18 + $0x18] sm:$0xff]  }
 0xb68   :  { %v2298_v29 = vpop.f32.mrf.mxu1  ;;  %3438 = vmatprep.subr.bf16.mxu1 %v3940_v0 }
 0xb69   :  { %v3397_v30 = vpop.f32.mrf.mxu0 }
 0xb6a   :  { %v3391_v31 = vpop.f32.mrf.mxu1 }
 0xb6b   :  { %2596 = vrot.lane.b32.xlu0 %v3112_v4, %s3953_s14  ;;  %v2433_v32 = vpop.f32.mrf.mxu0 }
 0xb6c   :  { %v2581_v33 = vpack.c.bf16 %v2433_v32, %v2433_v32 }
 0xb6d   :  { %v3408_v34 = vpop.f32.mrf.mxu0 }
 0xb6e   :  { %2607 = vst.msk [vmem:[#allocation5 + $0x4] sm:$0xf] %vm320_vm2, %v2581_v33 }
 0xb6f   :  { %v2387_v35 = vpop.f32.mrf.mxu1  ;;  %v2436_v36 = vpop.f32.mrf.mxu0 }
 0xb70   :  { %v3113_v37 = vpack.c.bf16 %v2387_v35, %v2387_v35  ;;  %v3085_v35 = vld [vmem:[#allocation23] ss:$0 sm:$0xff] }
 0xb71   :  { %v3402_v38 = vpop.f32.mrf.mxu1  ;;  %v3409_v56 = vpop.f32.mrf.mxu0 }
 0xb72   :  { %2603 = vrot.lane.b32.xlu0 %v3113_v37, %s3954_s2  ;;  %v3086_v56 = vld [vmem:[#allocation24] ss:$0 sm:$0xff] }
 0xb73   :  { %v2390_v39 = vpop.f32.mrf.mxu1 }
 0xb75   :  { %v3403_v40 = vpop.f32.mrf.mxu1 }
 0xb78   :  { %v2479_v42 = vpop.f32.mrf.mxu1 }
 0xb79   :  { %v3114_v43 = vpack.c.bf16 %v2479_v42, %v2479_v42 }
 0xb7a   :  { %v3414_v45 = vpop.f32.mrf.mxu1 }
 0xb7b   :  { %2611 = vrot.lane.b32.xlu1 %v3114_v43, %s3952_s25  ;;  %v3505_v43 = vld [vmem:[%s4729_s18 + $0x10] sm:$0xff]   ;;  %v3507_v45 = vld [vmem:[%s4729_s18] sm:$0xff]   ;;  %s3955_s18 = smov [#allocation30]  }
 0xb7c   :  { %v2482_v46 = vpop.f32.mrf.mxu1 }
 0xb7d   :  { %v2525_v15 = vpop.f32.mrf.mxu0  ;;  %v3087_v46 = vld [vmem:[#allocation27] ss:$0 sm:$0xff] }
 0xb7e   :  { %v3415_v47 = vpop.f32.mrf.mxu1  ;;  %v3115_v48 = vpack.c.bf16 %v2525_v15, %v2525_v15 }
 0xb7f   :  { %v3420_v51 = vpop.f32.mrf.mxu0 }
 0xb80   :  { %v2571_v52 = vpop.f32.mrf.mxu1  ;;  %2618 = vrot.lane.b32.xlu1 %v3115_v48, %s3953_s14 }
 0xb81   :  { %v2528_v53 = vpop.f32.mrf.mxu0  ;;  %v3116_v54 = vpack.c.bf16 %v2571_v52, %v2571_v52 }
 0xb82   :  { %v3426_v55 = vpop.f32.mrf.mxu1 }
 0xb83   :  { %v3421_v57 = vpop.f32.mrf.mxu0 }
 0xb84   :  { %v2574_v58 = vpop.f32.mrf.mxu1  ;;  %2625 = vrot.lane.b32.xlu1 %v3116_v54, %s3954_s2 }
 0xb86   :  { %v3427_v60 = vpop.f32.mrf.mxu1 }
 0xbd9   :  { %v2590_v10 = vpop.permute.xlu0 %2589 }
 0xbda   :  { %2592 = vst.msk [vmem:[#allocation5] sm:$0xf] %vm1326_vm6, %v2590_v10 }
 0xbdd   :  { %v2597_v59 = vpop.permute.xlu0 %2596 }
 0xbde   :  { %2599 = vst.msk [vmem:[#allocation5] sm:$0xf] %vm1334_vm7, %v2597_v59 }
 0xbe4   :  { %v2604_v62 = vpop.permute.xlu0 %2603 }
 0xbe5   :  { %2606 = vst.msk [vmem:[#allocation5] sm:$0xf] %vm1342_vm8, %v2604_v62 }
 0xbed   :  { %v2612_v63 = vpop.permute.xlu1 %2611 }
 0xbee   :  { %2614 = vst.msk [vmem:[#allocation5 + $0x4] sm:$0xf] %vm1326_vm6, %v2612_v63 }
 0xbf2   :  { %v2619_v1 = vpop.permute.xlu1 %2618 }
 0xbf3   :  { %2621 = vst.msk [vmem:[#allocation5 + $0x4] sm:$0xf] %vm1334_vm7, %v2619_v1 }
 0xbf6   :  { %v2626_v2 = vpop.permute.xlu1 %2625 }
 0xbf7   :  { %2628 = vst.msk [vmem:[#allocation5 + $0x4] sm:$0xf] %vm1342_vm8, %v2626_v2 }
 0xbfe   :  { %v3501_v5 = vld [vmem:[#allocation5] sm:$0xff]  }
 0xbff   :  { %3433 = vmatmul.mubr.msk.bf16.vlgmr.msra.gmra.mxu0 %vm274_vm1, %v3501_v5 }
 0xc00   :  { %3452 = vmatprep.mubr.msk.bf16.mxu0 %vm3941_vm0, %v3940_v0  ;;  %3445 = vmatpush3.bf16.msra.mxu0 %v3504_v3 }
 0xc01   :  { %3446 = vmatprep.subr.bf16.mxu0 %v3940_v0 }
 0xc04   :  { %3447 = vmatpush3.bf16.msra.mxu0 %v3505_v43 }
 0xc05   :  { %3448 = vmatprep.subr.bf16.mxu0 %v3940_v0 }
 0xc08   :  { %3449 = vmatpush3.bf16.msra.mxu0 %v3506_v44 }
 0xc09   :  { %3450 = vmatprep.subr.bf16.mxu0 %v3940_v0  ;;  %v3091_v0 = vld [vmem:[%s4730_s19] ss:$0 sm:$0xff]  ;;  %s2988_s19 = sshll.u32 %s3955_s18, 4  ;;  %s2989_s19 = int_to_ptr.vmem [resolvable:$true] %s2988_s19 }
 0xc0a   :  { %s3864_s8 = scalar_lea.vmem %s2989_s19, 256  ;;  %p3869_p1 = scmp.lt.s32.totalorder %s2989_s19, %s2989_s19 }
 0xc0b   :  { %p3865_p0 = scmp.ne.s32.totalorder %s2989_s19, %s3864_s8  ;;  %p3870_p2 = scmp.lt.s32.totalorder %s3864_s8, %s3864_s8 }
 0xc0c   :  { %3451 = vmatpush3.bf16.msra.mxu0 %v3507_v45 }
 0xc0d   :  { %p3871_p3 = por %p3870_p2, %p3869_p1 }
 0xc0f   :  { %p3872_p4 = pnand %p3871_p3, %p3865_p0 }
 0xcbf   :  { %v2696_v7 = vpop.f32.mrf.mxu0 }
 0xcc0   :  { %v2697_v8 = vadd.f32 %v3080_v6, %v2696_v7 }
 0xcc1   :  { %v3434_v11 = vpop.f32.mrf.mxu0 }
 0xcc2   :  { %v2703_v12 = vadd.f32 %v2697_v8, %v4432_v49 }
 0xcc3   :  { %v2699_v13 = vpop.f32.mrf.mxu0 }
 0xcc4   :  { %v2700_v9 = vadd.f32 %v3080_v6, %v2699_v13  ;;  %v2707_v14 = vsel %vm274_vm1, %v2703_v12, 0.0 }
 0xcc5   :  { %2708 = vadd.xlane.f32.xlu0 %v2707_v14  ;;  %v3435_v16 = vpop.f32.mrf.mxu0 }
 0xcc6   :  { %v2704_v18 = vadd.f32 %v2700_v9, %v4434_v50  ;;  %v3503_v50 = vld [vmem:[#allocation26] sm:$0xff]  }
 0xcc7   :  { %3439 = vmatpush3.bf16.msra.mxu1 %v3503_v50 }
 0xcc8   :  { %v2710_v19 = vsel %vm274_vm1, %v2704_v18, 0.0 }
 0xcc9   :  { %2711 = vadd.xlane.f32.xlu1 %v2710_v19 }
 0xd4e   :  { %v2709_v20 = vpop.xlane.xlu0 %2708 }
 0xd4f   :  { %v2713_v17 = vmul.f32 0.03125, %v2709_v20 }
 0xd51   :  { %v2715_v21 = vsub.f32 %v2703_v12, %v2713_v17 }
 0xd52   :  { %v2712_v22 = vpop.xlane.xlu1 %2711 }
 0xd53   :  { %v2714_v23 = vmul.f32 0.03125, %v2712_v22  ;;  %v2717_v24 = vmul.f32 %v2715_v21, %v2715_v21 }
 0xd55   :  { %v2716_v25 = vsub.f32 %v2704_v18, %v2714_v23  ;;  %v2719_v49 = vsel %vm274_vm1, %v2717_v24, 0.0 }
 0xd56   :  { %2720 = vadd.xlane.f32.xlu0 %v2719_v49 }
 0xd57   :  { %v2718_v61 = vmul.f32 %v2716_v25, %v2716_v25 }
 0xd59   :  { %v2722_v26 = vsel %vm274_vm1, %v2718_v61, 0.0 }
 0xd5a   :  { %2723 = vadd.xlane.f32.xlu0 %v2722_v26 }
 0xddf   :  { %v2721_v28 = vpop.xlane.xlu0 %2720 }
 0xde0   :  { %v2725_v29 = vmul.f32 0.03125, %v2721_v28 }
 0xde2   :  { %v2727_v4 = vadd.f32 1e-05, %v2725_v29 }
 0xde3   :  { %v2724_v30 = vpop.xlane.xlu0 %2723 }
 0xde4   :  { %3576 = vrsqrt.f32 %v2727_v4  ;;  %v2726_v31 = vmul.f32 0.03125, %v2724_v30 }
 0xde6   :  { %v2728_v32 = vadd.f32 1e-05, %v2726_v31 }
 0xde8   :  { %3578 = vrsqrt.f32 %v2728_v32 }
 0xdf1   :  { %v3577_v33 = vpop.eup %3576 }
 0xdf2   :  { %v2731_v34 = vmul.f32 %v3577_v33, %v2715_v21 }
 0xdf4   :  { %v2739_v38 = vmul.f32 %v3085_v35, %v2731_v34 }
 0xdf5   :  { %v3579_v36 = vpop.eup %3578 }
 0xdf6   :  { %v2732_v37 = vmul.f32 %v3579_v36, %v2716_v25  ;;  %v2747_v40 = vadd.f32 %v3086_v56, %v2739_v38 }
 0xdf8   :  { %v2740_v39 = vmul.f32 %v3085_v35, %v2732_v37 }
 0xdfa   :  { %v2748_v41 = vadd.f32 %v3086_v56, %v2740_v39 }
 0xdfc   :  { %v2768_v42 = vpack.c.bf16 %v2748_v41, %v2747_v40 }
 0xdfe   :  { %3441 = vmatmul.mubr.msk.bf16.vlgmr.msra.gmra.mxu1 %vm274_vm1, %v2768_v42 }
 0xebe   :  { %v2829_v15 = vpop.f32.mrf.mxu1 }
 0xebf   :  { %v2830_v48 = vadd.f32 %v3087_v46, %v2829_v15 }
 0xec0   :  { %v3442_v47 = vpop.f32.mrf.mxu1 }
 0xec1   :  { %v2836_v54 = vmax.f32 %v2830_v48, 0.0 }
 0xec2   :  { %v2832_v51 = vpop.f32.mrf.mxu1 }
 0xec3   :  { %v2833_v52 = vadd.f32 %v3087_v46, %v2832_v51 }
 0xec4   :  { %v3443_v53 = vpop.f32.mrf.mxu1 }
 0xec5   :  { %v2837_v55 = vmax.f32 %v2833_v52, 0.0 }
 0xec7   :  { %v2838_v57 = vpack.c.bf16 %v2837_v55, %v2836_v54 }
 0xec9   :  { %3453 = vmatmul.mubr.msk.bf16.vlgmr.msra.gmra.mxu0 %vm2878_vm9, %v2838_v57 }
 0xf89   :  { %v2916_v58 = vpop.f32.mrf.mxu0 }
 0xf8a   :  { %v2917_v60 = vadd.f32 %v3091_v0, %v2916_v58 }
 0xf8b   :  { %v3454_v10 = vpop.f32.mrf.mxu0 }
 0xf8c   :  { %v2923_v59 = vadd.f32 %v2917_v60, %v2747_v40 }
 0xf8d   :  { %v2919_v62 = vpop.f32.mrf.mxu0 }
 0xf8e   :  { %v2920_v63 = vadd.f32 %v3091_v0, %v2919_v62  ;;  %v2927_v1 = vsel %vm274_vm1, %v2923_v59, 0.0 }
 0xf8f   :  { %2928 = vadd.xlane.f32.xlu1 %v2927_v1  ;;  %v3455_v2 = vpop.f32.mrf.mxu0 }
 0xf90   :  { %v2924_v5 = vadd.f32 %v2920_v63, %v2748_v41 }
 0xf92   :  { %v2930_v6 = vsel %vm274_vm1, %v2924_v5, 0.0 }
 0xf93   :  { %2931 = vadd.xlane.f32.xlu0 %v2930_v6 }
0x1018   :  { %v2929_v7 = vpop.xlane.xlu1 %2928 }
0x1019   :  { %v2933_v8 = vmul.f32 0.03125, %v2929_v7 }
0x101b   :  { %v2935_v11 = vsub.f32 %v2923_v59, %v2933_v8 }
0x101c   :  { %v2932_v12 = vpop.xlane.xlu0 %2931 }
0x101d   :  { %v2934_v13 = vmul.f32 0.03125, %v2932_v12  ;;  %v2937_v9 = vmul.f32 %v2935_v11, %v2935_v11 }
0x101f   :  { %v2936_v14 = vsub.f32 %v2924_v5, %v2934_v13  ;;  %v2939_v16 = vsel %vm274_vm1, %v2937_v9, 0.0 }
0x1020   :  { %2940 = vadd.xlane.f32.xlu1 %v2939_v16 }
0x1021   :  { %v2938_v18 = vmul.f32 %v2936_v14, %v2936_v14 }
0x1023   :  { %v2942_v19 = vsel %vm274_vm1, %v2938_v18, 0.0 }
0x1024   :  { %2943 = vadd.xlane.f32.xlu0 %v2942_v19 }
0x1025   :  { %3875 = shalt.err (!%p3872_p4)
}
0x1026   :  { %s3956_s1 = smov 128   ;;  %v3097_v49 = vld [vmem:[%s4731_s20] ss:$0 sm:$0xff] }
0x1027   :  { %2994 = dma.vmem_to_hbm [thread:$0]  %s2989_s19, 256, %s4734_s23, [#allocation31], %s3956_s1, %s3956_s1, %s3952_s25  }
0x1028   :  { %v3098_v26 = vld [vmem:[%s4732_s21] ss:$0 sm:$0xff]  ;;  %s3957_s23 = smov [#allocation29]  }
0x1029   :  { %s2976_s5 = sshll.u32 %s3957_s23, 4  ;;  %s2977_s5 = int_to_ptr.vmem [resolvable:$true] %s2976_s5 }
0x102a   :  { %s3884_s26 = scalar_lea.vmem %s2977_s5, 256  ;;  %p3889_p6 = scmp.lt.s32.totalorder %s2977_s5, %s2977_s5 }
0x102b   :  { %p3885_p5 = scmp.ne.s32.totalorder %s2977_s5, %s3884_s26  ;;  %p3890_p7 = scmp.lt.s32.totalorder %s3884_s26, %s3884_s26 }
0x102d   :  { %p3891_p8 = por %p3890_p7, %p3889_p6 }
0x102f   :  { %p3892_p9 = pnand %p3891_p8, %p3885_p5 }
0x10a9   :  { %v2941_v20 = vpop.xlane.xlu1 %2940 }
0x10aa   :  { %v2945_v17 = vmul.f32 0.03125, %v2941_v20 }
0x10ac   :  { %v2947_v21 = vadd.f32 1e-05, %v2945_v17 }
0x10ad   :  { %v2944_v22 = vpop.xlane.xlu0 %2943 }
0x10ae   :  { %3580 = vrsqrt.f32 %v2947_v21  ;;  %v2946_v23 = vmul.f32 0.03125, %v2944_v22 }
0x10b0   :  { %v2948_v24 = vadd.f32 1e-05, %v2946_v23 }
0x10b2   :  { %3582 = vrsqrt.f32 %v2948_v24 }
0x10bb   :  { %v3581_v25 = vpop.eup %3580 }
0x10bc   :  { %v2951_v61 = vmul.f32 %v3581_v25, %v2935_v11 }
0x10be   :  { %v2959_v27 = vmul.f32 %v3097_v49, %v2951_v61 }
0x10bf   :  { %v3583_v50 = vpop.eup %3582 }
0x10c0   :  { %v2952_v3 = vmul.f32 %v3583_v50, %v2936_v14  ;;  %v2967_v28 = vadd.f32 %v3098_v26, %v2959_v27 }
0x10c2   :  { %v2960_v29 = vmul.f32 %v3097_v49, %v2952_v3  ;;  %2969 = vst.msk [vmem:[#allocation29] sm:$0xff] %vm274_vm1, %v2967_v28 }
0x10c4   :  { %v2968_v4 = vadd.f32 %v3098_v26, %v2960_v29 }
0x10c6   :  { %2970 = vst.msk [vmem:[#allocation29 + $0x8] sm:$0xff] %vm274_vm1, %v2968_v4 }
0x10c7   :  { %3895 = shalt.err (!%p3892_p9)
}
0x10c8   :  { %2982 = dma.vmem_to_hbm [thread:$0]  %s2977_s5, 256, %s4733_s22, [#allocation8], %s3956_s1, %s3956_s1, %s3952_s25  }
0x10c9   :  { %3920 = dma.done.wait [#allocation8], 256  }
0x10ca   :  { %3921 = vsyncadd [#allocation8], 4294967040 }
0x10cb   :  { %3922 = dma.done.wait [#allocation31], 256  }
0x10cc   :  { %3923 = vsyncadd [#allocation31], 4294967040 }
0x10cd   :  { %3001 = vsyncpa [#allocation7], 1 }
0x10ce   :  { %3002 = vsyncpa [#allocation10], 1 }
0x10cf   :  { %3003 = vsyncpa [#allocation13], 1 }
0x10d0   :  { %3004 = vsyncpa [#allocation16], 1 }
0x10d1   :  { %3005 = vsyncpa [#allocation19], 1 }
0x10d2   :  { %3006 = vsyncpa [#allocation22], 1 }
0x10d3   :  { %3007 = vsyncpa [#allocation25], 1 }
0x10d4   :  { %3008 = vsyncpa [#allocation28], 1 }
0x10d5   :  { %3009 = vsyncpa [#allocation8], 1 }
0x10d6   :  { %3010 = vsyncpa [#allocation31], 1 }

</bundles_post_ra>
